<compile_context>
chip_gen: v6e
topology: v6e:2x2x1
jax: 0.10.0
libtpu: 0.0.40
codegen_flags: <defaults>
</compile_context>

<pallas_src>
import functools

import jax
import jax.numpy as jnp
from jax import lax
from jax.experimental import pallas as pl
from jax.experimental.pallas import tpu as pltpu

NCLASSES = 43
K = 5                 # conv kernel size (both convs)
H_IN = W_IN = 32      # input spatial size implied by 20*5*5 = 500 fc1 features
C_IN = 3


# ---------------------------------------------------------------------------
# Fused whole-network kernel: one grid step == one image.
# ---------------------------------------------------------------------------
def _net_fused_kernel(x_ref, w1t_ref, b1r_ref, w2t_ref, b2r_ref,
                      fc1w_ref, fc1b_ref, fc2w_ref, fc2b_ref,
                      o_ref, xb1_ref, xb2_ref, flat_ref, *, k):
    # ---- static shape bookkeeping (all Python ints) ----
    _, cin, h, w = x_ref.shape                 # (1, 3, 32, 32)
    oh1, ow1 = h - k + 1, w - k + 1            # 28, 28
    ph1, pw1 = oh1 // 2, ow1 // 2              # 14, 14
    c1 = b1r_ref.shape[1] // pw1               # 10  (conv1 out channels)
    h2, w2 = ph1, pw1                          # 14, 14
    oh2 = h2 - k + 1                           # 10
    ph2, pw2 = oh2 // 2, (w2 - k + 1) // 2     # 5, 5
    c2 = b2r_ref.shape[1] // pw2               # 20  (conv2 out channels)
    half1 = c1 * pw1                           # 140
    half2 = c2 * pw2                           # 100

    # ---- conv1: build block-Toeplitz LHS rows in VMEM, single MXU matmul ----
    x = x_ref[0]                               # (3, 32, 32), NCHW plane
    for ci in range(cin):
        for kh in range(k):
            col = (ci * k + kh) * w
            xb1_ref[:, col:col + w] = x[ci, kh:kh + oh1, :]
    y = jnp.dot(xb1_ref[...], w1t_ref[...],
                preferred_element_type=jnp.float32)          # (28, 280)

    # ---- 2x2 max-pool on the VPU, then bias + ReLU ----
    y = jnp.maximum(y[:, :half1], y[:, half1:])              # pool W -> (28, 140)
    y = y.reshape(ph1, 2, half1)
    y = jnp.maximum(y[:, 0, :], y[:, 1, :])                  # pool H -> (14, 140)
    a1 = jnp.maximum(y + b1r_ref[...], 0.0)                  # layout [h, c*pw1 + w]

    # ---- conv2 (Dropout2d is identity in eval mode) ----
    # TODO(synk): training-mode Dropout2d / F.dropout masks are not implemented.
    for ci in range(c1):
        for kh in range(k):
            col = (ci * k + kh) * w2
            xb2_ref[:, col:col + w2] = a1[kh:kh + oh2, ci * w2:(ci + 1) * w2]
    y2 = jnp.dot(xb2_ref[...], w2t_ref[...],
                 preferred_element_type=jnp.float32)         # (10, 200)

    y2 = jnp.maximum(y2[:, :half2], y2[:, half2:])           # pool W -> (10, 100)
    y2 = y2.reshape(ph2, 2, half2)
    y2 = jnp.maximum(y2[:, 0, :], y2[:, 1, :])               # pool H -> (5, 100)
    a2 = jnp.maximum(y2 + b2r_ref[...], 0.0)                 # layout [ph, c*pw2 + pw]

    # ---- flatten (fc1 weight rows are pre-permuted to this (h, c, w) order) ----
    for ph in range(ph2):
        flat_ref[:, ph * half2:(ph + 1) * half2] = a2[ph:ph + 1, :]

    # ---- fc1 -> ReLU -> (dropout identity) -> fc2 -> log_softmax ----
    hvec = jnp.dot(flat_ref[...], fc1w_ref[...],
                   preferred_element_type=jnp.float32) + fc1b_ref[...]
    hvec = jnp.maximum(hvec, 0.0)
    logits = jnp.dot(hvec, fc2w_ref[...],
                     preferred_element_type=jnp.float32) + fc2b_ref[...]
    m = jnp.max(logits, axis=-1, keepdims=True)
    s = logits - m
    lse = jnp.log(jnp.sum(jnp.exp(s), axis=-1, keepdims=True))
    o_ref[0] = s - lse


def net_forward_pallas(x_nchw, kp):
    n, cin, h, w = x_nchw.shape
    w1t, b1r, w2t, b2r = kp["w1t"], kp["b1r"], kp["w2t"], kp["b2r"]
    fc1w, fc1b, fc2w, fc2b = kp["fc1w"], kp["fc1b"], kp["fc2w"], kp["fc2b"]
    oh1 = h - K + 1
    oh2 = oh1 // 2 - K + 1

    kernel = functools.partial(_net_fused_kernel, k=K)
    out = pl.pallas_call(
        kernel,
        out_shape=jax.ShapeDtypeStruct((n, 1, NCLASSES), jnp.float32),
        grid=(n,),
        in_specs=[
            pl.BlockSpec((1, cin, h, w), lambda i: (i, 0, 0, 0)),
            pl.BlockSpec(w1t.shape, lambda i: (0, 0)),
            pl.BlockSpec(b1r.shape, lambda i: (0, 0)),
            pl.BlockSpec(w2t.shape, lambda i: (0, 0)),
            pl.BlockSpec(b2r.shape, lambda i: (0, 0)),
            pl.BlockSpec(fc1w.shape, lambda i: (0, 0)),
            pl.BlockSpec(fc1b.shape, lambda i: (0, 0)),
            pl.BlockSpec(fc2w.shape, lambda i: (0, 0)),
            pl.BlockSpec(fc2b.shape, lambda i: (0, 0)),
        ],
        out_specs=pl.BlockSpec((1, 1, NCLASSES), lambda i: (i, 0, 0)),
        scratch_shapes=[
            pltpu.VMEM((oh1, w1t.shape[0]), jnp.float32),   # conv1 Toeplitz LHS
            pltpu.VMEM((oh2, w2t.shape[0]), jnp.float32),   # conv2 Toeplitz LHS
            pltpu.VMEM((1, fc1w.shape[0]), jnp.float32),    # flattened features
        ],
        compiler_params=pltpu.CompilerParams(
            dimension_semantics=("parallel",)),
    )(x_nchw, w1t, b1r, w2t, b2r, fc1w, fc1b, fc2w, fc2b)
    return out.reshape(n, NCLASSES)


net_forward = jax.jit(net_forward_pallas)


# ---------------------------------------------------------------------------
# Wrapper-side weight preparation (runs once, outside the kernel).
# ---------------------------------------------------------------------------
def _conv_pool_toeplitz(wgt, w_in):
    """Fold the width-axis sliding window of a VALID KxK conv into a
    block-Toeplitz matmul RHS.  Rows are ordered (cin, kh, input_w); columns
    are ordered (w-parity, cout, pooled_w) so the width half of the 2x2 max
    pool becomes a max of two contiguous lane halves inside the kernel."""
    cout, cin, k, _ = wgt.shape
    ow = w_in - k + 1
    pw = ow // 2
    t = jnp.arange(w_in)[:, None]
    o = jnp.arange(ow)[None, :]
    kw = t - o
    valid = (kw >= 0) & (kw < k)
    kw_c = jnp.clip(kw, 0, k - 1)
    wt = jnp.transpose(wgt, (1, 2, 0, 3))            # (cin, kh, cout, kw)
    g = wt[:, :, :, kw_c]                            # (cin, kh, cout, w_in, ow)
    g = jnp.where(valid[None, None, None, :, :], g, 0.0)
    g = jnp.transpose(g, (0, 1, 3, 2, 4))            # (cin, kh, w_in, cout, ow)
    g = g.reshape(cin, k, w_in, cout, pw, 2)         # ow -> (pw, parity)
    g = jnp.transpose(g, (0, 1, 2, 5, 3, 4))         # (cin, kh, w_in, parity, cout, pw)
    return g.reshape(cin * k * w_in, 2 * cout * pw)


def prepare_params(p):
    pw1 = (W_IN - K + 1) // 2            # 14
    pw2 = (pw1 - K + 1) // 2             # 5
    c2 = p["conv2_w"].shape[0]           # 20
    w1t = _conv_pool_toeplitz(p["conv1_w"], W_IN)    # (480, 280)
    b1r = jnp.repeat(p["conv1_b"], pw1)[None, :]     # (1, 140)
    w2t = _conv_pool_toeplitz(p["conv2_w"], pw1)     # (700, 200)
    b2r = jnp.repeat(p["conv2_b"], pw2)[None, :]     # (1, 100)
    # Kernel flatten order is (ph, c, pw); PyTorch's view(-1, 500) is (c, ph, pw).
    # Absorb the reorder into fc1's weight rows.
    ph_i = jnp.arange(pw2)
    co_i = jnp.arange(c2)
    pw_i = jnp.arange(pw2)
    perm = (co_i[None, :, None] * (pw2 * pw2)
            + ph_i[:, None, None] * pw2
            + pw_i[None, None, :]).reshape(-1)       # (500,)
    fc1w = p["fc1_w"][perm, :]
    return dict(w1t=w1t, b1r=b1r, w2t=w2t, b2r=b2r,
                fc1w=fc1w, fc1b=p["fc1_b"][None, :],
                fc2w=p["fc2_w"], fc2b=p["fc2_b"][None, :])


# ---------------------------------------------------------------------------
# Deterministic PyTorch-layout parameters + pure-XLA reference for validation.
# ---------------------------------------------------------------------------
def init_params(key):
    ks = jax.random.split(key, 8)

    def u(k_, shape, fan_in):
        b = 1.0 / jnp.sqrt(jnp.float32(fan_in))
        return jax.random.uniform(k_, shape, jnp.float32, -b, b)

    return dict(
        conv1_w=u(ks[0], (10, C_IN, K, K), C_IN * K * K),
        conv1_b=u(ks[1], (10,), C_IN * K * K),
        conv2_w=u(ks[2], (20, 10, K, K), 10 * K * K),
        conv2_b=u(ks[3], (20,), 10 * K * K),
        fc1_w=u(ks[4], (500, 50), 500),
        fc1_b=u(ks[5], (50,), 500),
        fc2_w=u(ks[6], (50, NCLASSES), 50),
        fc2_b=u(ks[7], (NCLASSES,), 50),
    )


def net_reference(x_nchw, p):
    dn = ("NCHW", "OIHW", "NCHW")
    hi = lax.Precision.HIGHEST
    y = lax.conv_general_dilated(x_nchw, p["conv1_w"], (1, 1), "VALID",
                                 dimension_numbers=dn, precision=hi)
    y = y + p["conv1_b"][None, :, None, None]
    y = lax.reduce_window(y, -jnp.inf, lax.max, (1, 1, 2, 2), (1, 1, 2, 2), "VALID")
    y = jnp.maximum(y, 0.0)
    y = lax.conv_general_dilated(y, p["conv2_w"], (1, 1), "VALID",
                                 dimension_numbers=dn, precision=hi)
    y = y + p["conv2_b"][None, :, None, None]
    y = lax.reduce_window(y, -jnp.inf, lax.max, (1, 1, 2, 2), (1, 1, 2, 2), "VALID")
    y = jnp.maximum(y, 0.0)
    v = y.reshape(y.shape[0], -1)                     # PyTorch (C,H,W) flatten
    hvec = jnp.maximum(jnp.dot(v, p["fc1_w"], precision=hi) + p["fc1_b"], 0.0)
    logits = jnp.dot(hvec, p["fc2_w"], precision=hi) + p["fc2_b"]
    return jax.nn.log_softmax(logits, axis=-1)


if __name__ == "__main__":
    key = jax.random.PRNGKey(0)
    pkey, xkey = jax.random.split(key)
    params = init_params(pkey)
    kparams = prepare_params(params)
    # 32x32 RGB input implied by the forward pass (20*5*5 = 500 fc1 features).
    x = jax.random.normal(xkey, (2, C_IN, H_IN, W_IN), dtype=jnp.float32)

    out = jax.block_until_ready(net_forward(x, kparams))
    assert out.shape == (2, NCLASSES), out.shape
    # log_softmax sanity: probabilities sum to 1.
    assert jnp.allclose(jnp.sum(jnp.exp(out), axis=-1), 1.0, atol=1e-3)
    # Cross-check the fused kernel against a pure-XLA reference forward pass.
    ref = net_reference(x, params)
    assert jnp.allclose(out, ref, atol=1e-2, rtol=1e-2), \
        float(jnp.max(jnp.abs(out - ref)))
    print("KERNEL_OK")
</pallas_src>

<mosaic_0001>
module attributes {stable_mosaic.version = 11 : i64} {
  func.func @_net_fused_kernel(%arg0: i32, %arg1: memref<1x3x32x32xf32, #tpu.memory_space<vmem>>, %arg2: memref<480x280xf32, #tpu.memory_space<vmem>>, %arg3: memref<1x140xf32, #tpu.memory_space<vmem>>, %arg4: memref<700x200xf32, #tpu.memory_space<vmem>>, %arg5: memref<1x100xf32, #tpu.memory_space<vmem>>, %arg6: memref<500x50xf32, #tpu.memory_space<vmem>>, %arg7: memref<1x50xf32, #tpu.memory_space<vmem>>, %arg8: memref<50x43xf32, #tpu.memory_space<vmem>>, %arg9: memref<1x43xf32, #tpu.memory_space<vmem>>, %arg10: memref<1x1x43xf32, #tpu.memory_space<vmem>>, %arg11: memref<28x480xf32, #tpu.memory_space<vmem>>, %arg12: memref<10x700xf32, #tpu.memory_space<vmem>>, %arg13: memref<1x500xf32, #tpu.memory_space<vmem>>) attributes {dimension_semantics = [#tpu.dimension_semantics<parallel>], iteration_bounds = array<i64: 2>, scalar_prefetch = 0 : i64, scratch_operands = 3 : i64, tpu.core_type = #tpu.core_type<tc>, window_params = [{transform_indices = @transform_0, window_bounds = array<i64: 1, 3, 32, 32>}, {pipeline_mode = #tpu.pipeline_mode<synchronous>, transform_indices = @transform_1, window_bounds = array<i64: 480, 280>}, {pipeline_mode = #tpu.pipeline_mode<synchronous>, transform_indices = @transform_2, window_bounds = array<i64: 1, 140>}, {pipeline_mode = #tpu.pipeline_mode<synchronous>, transform_indices = @transform_3, window_bounds = array<i64: 700, 200>}, {pipeline_mode = #tpu.pipeline_mode<synchronous>, transform_indices = @transform_4, window_bounds = array<i64: 1, 100>}, {pipeline_mode = #tpu.pipeline_mode<synchronous>, transform_indices = @transform_5, window_bounds = array<i64: 500, 50>}, {pipeline_mode = #tpu.pipeline_mode<synchronous>, transform_indices = @transform_6, window_bounds = array<i64: 1, 50>}, {pipeline_mode = #tpu.pipeline_mode<synchronous>, transform_indices = @transform_7, window_bounds = array<i64: 50, 43>}, {pipeline_mode = #tpu.pipeline_mode<synchronous>, transform_indices = @transform_8, window_bounds = array<i64: 1, 43>}, {transform_indices = @transform_9, window_bounds = array<i64: 1, 1, 43>}]} {
    %c0 = arith.constant 0 : index
    %c0_0 = arith.constant 0 : index
    %c0_1 = arith.constant 0 : index
    %c0_2 = arith.constant 0 : index
    %0 = vector.load %arg1[%c0, %c0_0, %c0_1, %c0_2] : memref<1x3x32x32xf32, #tpu.memory_space<vmem>>, vector<1x3x32x32xf32>
    %1 = vector.shape_cast %0 : vector<1x3x32x32xf32> to vector<3x32x32xf32>
    %2 = vector.extract_strided_slice %1 {offsets = [0, 0, 0], sizes = [1, 28, 32], strides = [1, 1, 1]} : vector<3x32x32xf32> to vector<1x28x32xf32>
    %3 = vector.shape_cast %2 : vector<1x28x32xf32> to vector<28x32xf32>
    %c0_3 = arith.constant 0 : index
    %c0_4 = arith.constant 0 : index
    %4 = vector.load %arg11[%c0_3, %c0_4] : memref<28x480xf32, #tpu.memory_space<vmem>>, vector<28x32xf32>
    tpu.vector_store %arg11[%c0_3, %c0_4], %3 {strides = array<i32>} : memref<28x480xf32, #tpu.memory_space<vmem>>, vector<28x32xf32>,
    %5 = vector.extract_strided_slice %1 {offsets = [0, 1, 0], sizes = [1, 28, 32], strides = [1, 1, 1]} : vector<3x32x32xf32> to vector<1x28x32xf32>
    %6 = vector.shape_cast %5 : vector<1x28x32xf32> to vector<28x32xf32>
    %c0_5 = arith.constant 0 : index
    %c32 = arith.constant 32 : index
    %7 = vector.load %arg11[%c0_5, %c32] : memref<28x480xf32, #tpu.memory_space<vmem>>, vector<28x32xf32>
    tpu.vector_store %arg11[%c0_5, %c32], %6 {strides = array<i32>} : memref<28x480xf32, #tpu.memory_space<vmem>>, vector<28x32xf32>,
    %8 = vector.extract_strided_slice %1 {offsets = [0, 2, 0], sizes = [1, 28, 32], strides = [1, 1, 1]} : vector<3x32x32xf32> to vector<1x28x32xf32>
    %9 = vector.shape_cast %8 : vector<1x28x32xf32> to vector<28x32xf32>
    %c0_6 = arith.constant 0 : index
    %c64 = arith.constant 64 : index
    %10 = vector.load %arg11[%c0_6, %c64] : memref<28x480xf32, #tpu.memory_space<vmem>>, vector<28x32xf32>
    tpu.vector_store %arg11[%c0_6, %c64], %9 {strides = array<i32>} : memref<28x480xf32, #tpu.memory_space<vmem>>, vector<28x32xf32>,
    %11 = vector.extract_strided_slice %1 {offsets = [0, 3, 0], sizes = [1, 28, 32], strides = [1, 1, 1]} : vector<3x32x32xf32> to vector<1x28x32xf32>
    %12 = vector.shape_cast %11 : vector<1x28x32xf32> to vector<28x32xf32>
    %c0_7 = arith.constant 0 : index
    %c96 = arith.constant 96 : index
    %13 = vector.load %arg11[%c0_7, %c96] : memref<28x480xf32, #tpu.memory_space<vmem>>, vector<28x32xf32>
    tpu.vector_store %arg11[%c0_7, %c96], %12 {strides = array<i32>} : memref<28x480xf32, #tpu.memory_space<vmem>>, vector<28x32xf32>,
    %14 = vector.extract_strided_slice %1 {offsets = [0, 4, 0], sizes = [1, 28, 32], strides = [1, 1, 1]} : vector<3x32x32xf32> to vector<1x28x32xf32>
    %15 = vector.shape_cast %14 : vector<1x28x32xf32> to vector<28x32xf32>
    %c0_8 = arith.constant 0 : index
    %c128 = arith.constant 128 : index
    %16 = vector.load %arg11[%c0_8, %c128] : memref<28x480xf32, #tpu.memory_space<vmem>>, vector<28x32xf32>
    tpu.vector_store %arg11[%c0_8, %c128], %15 {strides = array<i32>} : memref<28x480xf32, #tpu.memory_space<vmem>>, vector<28x32xf32>,
    %17 = vector.extract_strided_slice %1 {offsets = [1, 0, 0], sizes = [1, 28, 32], strides = [1, 1, 1]} : vector<3x32x32xf32> to vector<1x28x32xf32>
    %18 = vector.shape_cast %17 : vector<1x28x32xf32> to vector<28x32xf32>
    %c0_9 = arith.constant 0 : index
    %c160 = arith.constant 160 : index
    %19 = vector.load %arg11[%c0_9, %c160] : memref<28x480xf32, #tpu.memory_space<vmem>>, vector<28x32xf32>
    tpu.vector_store %arg11[%c0_9, %c160], %18 {strides = array<i32>} : memref<28x480xf32, #tpu.memory_space<vmem>>, vector<28x32xf32>,
    %20 = vector.extract_strided_slice %1 {offsets = [1, 1, 0], sizes = [1, 28, 32], strides = [1, 1, 1]} : vector<3x32x32xf32> to vector<1x28x32xf32>
    %21 = vector.shape_cast %20 : vector<1x28x32xf32> to vector<28x32xf32>
    %c0_10 = arith.constant 0 : index
    %c192 = arith.constant 192 : index
    %22 = vector.load %arg11[%c0_10, %c192] : memref<28x480xf32, #tpu.memory_space<vmem>>, vector<28x32xf32>
    tpu.vector_store %arg11[%c0_10, %c192], %21 {strides = array<i32>} : memref<28x480xf32, #tpu.memory_space<vmem>>, vector<28x32xf32>,
    %23 = vector.extract_strided_slice %1 {offsets = [1, 2, 0], sizes = [1, 28, 32], strides = [1, 1, 1]} : vector<3x32x32xf32> to vector<1x28x32xf32>
    %24 = vector.shape_cast %23 : vector<1x28x32xf32> to vector<28x32xf32>
    %c0_11 = arith.constant 0 : index
    %c224 = arith.constant 224 : index
    %25 = vector.load %arg11[%c0_11, %c224] : memref<28x480xf32, #tpu.memory_space<vmem>>, vector<28x32xf32>
    tpu.vector_store %arg11[%c0_11, %c224], %24 {strides = array<i32>} : memref<28x480xf32, #tpu.memory_space<vmem>>, vector<28x32xf32>,
    %26 = vector.extract_strided_slice %1 {offsets = [1, 3, 0], sizes = [1, 28, 32], strides = [1, 1, 1]} : vector<3x32x32xf32> to vector<1x28x32xf32>
    %27 = vector.shape_cast %26 : vector<1x28x32xf32> to vector<28x32xf32>
    %c0_12 = arith.constant 0 : index
    %c256 = arith.constant 256 : index
    %28 = vector.load %arg11[%c0_12, %c256] : memref<28x480xf32, #tpu.memory_space<vmem>>, vector<28x32xf32>
    tpu.vector_store %arg11[%c0_12, %c256], %27 {strides = array<i32>} : memref<28x480xf32, #tpu.memory_space<vmem>>, vector<28x32xf32>,
    %29 = vector.extract_strided_slice %1 {offsets = [1, 4, 0], sizes = [1, 28, 32], strides = [1, 1, 1]} : vector<3x32x32xf32> to vector<1x28x32xf32>
    %30 = vector.shape_cast %29 : vector<1x28x32xf32> to vector<28x32xf32>
    %c0_13 = arith.constant 0 : index
    %c288 = arith.constant 288 : index
    %31 = vector.load %arg11[%c0_13, %c288] : memref<28x480xf32, #tpu.memory_space<vmem>>, vector<28x32xf32>
    tpu.vector_store %arg11[%c0_13, %c288], %30 {strides = array<i32>} : memref<28x480xf32, #tpu.memory_space<vmem>>, vector<28x32xf32>,
    %32 = vector.extract_strided_slice %1 {offsets = [2, 0, 0], sizes = [1, 28, 32], strides = [1, 1, 1]} : vector<3x32x32xf32> to vector<1x28x32xf32>
    %33 = vector.shape_cast %32 : vector<1x28x32xf32> to vector<28x32xf32>
    %c0_14 = arith.constant 0 : index
    %c320 = arith.constant 320 : index
    %34 = vector.load %arg11[%c0_14, %c320] : memref<28x480xf32, #tpu.memory_space<vmem>>, vector<28x32xf32>
    tpu.vector_store %arg11[%c0_14, %c320], %33 {strides = array<i32>} : memref<28x480xf32, #tpu.memory_space<vmem>>, vector<28x32xf32>,
    %35 = vector.extract_strided_slice %1 {offsets = [2, 1, 0], sizes = [1, 28, 32], strides = [1, 1, 1]} : vector<3x32x32xf32> to vector<1x28x32xf32>
    %36 = vector.shape_cast %35 : vector<1x28x32xf32> to vector<28x32xf32>
    %c0_15 = arith.constant 0 : index
    %c352 = arith.constant 352 : index
    %37 = vector.load %arg11[%c0_15, %c352] : memref<28x480xf32, #tpu.memory_space<vmem>>, vector<28x32xf32>
    tpu.vector_store %arg11[%c0_15, %c352], %36 {strides = array<i32>} : memref<28x480xf32, #tpu.memory_space<vmem>>, vector<28x32xf32>,
    %38 = vector.extract_strided_slice %1 {offsets = [2, 2, 0], sizes = [1, 28, 32], strides = [1, 1, 1]} : vector<3x32x32xf32> to vector<1x28x32xf32>
    %39 = vector.shape_cast %38 : vector<1x28x32xf32> to vector<28x32xf32>
    %c0_16 = arith.constant 0 : index
    %c384 = arith.constant 384 : index
    %40 = vector.load %arg11[%c0_16, %c384] : memref<28x480xf32, #tpu.memory_space<vmem>>, vector<28x32xf32>
    tpu.vector_store %arg11[%c0_16, %c384], %39 {strides = array<i32>} : memref<28x480xf32, #tpu.memory_space<vmem>>, vector<28x32xf32>,
    %41 = vector.extract_strided_slice %1 {offsets = [2, 3, 0], sizes = [1, 28, 32], strides = [1, 1, 1]} : vector<3x32x32xf32> to vector<1x28x32xf32>
    %42 = vector.shape_cast %41 : vector<1x28x32xf32> to vector<28x32xf32>
    %c0_17 = arith.constant 0 : index
    %c416 = arith.constant 416 : index
    %43 = vector.load %arg11[%c0_17, %c416] : memref<28x480xf32, #tpu.memory_space<vmem>>, vector<28x32xf32>
    tpu.vector_store %arg11[%c0_17, %c416], %42 {strides = array<i32>} : memref<28x480xf32, #tpu.memory_space<vmem>>, vector<28x32xf32>,
    %44 = vector.extract_strided_slice %1 {offsets = [2, 4, 0], sizes = [1, 28, 32], strides = [1, 1, 1]} : vector<3x32x32xf32> to vector<1x28x32xf32>
    %45 = vector.shape_cast %44 : vector<1x28x32xf32> to vector<28x32xf32>
    %c0_18 = arith.constant 0 : index
    %c448 = arith.constant 448 : index
    %46 = vector.load %arg11[%c0_18, %c448] : memref<28x480xf32, #tpu.memory_space<vmem>>, vector<28x32xf32>
    tpu.vector_store %arg11[%c0_18, %c448], %45 {strides = array<i32>} : memref<28x480xf32, #tpu.memory_space<vmem>>, vector<28x32xf32>,
    %c0_19 = arith.constant 0 : index
    %c0_20 = arith.constant 0 : index
    %47 = vector.load %arg11[%c0_19, %c0_20] : memref<28x480xf32, #tpu.memory_space<vmem>>, vector<28x480xf32>
    %c0_21 = arith.constant 0 : index
    %c0_22 = arith.constant 0 : index
    %48 = vector.load %arg2[%c0_21, %c0_22] : memref<480x280xf32, #tpu.memory_space<vmem>>, vector<480x280xf32>
    %cst = arith.constant dense<0.000000e+00> : vector<28x280xf32>
    %49 = tpu.matmul %47, %48, %cst {dimension_numbers = #tpu.dot_dimension_numbers<[1], [0], [0], [1], [0, 0, 1, 1], [], []>} : vector<28x480xf32>, vector<480x280xf32>, vector<28x280xf32> -> vector<28x280xf32>
    %50 = vector.extract_strided_slice %49 {offsets = [0, 0], sizes = [28, 140], strides = [1, 1]} : vector<28x280xf32> to vector<28x140xf32>
    %51 = vector.extract_strided_slice %49 {offsets = [0, 140], sizes = [28, 140], strides = [1, 1]} : vector<28x280xf32> to vector<28x140xf32>
    %52 = arith.maximumf %50, %51 : vector<28x140xf32>
    %53 = vector.shape_cast %52 : vector<28x140xf32> to vector<14x2x140xf32>
    %54 = vector.extract_strided_slice %53 {offsets = [0, 0, 0], sizes = [14, 1, 140], strides = [1, 1, 1]} : vector<14x2x140xf32> to vector<14x1x140xf32>
    %55 = vector.shape_cast %54 : vector<14x1x140xf32> to vector<14x140xf32>
    %56 = vector.extract_strided_slice %53 {offsets = [0, 1, 0], sizes = [14, 1, 140], strides = [1, 1, 1]} : vector<14x2x140xf32> to vector<14x1x140xf32>
    %57 = vector.shape_cast %56 : vector<14x1x140xf32> to vector<14x140xf32>
    %58 = arith.maximumf %55, %57 : vector<14x140xf32>
    %c0_23 = arith.constant 0 : index
    %c0_24 = arith.constant 0 : index
    %59 = vector.load %arg3[%c0_23, %c0_24] : memref<1x140xf32, #tpu.memory_space<vmem>>, vector<1x140xf32>
    %60 = vector.broadcast %59 : vector<1x140xf32> to vector<14x140xf32>
    %61 = arith.addf %58, %60 : vector<14x140xf32>
    %cst_25 = arith.constant 0.000000e+00 : f32
    %62 = vector.broadcast %cst_25 : f32 to vector<14x140xf32>
    %63 = arith.maximumf %61, %62 : vector<14x140xf32>
    %64 = vector.extract_strided_slice %63 {offsets = [0, 0], sizes = [10, 14], strides = [1, 1]} : vector<14x140xf32> to vector<10x14xf32>
    %c0_26 = arith.constant 0 : index
    %c0_27 = arith.constant 0 : index
    %65 = vector.load %arg12[%c0_26, %c0_27] : memref<10x700xf32, #tpu.memory_space<vmem>>, vector<10x14xf32>
    tpu.vector_store %arg12[%c0_26, %c0_27], %64 {strides = array<i32>} : memref<10x700xf32, #tpu.memory_space<vmem>>, vector<10x14xf32>,
    %66 = vector.extract_strided_slice %63 {offsets = [1, 0], sizes = [10, 14], strides = [1, 1]} : vector<14x140xf32> to vector<10x14xf32>
    %c0_28 = arith.constant 0 : index
    %c14 = arith.constant 14 : index
    %67 = vector.load %arg12[%c0_28, %c14] : memref<10x700xf32, #tpu.memory_space<vmem>>, vector<10x14xf32>
    tpu.vector_store %arg12[%c0_28, %c14], %66 {strides = array<i32>} : memref<10x700xf32, #tpu.memory_space<vmem>>, vector<10x14xf32>,
    %68 = vector.extract_strided_slice %63 {offsets = [2, 0], sizes = [10, 14], strides = [1, 1]} : vector<14x140xf32> to vector<10x14xf32>
    %c0_29 = arith.constant 0 : index
    %c28 = arith.constant 28 : index
    %69 = vector.load %arg12[%c0_29, %c28] : memref<10x700xf32, #tpu.memory_space<vmem>>, vector<10x14xf32>
    tpu.vector_store %arg12[%c0_29, %c28], %68 {strides = array<i32>} : memref<10x700xf32, #tpu.memory_space<vmem>>, vector<10x14xf32>,
    %70 = vector.extract_strided_slice %63 {offsets = [3, 0], sizes = [10, 14], strides = [1, 1]} : vector<14x140xf32> to vector<10x14xf32>
    %c0_30 = arith.constant 0 : index
    %c42 = arith.constant 42 : index
    %71 = vector.load %arg12[%c0_30, %c42] : memref<10x700xf32, #tpu.memory_space<vmem>>, vector<10x14xf32>
    tpu.vector_store %arg12[%c0_30, %c42], %70 {strides = array<i32>} : memref<10x700xf32, #tpu.memory_space<vmem>>, vector<10x14xf32>,
    %72 = vector.extract_strided_slice %63 {offsets = [4, 0], sizes = [10, 14], strides = [1, 1]} : vector<14x140xf32> to vector<10x14xf32>
    %c0_31 = arith.constant 0 : index
    %c56 = arith.constant 56 : index
    %73 = vector.load %arg12[%c0_31, %c56] : memref<10x700xf32, #tpu.memory_space<vmem>>, vector<10x14xf32>
    tpu.vector_store %arg12[%c0_31, %c56], %72 {strides = array<i32>} : memref<10x700xf32, #tpu.memory_space<vmem>>, vector<10x14xf32>,
    %74 = vector.extract_strided_slice %63 {offsets = [0, 14], sizes = [10, 14], strides = [1, 1]} : vector<14x140xf32> to vector<10x14xf32>
    %c0_32 = arith.constant 0 : index
    %c70 = arith.constant 70 : index
    %75 = vector.load %arg12[%c0_32, %c70] : memref<10x700xf32, #tpu.memory_space<vmem>>, vector<10x14xf32>
    tpu.vector_store %arg12[%c0_32, %c70], %74 {strides = array<i32>} : memref<10x700xf32, #tpu.memory_space<vmem>>, vector<10x14xf32>,
    %76 = vector.extract_strided_slice %63 {offsets = [1, 14], sizes = [10, 14], strides = [1, 1]} : vector<14x140xf32> to vector<10x14xf32>
    %c0_33 = arith.constant 0 : index
    %c84 = arith.constant 84 : index
    %77 = vector.load %arg12[%c0_33, %c84] : memref<10x700xf32, #tpu.memory_space<vmem>>, vector<10x14xf32>
    tpu.vector_store %arg12[%c0_33, %c84], %76 {strides = array<i32>} : memref<10x700xf32, #tpu.memory_space<vmem>>, vector<10x14xf32>,
    %78 = vector.extract_strided_slice %63 {offsets = [2, 14], sizes = [10, 14], strides = [1, 1]} : vector<14x140xf32> to vector<10x14xf32>
    %c0_34 = arith.constant 0 : index
    %c98 = arith.constant 98 : index
    %79 = vector.load %arg12[%c0_34, %c98] : memref<10x700xf32, #tpu.memory_space<vmem>>, vector<10x14xf32>
    tpu.vector_store %arg12[%c0_34, %c98], %78 {strides = array<i32>} : memref<10x700xf32, #tpu.memory_space<vmem>>, vector<10x14xf32>,
    %80 = vector.extract_strided_slice %63 {offsets = [3, 14], sizes = [10, 14], strides = [1, 1]} : vector<14x140xf32> to vector<10x14xf32>
    %c0_35 = arith.constant 0 : index
    %c112 = arith.constant 112 : index
    %81 = vector.load %arg12[%c0_35, %c112] : memref<10x700xf32, #tpu.memory_space<vmem>>, vector<10x14xf32>
    tpu.vector_store %arg12[%c0_35, %c112], %80 {strides = array<i32>} : memref<10x700xf32, #tpu.memory_space<vmem>>, vector<10x14xf32>,
    %82 = vector.extract_strided_slice %63 {offsets = [4, 14], sizes = [10, 14], strides = [1, 1]} : vector<14x140xf32> to vector<10x14xf32>
    %c0_36 = arith.constant 0 : index
    %c126 = arith.constant 126 : index
    %83 = vector.load %arg12[%c0_36, %c126] : memref<10x700xf32, #tpu.memory_space<vmem>>, vector<10x14xf32>
    tpu.vector_store %arg12[%c0_36, %c126], %82 {strides = array<i32>} : memref<10x700xf32, #tpu.memory_space<vmem>>, vector<10x14xf32>,
    %84 = vector.extract_strided_slice %63 {offsets = [0, 28], sizes = [10, 14], strides = [1, 1]} : vector<14x140xf32> to vector<10x14xf32>
    %c0_37 = arith.constant 0 : index
    %c140 = arith.constant 140 : index
    %85 = vector.load %arg12[%c0_37, %c140] : memref<10x700xf32, #tpu.memory_space<vmem>>, vector<10x14xf32>
    tpu.vector_store %arg12[%c0_37, %c140], %84 {strides = array<i32>} : memref<10x700xf32, #tpu.memory_space<vmem>>, vector<10x14xf32>,
    %86 = vector.extract_strided_slice %63 {offsets = [1, 28], sizes = [10, 14], strides = [1, 1]} : vector<14x140xf32> to vector<10x14xf32>
    %c0_38 = arith.constant 0 : index
    %c154 = arith.constant 154 : index
    %87 = vector.load %arg12[%c0_38, %c154] : memref<10x700xf32, #tpu.memory_space<vmem>>, vector<10x14xf32>
    tpu.vector_store %arg12[%c0_38, %c154], %86 {strides = array<i32>} : memref<10x700xf32, #tpu.memory_space<vmem>>, vector<10x14xf32>,
    %88 = vector.extract_strided_slice %63 {offsets = [2, 28], sizes = [10, 14], strides = [1, 1]} : vector<14x140xf32> to vector<10x14xf32>
    %c0_39 = arith.constant 0 : index
    %c168 = arith.constant 168 : index
    %89 = vector.load %arg12[%c0_39, %c168] : memref<10x700xf32, #tpu.memory_space<vmem>>, vector<10x14xf32>
    tpu.vector_store %arg12[%c0_39, %c168], %88 {strides = array<i32>} : memref<10x700xf32, #tpu.memory_space<vmem>>, vector<10x14xf32>,
    %90 = vector.extract_strided_slice %63 {offsets = [3, 28], sizes = [10, 14], strides = [1, 1]} : vector<14x140xf32> to vector<10x14xf32>
    %c0_40 = arith.constant 0 : index
    %c182 = arith.constant 182 : index
    %91 = vector.load %arg12[%c0_40, %c182] : memref<10x700xf32, #tpu.memory_space<vmem>>, vector<10x14xf32>
    tpu.vector_store %arg12[%c0_40, %c182], %90 {strides = array<i32>} : memref<10x700xf32, #tpu.memory_space<vmem>>, vector<10x14xf32>,
    %92 = vector.extract_strided_slice %63 {offsets = [4, 28], sizes = [10, 14], strides = [1, 1]} : vector<14x140xf32> to vector<10x14xf32>
    %c0_41 = arith.constant 0 : index
    %c196 = arith.constant 196 : index
    %93 = vector.load %arg12[%c0_41, %c196] : memref<10x700xf32, #tpu.memory_space<vmem>>, vector<10x14xf32>
    tpu.vector_store %arg12[%c0_41, %c196], %92 {strides = array<i32>} : memref<10x700xf32, #tpu.memory_space<vmem>>, vector<10x14xf32>,
    %94 = vector.extract_strided_slice %63 {offsets = [0, 42], sizes = [10, 14], strides = [1, 1]} : vector<14x140xf32> to vector<10x14xf32>
    %c0_42 = arith.constant 0 : index
    %c210 = arith.constant 210 : index
    %95 = vector.load %arg12[%c0_42, %c210] : memref<10x700xf32, #tpu.memory_space<vmem>>, vector<10x14xf32>
    tpu.vector_store %arg12[%c0_42, %c210], %94 {strides = array<i32>} : memref<10x700xf32, #tpu.memory_space<vmem>>, vector<10x14xf32>,
    %96 = vector.extract_strided_slice %63 {offsets = [1, 42], sizes = [10, 14], strides = [1, 1]} : vector<14x140xf32> to vector<10x14xf32>
    %c0_43 = arith.constant 0 : index
    %c224_44 = arith.constant 224 : index
    %97 = vector.load %arg12[%c0_43, %c224_44] : memref<10x700xf32, #tpu.memory_space<vmem>>, vector<10x14xf32>
    tpu.vector_store %arg12[%c0_43, %c224_44], %96 {strides = array<i32>} : memref<10x700xf32, #tpu.memory_space<vmem>>, vector<10x14xf32>,
    %98 = vector.extract_strided_slice %63 {offsets = [2, 42], sizes = [10, 14], strides = [1, 1]} : vector<14x140xf32> to vector<10x14xf32>
    %c0_45 = arith.constant 0 : index
    %c238 = arith.constant 238 : index
    %99 = vector.load %arg12[%c0_45, %c238] : memref<10x700xf32, #tpu.memory_space<vmem>>, vector<10x14xf32>
    tpu.vector_store %arg12[%c0_45, %c238], %98 {strides = array<i32>} : memref<10x700xf32, #tpu.memory_space<vmem>>, vector<10x14xf32>,
    %100 = vector.extract_strided_slice %63 {offsets = [3, 42], sizes = [10, 14], strides = [1, 1]} : vector<14x140xf32> to vector<10x14xf32>
    %c0_46 = arith.constant 0 : index
    %c252 = arith.constant 252 : index
    %101 = vector.load %arg12[%c0_46, %c252] : memref<10x700xf32, #tpu.memory_space<vmem>>, vector<10x14xf32>
    tpu.vector_store %arg12[%c0_46, %c252], %100 {strides = array<i32>} : memref<10x700xf32, #tpu.memory_space<vmem>>, vector<10x14xf32>,
    %102 = vector.extract_strided_slice %63 {offsets = [4, 42], sizes = [10, 14], strides = [1, 1]} : vector<14x140xf32> to vector<10x14xf32>
    %c0_47 = arith.constant 0 : index
    %c266 = arith.constant 266 : index
    %103 = vector.load %arg12[%c0_47, %c266] : memref<10x700xf32, #tpu.memory_space<vmem>>, vector<10x14xf32>
    tpu.vector_store %arg12[%c0_47, %c266], %102 {strides = array<i32>} : memref<10x700xf32, #tpu.memory_space<vmem>>, vector<10x14xf32>,
    %104 = vector.extract_strided_slice %63 {offsets = [0, 56], sizes = [10, 14], strides = [1, 1]} : vector<14x140xf32> to vector<10x14xf32>
    %c0_48 = arith.constant 0 : index
    %c280 = arith.constant 280 : index
    %105 = vector.load %arg12[%c0_48, %c280] : memref<10x700xf32, #tpu.memory_space<vmem>>, vector<10x14xf32>
    tpu.vector_store %arg12[%c0_48, %c280], %104 {strides = array<i32>} : memref<10x700xf32, #tpu.memory_space<vmem>>, vector<10x14xf32>,
    %106 = vector.extract_strided_slice %63 {offsets = [1, 56], sizes = [10, 14], strides = [1, 1]} : vector<14x140xf32> to vector<10x14xf32>
    %c0_49 = arith.constant 0 : index
    %c294 = arith.constant 294 : index
    %107 = vector.load %arg12[%c0_49, %c294] : memref<10x700xf32, #tpu.memory_space<vmem>>, vector<10x14xf32>
    tpu.vector_store %arg12[%c0_49, %c294], %106 {strides = array<i32>} : memref<10x700xf32, #tpu.memory_space<vmem>>, vector<10x14xf32>,
    %108 = vector.extract_strided_slice %63 {offsets = [2, 56], sizes = [10, 14], strides = [1, 1]} : vector<14x140xf32> to vector<10x14xf32>
    %c0_50 = arith.constant 0 : index
    %c308 = arith.constant 308 : index
    %109 = vector.load %arg12[%c0_50, %c308] : memref<10x700xf32, #tpu.memory_space<vmem>>, vector<10x14xf32>
    tpu.vector_store %arg12[%c0_50, %c308], %108 {strides = array<i32>} : memref<10x700xf32, #tpu.memory_space<vmem>>, vector<10x14xf32>,
    %110 = vector.extract_strided_slice %63 {offsets = [3, 56], sizes = [10, 14], strides = [1, 1]} : vector<14x140xf32> to vector<10x14xf32>
    %c0_51 = arith.constant 0 : index
    %c322 = arith.constant 322 : index
    %111 = vector.load %arg12[%c0_51, %c322] : memref<10x700xf32, #tpu.memory_space<vmem>>, vector<10x14xf32>
    tpu.vector_store %arg12[%c0_51, %c322], %110 {strides = array<i32>} : memref<10x700xf32, #tpu.memory_space<vmem>>, vector<10x14xf32>,
    %112 = vector.extract_strided_slice %63 {offsets = [4, 56], sizes = [10, 14], strides = [1, 1]} : vector<14x140xf32> to vector<10x14xf32>
    %c0_52 = arith.constant 0 : index
    %c336 = arith.constant 336 : index
    %113 = vector.load %arg12[%c0_52, %c336] : memref<10x700xf32, #tpu.memory_space<vmem>>, vector<10x14xf32>
    tpu.vector_store %arg12[%c0_52, %c336], %112 {strides = array<i32>} : memref<10x700xf32, #tpu.memory_space<vmem>>, vector<10x14xf32>,
    %114 = vector.extract_strided_slice %63 {offsets = [0, 70], sizes = [10, 14], strides = [1, 1]} : vector<14x140xf32> to vector<10x14xf32>
    %c0_53 = arith.constant 0 : index
    %c350 = arith.constant 350 : index
    %115 = vector.load %arg12[%c0_53, %c350] : memref<10x700xf32, #tpu.memory_space<vmem>>, vector<10x14xf32>
    tpu.vector_store %arg12[%c0_53, %c350], %114 {strides = array<i32>} : memref<10x700xf32, #tpu.memory_space<vmem>>, vector<10x14xf32>,
    %116 = vector.extract_strided_slice %63 {offsets = [1, 70], sizes = [10, 14], strides = [1, 1]} : vector<14x140xf32> to vector<10x14xf32>
    %c0_54 = arith.constant 0 : index
    %c364 = arith.constant 364 : index
    %117 = vector.load %arg12[%c0_54, %c364] : memref<10x700xf32, #tpu.memory_space<vmem>>, vector<10x14xf32>
    tpu.vector_store %arg12[%c0_54, %c364], %116 {strides = array<i32>} : memref<10x700xf32, #tpu.memory_space<vmem>>, vector<10x14xf32>,
    %118 = vector.extract_strided_slice %63 {offsets = [2, 70], sizes = [10, 14], strides = [1, 1]} : vector<14x140xf32> to vector<10x14xf32>
    %c0_55 = arith.constant 0 : index
    %c378 = arith.constant 378 : index
    %119 = vector.load %arg12[%c0_55, %c378] : memref<10x700xf32, #tpu.memory_space<vmem>>, vector<10x14xf32>
    tpu.vector_store %arg12[%c0_55, %c378], %118 {strides = array<i32>} : memref<10x700xf32, #tpu.memory_space<vmem>>, vector<10x14xf32>,
    %120 = vector.extract_strided_slice %63 {offsets = [3, 70], sizes = [10, 14], strides = [1, 1]} : vector<14x140xf32> to vector<10x14xf32>
    %c0_56 = arith.constant 0 : index
    %c392 = arith.constant 392 : index
    %121 = vector.load %arg12[%c0_56, %c392] : memref<10x700xf32, #tpu.memory_space<vmem>>, vector<10x14xf32>
    tpu.vector_store %arg12[%c0_56, %c392], %120 {strides = array<i32>} : memref<10x700xf32, #tpu.memory_space<vmem>>, vector<10x14xf32>,
    %122 = vector.extract_strided_slice %63 {offsets = [4, 70], sizes = [10, 14], strides = [1, 1]} : vector<14x140xf32> to vector<10x14xf32>
    %c0_57 = arith.constant 0 : index
    %c406 = arith.constant 406 : index
    %123 = vector.load %arg12[%c0_57, %c406] : memref<10x700xf32, #tpu.memory_space<vmem>>, vector<10x14xf32>
    tpu.vector_store %arg12[%c0_57, %c406], %122 {strides = array<i32>} : memref<10x700xf32, #tpu.memory_space<vmem>>, vector<10x14xf32>,
    %124 = vector.extract_strided_slice %63 {offsets = [0, 84], sizes = [10, 14], strides = [1, 1]} : vector<14x140xf32> to vector<10x14xf32>
    %c0_58 = arith.constant 0 : index
    %c420 = arith.constant 420 : index
    %125 = vector.load %arg12[%c0_58, %c420] : memref<10x700xf32, #tpu.memory_space<vmem>>, vector<10x14xf32>
    tpu.vector_store %arg12[%c0_58, %c420], %124 {strides = array<i32>} : memref<10x700xf32, #tpu.memory_space<vmem>>, vector<10x14xf32>,
    %126 = vector.extract_strided_slice %63 {offsets = [1, 84], sizes = [10, 14], strides = [1, 1]} : vector<14x140xf32> to vector<10x14xf32>
    %c0_59 = arith.constant 0 : index
    %c434 = arith.constant 434 : index
    %127 = vector.load %arg12[%c0_59, %c434] : memref<10x700xf32, #tpu.memory_space<vmem>>, vector<10x14xf32>
    tpu.vector_store %arg12[%c0_59, %c434], %126 {strides = array<i32>} : memref<10x700xf32, #tpu.memory_space<vmem>>, vector<10x14xf32>,
    %128 = vector.extract_strided_slice %63 {offsets = [2, 84], sizes = [10, 14], strides = [1, 1]} : vector<14x140xf32> to vector<10x14xf32>
    %c0_60 = arith.constant 0 : index
    %c448_61 = arith.constant 448 : index
    %129 = vector.load %arg12[%c0_60, %c448_61] : memref<10x700xf32, #tpu.memory_space<vmem>>, vector<10x14xf32>
    tpu.vector_store %arg12[%c0_60, %c448_61], %128 {strides = array<i32>} : memref<10x700xf32, #tpu.memory_space<vmem>>, vector<10x14xf32>,
    %130 = vector.extract_strided_slice %63 {offsets = [3, 84], sizes = [10, 14], strides = [1, 1]} : vector<14x140xf32> to vector<10x14xf32>
    %c0_62 = arith.constant 0 : index
    %c462 = arith.constant 462 : index
    %131 = vector.load %arg12[%c0_62, %c462] : memref<10x700xf32, #tpu.memory_space<vmem>>, vector<10x14xf32>
    tpu.vector_store %arg12[%c0_62, %c462], %130 {strides = array<i32>} : memref<10x700xf32, #tpu.memory_space<vmem>>, vector<10x14xf32>,
    %132 = vector.extract_strided_slice %63 {offsets = [4, 84], sizes = [10, 14], strides = [1, 1]} : vector<14x140xf32> to vector<10x14xf32>
    %c0_63 = arith.constant 0 : index
    %c476 = arith.constant 476 : index
    %133 = vector.load %arg12[%c0_63, %c476] : memref<10x700xf32, #tpu.memory_space<vmem>>, vector<10x14xf32>
    tpu.vector_store %arg12[%c0_63, %c476], %132 {strides = array<i32>} : memref<10x700xf32, #tpu.memory_space<vmem>>, vector<10x14xf32>,
    %134 = vector.extract_strided_slice %63 {offsets = [0, 98], sizes = [10, 14], strides = [1, 1]} : vector<14x140xf32> to vector<10x14xf32>
    %c0_64 = arith.constant 0 : index
    %c490 = arith.constant 490 : index
    %135 = vector.load %arg12[%c0_64, %c490] : memref<10x700xf32, #tpu.memory_space<vmem>>, vector<10x14xf32>
    tpu.vector_store %arg12[%c0_64, %c490], %134 {strides = array<i32>} : memref<10x700xf32, #tpu.memory_space<vmem>>, vector<10x14xf32>,
    %136 = vector.extract_strided_slice %63 {offsets = [1, 98], sizes = [10, 14], strides = [1, 1]} : vector<14x140xf32> to vector<10x14xf32>
    %c0_65 = arith.constant 0 : index
    %c504 = arith.constant 504 : index
    %137 = vector.load %arg12[%c0_65, %c504] : memref<10x700xf32, #tpu.memory_space<vmem>>, vector<10x14xf32>
    tpu.vector_store %arg12[%c0_65, %c504], %136 {strides = array<i32>} : memref<10x700xf32, #tpu.memory_space<vmem>>, vector<10x14xf32>,
    %138 = vector.extract_strided_slice %63 {offsets = [2, 98], sizes = [10, 14], strides = [1, 1]} : vector<14x140xf32> to vector<10x14xf32>
    %c0_66 = arith.constant 0 : index
    %c518 = arith.constant 518 : index
    %139 = vector.load %arg12[%c0_66, %c518] : memref<10x700xf32, #tpu.memory_space<vmem>>, vector<10x14xf32>
    tpu.vector_store %arg12[%c0_66, %c518], %138 {strides = array<i32>} : memref<10x700xf32, #tpu.memory_space<vmem>>, vector<10x14xf32>,
    %140 = vector.extract_strided_slice %63 {offsets = [3, 98], sizes = [10, 14], strides = [1, 1]} : vector<14x140xf32> to vector<10x14xf32>
    %c0_67 = arith.constant 0 : index
    %c532 = arith.constant 532 : index
    %141 = vector.load %arg12[%c0_67, %c532] : memref<10x700xf32, #tpu.memory_space<vmem>>, vector<10x14xf32>
    tpu.vector_store %arg12[%c0_67, %c532], %140 {strides = array<i32>} : memref<10x700xf32, #tpu.memory_space<vmem>>, vector<10x14xf32>,
    %142 = vector.extract_strided_slice %63 {offsets = [4, 98], sizes = [10, 14], strides = [1, 1]} : vector<14x140xf32> to vector<10x14xf32>
    %c0_68 = arith.constant 0 : index
    %c546 = arith.constant 546 : index
    %143 = vector.load %arg12[%c0_68, %c546] : memref<10x700xf32, #tpu.memory_space<vmem>>, vector<10x14xf32>
    tpu.vector_store %arg12[%c0_68, %c546], %142 {strides = array<i32>} : memref<10x700xf32, #tpu.memory_space<vmem>>, vector<10x14xf32>,
    %144 = vector.extract_strided_slice %63 {offsets = [0, 112], sizes = [10, 14], strides = [1, 1]} : vector<14x140xf32> to vector<10x14xf32>
    %c0_69 = arith.constant 0 : index
    %c560 = arith.constant 560 : index
    %145 = vector.load %arg12[%c0_69, %c560] : memref<10x700xf32, #tpu.memory_space<vmem>>, vector<10x14xf32>
    tpu.vector_store %arg12[%c0_69, %c560], %144 {strides = array<i32>} : memref<10x700xf32, #tpu.memory_space<vmem>>, vector<10x14xf32>,
    %146 = vector.extract_strided_slice %63 {offsets = [1, 112], sizes = [10, 14], strides = [1, 1]} : vector<14x140xf32> to vector<10x14xf32>
    %c0_70 = arith.constant 0 : index
    %c574 = arith.constant 574 : index
    %147 = vector.load %arg12[%c0_70, %c574] : memref<10x700xf32, #tpu.memory_space<vmem>>, vector<10x14xf32>
    tpu.vector_store %arg12[%c0_70, %c574], %146 {strides = array<i32>} : memref<10x700xf32, #tpu.memory_space<vmem>>, vector<10x14xf32>,
    %148 = vector.extract_strided_slice %63 {offsets = [2, 112], sizes = [10, 14], strides = [1, 1]} : vector<14x140xf32> to vector<10x14xf32>
    %c0_71 = arith.constant 0 : index
    %c588 = arith.constant 588 : index
    %149 = vector.load %arg12[%c0_71, %c588] : memref<10x700xf32, #tpu.memory_space<vmem>>, vector<10x14xf32>
    tpu.vector_store %arg12[%c0_71, %c588], %148 {strides = array<i32>} : memref<10x700xf32, #tpu.memory_space<vmem>>, vector<10x14xf32>,
    %150 = vector.extract_strided_slice %63 {offsets = [3, 112], sizes = [10, 14], strides = [1, 1]} : vector<14x140xf32> to vector<10x14xf32>
    %c0_72 = arith.constant 0 : index
    %c602 = arith.constant 602 : index
    %151 = vector.load %arg12[%c0_72, %c602] : memref<10x700xf32, #tpu.memory_space<vmem>>, vector<10x14xf32>
    tpu.vector_store %arg12[%c0_72, %c602], %150 {strides = array<i32>} : memref<10x700xf32, #tpu.memory_space<vmem>>, vector<10x14xf32>,
    %152 = vector.extract_strided_slice %63 {offsets = [4, 112], sizes = [10, 14], strides = [1, 1]} : vector<14x140xf32> to vector<10x14xf32>
    %c0_73 = arith.constant 0 : index
    %c616 = arith.constant 616 : index
    %153 = vector.load %arg12[%c0_73, %c616] : memref<10x700xf32, #tpu.memory_space<vmem>>, vector<10x14xf32>
    tpu.vector_store %arg12[%c0_73, %c616], %152 {strides = array<i32>} : memref<10x700xf32, #tpu.memory_space<vmem>>, vector<10x14xf32>,
    %154 = vector.extract_strided_slice %63 {offsets = [0, 126], sizes = [10, 14], strides = [1, 1]} : vector<14x140xf32> to vector<10x14xf32>
    %c0_74 = arith.constant 0 : index
    %c630 = arith.constant 630 : index
    %155 = vector.load %arg12[%c0_74, %c630] : memref<10x700xf32, #tpu.memory_space<vmem>>, vector<10x14xf32>
    tpu.vector_store %arg12[%c0_74, %c630], %154 {strides = array<i32>} : memref<10x700xf32, #tpu.memory_space<vmem>>, vector<10x14xf32>,
    %156 = vector.extract_strided_slice %63 {offsets = [1, 126], sizes = [10, 14], strides = [1, 1]} : vector<14x140xf32> to vector<10x14xf32>
    %c0_75 = arith.constant 0 : index
    %c644 = arith.constant 644 : index
    %157 = vector.load %arg12[%c0_75, %c644] : memref<10x700xf32, #tpu.memory_space<vmem>>, vector<10x14xf32>
    tpu.vector_store %arg12[%c0_75, %c644], %156 {strides = array<i32>} : memref<10x700xf32, #tpu.memory_space<vmem>>, vector<10x14xf32>,
    %158 = vector.extract_strided_slice %63 {offsets = [2, 126], sizes = [10, 14], strides = [1, 1]} : vector<14x140xf32> to vector<10x14xf32>
    %c0_76 = arith.constant 0 : index
    %c658 = arith.constant 658 : index
    %159 = vector.load %arg12[%c0_76, %c658] : memref<10x700xf32, #tpu.memory_space<vmem>>, vector<10x14xf32>
    tpu.vector_store %arg12[%c0_76, %c658], %158 {strides = array<i32>} : memref<10x700xf32, #tpu.memory_space<vmem>>, vector<10x14xf32>,
    %160 = vector.extract_strided_slice %63 {offsets = [3, 126], sizes = [10, 14], strides = [1, 1]} : vector<14x140xf32> to vector<10x14xf32>
    %c0_77 = arith.constant 0 : index
    %c672 = arith.constant 672 : index
    %161 = vector.load %arg12[%c0_77, %c672] : memref<10x700xf32, #tpu.memory_space<vmem>>, vector<10x14xf32>
    tpu.vector_store %arg12[%c0_77, %c672], %160 {strides = array<i32>} : memref<10x700xf32, #tpu.memory_space<vmem>>, vector<10x14xf32>,
    %162 = vector.extract_strided_slice %63 {offsets = [4, 126], sizes = [10, 14], strides = [1, 1]} : vector<14x140xf32> to vector<10x14xf32>
    %c0_78 = arith.constant 0 : index
    %c686 = arith.constant 686 : index
    %163 = vector.load %arg12[%c0_78, %c686] : memref<10x700xf32, #tpu.memory_space<vmem>>, vector<10x14xf32>
    tpu.vector_store %arg12[%c0_78, %c686], %162 {strides = array<i32>} : memref<10x700xf32, #tpu.memory_space<vmem>>, vector<10x14xf32>,
    %c0_79 = arith.constant 0 : index
    %c0_80 = arith.constant 0 : index
    %164 = vector.load %arg12[%c0_79, %c0_80] : memref<10x700xf32, #tpu.memory_space<vmem>>, vector<10x700xf32>
    %c0_81 = arith.constant 0 : index
    %c0_82 = arith.constant 0 : index
    %165 = vector.load %arg4[%c0_81, %c0_82] : memref<700x200xf32, #tpu.memory_space<vmem>>, vector<700x200xf32>
    %cst_83 = arith.constant dense<0.000000e+00> : vector<10x200xf32>
    %166 = tpu.matmul %164, %165, %cst_83 {dimension_numbers = #tpu.dot_dimension_numbers<[1], [0], [0], [1], [0, 0, 1, 1], [], []>} : vector<10x700xf32>, vector<700x200xf32>, vector<10x200xf32> -> vector<10x200xf32>
    %167 = vector.extract_strided_slice %166 {offsets = [0, 0], sizes = [10, 100], strides = [1, 1]} : vector<10x200xf32> to vector<10x100xf32>
    %168 = vector.extract_strided_slice %166 {offsets = [0, 100], sizes = [10, 100], strides = [1, 1]} : vector<10x200xf32> to vector<10x100xf32>
    %169 = arith.maximumf %167, %168 : vector<10x100xf32>
    %170 = vector.shape_cast %169 : vector<10x100xf32> to vector<5x2x100xf32>
    %171 = vector.extract_strided_slice %170 {offsets = [0, 0, 0], sizes = [5, 1, 100], strides = [1, 1, 1]} : vector<5x2x100xf32> to vector<5x1x100xf32>
    %172 = vector.shape_cast %171 : vector<5x1x100xf32> to vector<5x100xf32>
    %173 = vector.extract_strided_slice %170 {offsets = [0, 1, 0], sizes = [5, 1, 100], strides = [1, 1, 1]} : vector<5x2x100xf32> to vector<5x1x100xf32>
    %174 = vector.shape_cast %173 : vector<5x1x100xf32> to vector<5x100xf32>
    %175 = arith.maximumf %172, %174 : vector<5x100xf32>
    %c0_84 = arith.constant 0 : index
    %c0_85 = arith.constant 0 : index
    %176 = vector.load %arg5[%c0_84, %c0_85] : memref<1x100xf32, #tpu.memory_space<vmem>>, vector<1x100xf32>
    %177 = vector.broadcast %176 : vector<1x100xf32> to vector<5x100xf32>
    %178 = arith.addf %175, %177 : vector<5x100xf32>
    %cst_86 = arith.constant 0.000000e+00 : f32
    %179 = vector.broadcast %cst_86 : f32 to vector<5x100xf32>
    %180 = arith.maximumf %178, %179 : vector<5x100xf32>
    %181 = vector.extract_strided_slice %180 {offsets = [0, 0], sizes = [1, 100], strides = [1, 1]} : vector<5x100xf32> to vector<1x100xf32>
    %c0_87 = arith.constant 0 : index
    %c0_88 = arith.constant 0 : index
    %182 = vector.load %arg13[%c0_87, %c0_88] : memref<1x500xf32, #tpu.memory_space<vmem>>, vector<1x100xf32>
    tpu.vector_store %arg13[%c0_87, %c0_88], %181 {strides = array<i32>} : memref<1x500xf32, #tpu.memory_space<vmem>>, vector<1x100xf32>,
    %183 = vector.extract_strided_slice %180 {offsets = [1, 0], sizes = [1, 100], strides = [1, 1]} : vector<5x100xf32> to vector<1x100xf32>
    %c0_89 = arith.constant 0 : index
    %c100 = arith.constant 100 : index
    %184 = vector.load %arg13[%c0_89, %c100] : memref<1x500xf32, #tpu.memory_space<vmem>>, vector<1x100xf32>
    tpu.vector_store %arg13[%c0_89, %c100], %183 {strides = array<i32>} : memref<1x500xf32, #tpu.memory_space<vmem>>, vector<1x100xf32>,
    %185 = vector.extract_strided_slice %180 {offsets = [2, 0], sizes = [1, 100], strides = [1, 1]} : vector<5x100xf32> to vector<1x100xf32>
    %c0_90 = arith.constant 0 : index
    %c200 = arith.constant 200 : index
    %186 = vector.load %arg13[%c0_90, %c200] : memref<1x500xf32, #tpu.memory_space<vmem>>, vector<1x100xf32>
    tpu.vector_store %arg13[%c0_90, %c200], %185 {strides = array<i32>} : memref<1x500xf32, #tpu.memory_space<vmem>>, vector<1x100xf32>,
    %187 = vector.extract_strided_slice %180 {offsets = [3, 0], sizes = [1, 100], strides = [1, 1]} : vector<5x100xf32> to vector<1x100xf32>
    %c0_91 = arith.constant 0 : index
    %c300 = arith.constant 300 : index
    %188 = vector.load %arg13[%c0_91, %c300] : memref<1x500xf32, #tpu.memory_space<vmem>>, vector<1x100xf32>
    tpu.vector_store %arg13[%c0_91, %c300], %187 {strides = array<i32>} : memref<1x500xf32, #tpu.memory_space<vmem>>, vector<1x100xf32>,
    %189 = vector.extract_strided_slice %180 {offsets = [4, 0], sizes = [1, 100], strides = [1, 1]} : vector<5x100xf32> to vector<1x100xf32>
    %c0_92 = arith.constant 0 : index
    %c400 = arith.constant 400 : index
    %190 = vector.load %arg13[%c0_92, %c400] : memref<1x500xf32, #tpu.memory_space<vmem>>, vector<1x100xf32>
    tpu.vector_store %arg13[%c0_92, %c400], %189 {strides = array<i32>} : memref<1x500xf32, #tpu.memory_space<vmem>>, vector<1x100xf32>,
    %c0_93 = arith.constant 0 : index
    %c0_94 = arith.constant 0 : index
    %191 = vector.load %arg13[%c0_93, %c0_94] : memref<1x500xf32, #tpu.memory_space<vmem>>, vector<1x500xf32>
    %c0_95 = arith.constant 0 : index
    %c0_96 = arith.constant 0 : index
    %192 = vector.load %arg6[%c0_95, %c0_96] : memref<500x50xf32, #tpu.memory_space<vmem>>, vector<500x50xf32>
    %cst_97 = arith.constant dense<0.000000e+00> : vector<1x50xf32>
    %193 = tpu.matmul %191, %192, %cst_97 {dimension_numbers = #tpu.dot_dimension_numbers<[1], [0], [0], [1], [0, 0, 1, 1], [], []>} : vector<1x500xf32>, vector<500x50xf32>, vector<1x50xf32> -> vector<1x50xf32>
    %c0_98 = arith.constant 0 : index
    %c0_99 = arith.constant 0 : index
    %194 = vector.load %arg7[%c0_98, %c0_99] : memref<1x50xf32, #tpu.memory_space<vmem>>, vector<1x50xf32>
    %195 = arith.addf %193, %194 : vector<1x50xf32>
    %cst_100 = arith.constant 0.000000e+00 : f32
    %196 = vector.broadcast %cst_100 : f32 to vector<1x50xf32>
    %197 = arith.maximumf %195, %196 : vector<1x50xf32>
    %c0_101 = arith.constant 0 : index
    %c0_102 = arith.constant 0 : index
    %198 = vector.load %arg8[%c0_101, %c0_102] : memref<50x43xf32, #tpu.memory_space<vmem>>, vector<50x43xf32>
    %cst_103 = arith.constant dense<0.000000e+00> : vector<1x43xf32>
    %199 = tpu.matmul %197, %198, %cst_103 {dimension_numbers = #tpu.dot_dimension_numbers<[1], [0], [0], [1], [0, 0, 1, 1], [], []>} : vector<1x50xf32>, vector<50x43xf32>, vector<1x43xf32> -> vector<1x43xf32>
    %c0_104 = arith.constant 0 : index
    %c0_105 = arith.constant 0 : index
    %200 = vector.load %arg9[%c0_104, %c0_105] : memref<1x43xf32, #tpu.memory_space<vmem>>, vector<1x43xf32>
    %201 = arith.addf %199, %200 : vector<1x43xf32>
    %cst_106 = arith.constant dense<0xFF800000> : vector<1xf32>
    %202 = vector.multi_reduction <maximumf>, %201, %cst_106 [1] : vector<1x43xf32> to vector<1xf32>
    %203 = vector.shape_cast %202 : vector<1xf32> to vector<1x1xf32>
    %204 = vector.broadcast %203 : vector<1x1xf32> to vector<1x43xf32>
    %205 = arith.subf %201, %204 : vector<1x43xf32>
    %206 = math.exp %205 : vector<1x43xf32>
    %cst_107 = arith.constant dense<0.000000e+00> : vector<1xf32>
    %207 = vector.multi_reduction <add>, %206, %cst_107 [1] : vector<1x43xf32> to vector<1xf32>
    %208 = vector.shape_cast %207 : vector<1xf32> to vector<1x1xf32>
    %209 = math.log %208 : vector<1x1xf32>
    %210 = vector.broadcast %209 : vector<1x1xf32> to vector<1x43xf32>
    %211 = arith.subf %205, %210 : vector<1x43xf32>
    %c0_108 = arith.constant 0 : index
    %c0_109 = arith.constant 0 : index
    %c0_110 = arith.constant 0 : index
    %212 = vector.load %arg10[%c0_108, %c0_109, %c0_110] : memref<1x1x43xf32, #tpu.memory_space<vmem>>, vector<1x1x43xf32>
    %213 = vector.shape_cast %212 : vector<1x1x43xf32> to vector<1x43xf32>
    %214 = vector.shape_cast %211 : vector<1x43xf32> to vector<1x1x43xf32>
    tpu.vector_store %arg10[%c0_108, %c0_109, %c0_110], %214 {strides = array<i32>} : memref<1x1x43xf32, #tpu.memory_space<vmem>>, vector<1x1x43xf32>,
    return
  }
  func.func @transform_0(%arg0: i32) -> (i32, i32, i32, i32) {
    %c0_i32 = arith.constant 0 : i32
    %c0_i32_0 = arith.constant 0 : i32
    %c0_i32_1 = arith.constant 0 : i32
    %c0_i32_2 = arith.constant 0 : i32
    return %arg0, %c0_i32, %c0_i32_0, %c0_i32_1 : i32, i32, i32, i32
  }
  func.func @transform_1(%arg0: i32) -> (i32, i32) {
    %c0_i32 = arith.constant 0 : i32
    %c0_i32_0 = arith.constant 0 : i32
    %c0_i32_1 = arith.constant 0 : i32
    return %c0_i32, %c0_i32_0 : i32, i32
  }
  func.func @transform_2(%arg0: i32) -> (i32, i32) {
    %c0_i32 = arith.constant 0 : i32
    %c0_i32_0 = arith.constant 0 : i32
    %c0_i32_1 = arith.constant 0 : i32
    return %c0_i32, %c0_i32_0 : i32, i32
  }
  func.func @transform_3(%arg0: i32) -> (i32, i32) {
    %c0_i32 = arith.constant 0 : i32
    %c0_i32_0 = arith.constant 0 : i32
    %c0_i32_1 = arith.constant 0 : i32
    return %c0_i32, %c0_i32_0 : i32, i32
  }
  func.func @transform_4(%arg0: i32) -> (i32, i32) {
    %c0_i32 = arith.constant 0 : i32
    %c0_i32_0 = arith.constant 0 : i32
    %c0_i32_1 = arith.constant 0 : i32
    return %c0_i32, %c0_i32_0 : i32, i32
  }
  func.func @transform_5(%arg0: i32) -> (i32, i32) {
    %c0_i32 = arith.constant 0 : i32
    %c0_i32_0 = arith.constant 0 : i32
    %c0_i32_1 = arith.constant 0 : i32
    return %c0_i32, %c0_i32_0 : i32, i32
  }
  func.func @transform_6(%arg0: i32) -> (i32, i32) {
    %c0_i32 = arith.constant 0 : i32
    %c0_i32_0 = arith.constant 0 : i32
    %c0_i32_1 = arith.constant 0 : i32
    return %c0_i32, %c0_i32_0 : i32, i32
  }
  func.func @transform_7(%arg0: i32) -> (i32, i32) {
    %c0_i32 = arith.constant 0 : i32
    %c0_i32_0 = arith.constant 0 : i32
    %c0_i32_1 = arith.constant 0 : i32
    return %c0_i32, %c0_i32_0 : i32, i32
  }
  func.func @transform_8(%arg0: i32) -> (i32, i32) {
    %c0_i32 = arith.constant 0 : i32
    %c0_i32_0 = arith.constant 0 : i32
    %c0_i32_1 = arith.constant 0 : i32
    return %c0_i32, %c0_i32_0 : i32, i32
  }
  func.func @transform_9(%arg0: i32) -> (i32, i32, i32) {
    %c0_i32 = arith.constant 0 : i32
    %c0_i32_0 = arith.constant 0 : i32
    %c0_i32_1 = arith.constant 0 : i32
    return %arg0, %c0_i32, %c0_i32_0 : i32, i32, i32
  }
}

</mosaic_0001>

<bundles_post_ra>
// kernel: net_forward_pallas.1
= control target key start
LH: loop header
LB: loop body
LE: loop exit
PB: predicated region body
PF: predicated region fallthrough
CT: control target
= control target key end

     0   :  { %s6379_s0 = inlined_call_operand.vmem [shape: f32[2,3,32,32], index: 0, kind: input, shape index: {}]   ;;  %s6380_s1 = inlined_call_operand.vmem [shape: f32[480,280], index: 1, kind: input, shape index: {}]   ;;  %s6381_s2 = inlined_call_operand.vmem [shape: f32[1,140], index: 2, kind: input, shape index: {}]   ;;  %s6382_s3 = inlined_call_operand.vmem [shape: f32[700,200], index: 3, kind: input, shape index: {}]   ;;  %s6383_s4 = inlined_call_operand.vmem [shape: f32[1,100], index: 4, kind: input, shape index: {}]   ;;  %s6384_s5 = inlined_call_operand.vmem [shape: f32[500,50], index: 5, kind: input, shape index: {}]   ;;  %s6385_s6 = inlined_call_operand.vmem [shape: f32[1,50], index: 6, kind: input, shape index: {}]   ;;  %s6386_s7 = inlined_call_operand.vmem [shape: f32[50,43], index: 7, kind: input, shape index: {}]   ;;  %s6387_s8 = inlined_call_operand.vmem [shape: f32[1,43], index: 8, kind: input, shape index: {}]   ;;  %s6388_s9 = inlined_call_operand.hbm [shape: f32[2,1,43], index: 9, kind: output, shape index: {}]  }
   0x1   :  { %6446 = sst [smem:[#allocation13_spill]] %s6379_s0 }
   0x2   :  { %6447 = sst [smem:[#allocation14_spill]] %s6380_s1 }
   0x3   :  { %6448 = sst [smem:[#allocation15_spill]] %s6381_s2 }
   0x4   :  { %14 = vsyncpa [#allocation6], 0 }
   0x5   :  { %16 = vsyncpa [#allocation6 + $0x1], 0  ;;  %s3649_s30 = smov 0   ;;  %s3651_s10 = smov 0  }
   0x6   :  { %s3653_s11 = smov 0   ;;  %s3655_s12 = smov 0  }
   0x7 LB: > { %6449 = sst [smem:[#allocation8_spill]] %s3542_s11  ;;  %s3670_s13 = sadd.s32 4294967295, %s3546_s12   ;;  %s3546_s12 = sphi %s3655_s12, %s6513_s12   ;;  %s3542_s11 = sphi %s3653_s11, %s6515_s11   ;;  %s3538_s10 = sphi %s3651_s10, %s6517_s10   ;;  %s3534_s30 = sphi %s3649_s30, %s6516_s30  }
   0x8   : > { %s3244_s14 = sadd.s32 4294967294, %s3546_s12   ;;  %s3674_s15 = sadd.s32 1, %s3546_s12  }
   0x9   : > { %6450 = sst [smem:[#allocation9_spill]] %s3674_s15  ;;  %s223_s16 = sadd.s32 1, %s3542_s11 }
   0xa   : > { %s220_s17 = ssub.s32 %s3546_s12, %s3674_s15  ;;  %p233_p0 = scmp.ne.s32.totalorder %s3542_s11, %s3538_s10 }
   0xb   : > { %p221_p1 = scmp.eq.s32.totalorder %s220_s17, 0  ;;  %p234_p2 = scmp.eq.s32.totalorder %s3670_s13, 1 }
   0xc   : > { %p239_p3 = scmp.ne.s32.totalorder %s3538_s10, %s3534_s30  ;;  %p240_p4 = scmp.eq.s32.totalorder %s3244_s14, 1 }
   0xd   : > { %s3685_s18 = scalar_select %p221_p1, %s3542_s11, %s223_s16  }
   0xe   : > { %p3687_p5 = por %p234_p2, %p233_p0  ;;  %p3691_p6 = por %p240_p4, %p239_p3 }
   0xf   : > { %6451 = sst [smem:[#allocation10_spill]] %s3685_s18  ;;  %p3247_p7 = scmp.ge.s32.totalorder %s3546_s12, 1 }
  0x10   : > { %s6453_s20 = scalar_select %p3691_p6, 1, 0 }
  0x11   : > { %p290_p8 = scmp.lt.s32.totalorder %s3546_s12, 3 }
  0x12   : > { %6454 = sst [smem:[#allocation11_spill]] %s6453_s20 }
  0x13   : > { %p291_p9 = pnand %p3247_p7, %p290_p8 }
  0x15   : > { %294 = sbr.rel (%p291_p9) target bundleno = 2137 (0x859), region = 56 }
  0x1a   : > { %p325_p10 = scmp.lt.s32.totalorder %s3670_s13, 1  ;;  %s6455_s1 = sld [smem:[#allocation14_spill]]  ;;  %vm352_vm0 = vcmask 1046528   ;;  %vm378_vm1 = vcmask 1045504   ;;  %vm342_vm2 = vcmask 261120   ;;  %vm404_vm3 = vcmask 1044480  }
  0x1b   : > { %s6456_s0 = sld [smem:[#allocation13_spill]]  ;;  %vm6444_vm4 = vcmask 1043456   ;;  %s6397_s29 = smov 96   ;;  %vm346_vm5 = vcmask 257024   ;;  %vm372_vm6 = vcmask 523520   ;;  %vm398_vm7 = vcmask 785920  }
  0x1c   : > { %s326_s27 = scalar_select %p325_p10, %s3670_s13, 1  ;;  %vm424_vm8 = vcmask 1048320   ;;  %vm850_vm9 = vcmask 785408   ;;  %vm376_vm10 = vcmask 519424   ;;  %vm402_vm11 = vcmask 781824  }
  0x1d   : > { %s6457_s16 = smov 64   ;;  %vm428_vm12 = vcmask 1044224   ;;  %s3552_s14 = smov 116   ;;  %vm6443_vm13 = vcmask 949248   ;;  %vm1515_vm14 = vcmask 1041409   ;;  %vm1517_vm15 = vcmask 1042434  }
  0x1e   : > { %s3392_s17 = smul.u32 96, %s326_s27  ;;  %s6389_s27 = smov 64  }
  0x1f   : > { %s6458_s2 = sld [smem:[#allocation15_spill]]  ;;  %s6414_s21 = smov 56  }
  0x20   : > { %v716_v0 = vld [vmem:[%s6455_s1 + $0x170] sm:$0xff]  ;;  %v715_v1 = vld [vmem:[%s6455_s1 + $0x168] sm:$0xff]  ;;  %v713_v2 = vld [vmem:[%s6455_s1 + $0x158] sm:$0xff]  ;;  %s6402_s22 = smov 40   ;;  %s6399_s23 = smov 80  }
  0x21   : > { %863 = vmatprep.subr.mxu0 %v716_v0  ;;  %v712_v3 = vld [vmem:[%s6455_s1 + $0x150] sm:$0xff]  ;;  %v710_v4 = vld [vmem:[%s6455_s1 + $0x140] sm:$0xff]  ;;  %v709_v5 = vld [vmem:[%s6455_s1 + $0x138] sm:$0xff]  ;;  %s3723_s28 = scalar_lea.vmem %s6456_s0, %s3392_s17  ;;  %s3548_s17 = smov 32  }
  0x22   : > { %864 = vmatpush1.msra.mxu0 %v715_v1  ;;  %v707_v6 = vld [vmem:[%s6455_s1 + $0x128] sm:$0xff]  ;;  %v706_v7 = vld [vmem:[%s6455_s1 + $0x120] sm:$0xff]  ;;  %v704_v8 = vld [vmem:[%s6455_s1 + $0x110] sm:$0xff]  ;;  %s6395_s24 = smov 120   ;;  %s6391_s25 = smov 24  }
  0x23   : > { %865 = vmatprep.subr.mxu0 %v713_v2  ;;  %v3732_v9 = vld [vmem:[%s3723_s28 + $0x20] sm:$0xff]  ;;  %v3735_v10 = vld [vmem:[%s3723_s28 + $0x28] sm:$0xff]  ;;  %v701_v22 = vld [vmem:[%s6455_s1 + $0xf8] sm:$0xff]  ;;  %s3560_s26 = smov 126   ;;  %s6473_s0 = smov 20  }
  0x24   : > { %866 = vmatpush1.msra.mxu0 %v712_v3  ;;  %v3738_v11 = vld [vmem:[%s3723_s28] sm:$0xff]  ;;  %450 = vrot.lane.b32.xlu0 %v3732_v9, %s3548_s17  ;;  %v466_v12 = vrot.slane %v3732_v9, 1  ;;  %v467_v13 = vrot.slane %v3735_v10, 1  ;;  %v3745_v14 = vld [vmem:[%s3723_s28 + $0x8] sm:$0xff]  ;;  %v489_v20 = vrot.slane %v3732_v9, 2  ;;  %v490_v21 = vrot.slane %v3735_v10, 2 }
  0x25   : > { %867 = vmatprep.subr.mxu0 %v710_v4  ;;  %v353_v15 = vrot.slane %v3738_v11, 1  ;;  %v379_v16 = vrot.slane %v3738_v11, 2  ;;  %v703_v17 = vld [vmem:[%s6455_s1 + $0x108] sm:$0xff]  ;;  %343 = vst.msk [vmem:[#allocation2] sm:$0xff] %vm342_vm2, %v3738_v11  ;;  %v354_v18 = vrot.slane %v3745_v14, 1  ;;  %v380_v19 = vrot.slane %v3745_v14, 2 }
  0x26   : > { %868 = vmatpush1.msra.mxu0 %v709_v5  ;;  %344 = vst.msk [vmem:[#allocation2 + $0x20] sm:$0xff] %vm342_vm2, %v3745_v14  ;;  %v468_v23 = vsel %vm352_vm0, %v466_v12, %v467_v13  ;;  %v3767_v24 = vld [vmem:[%s3723_s28 + $0x10] sm:$0xff]  ;;  %v698_v27 = vld [vmem:[%s6455_s1 + $0xe0] sm:$0xff]  ;;  %v405_v30 = vrot.slane %v3738_v11, 3  ;;  %v406_v31 = vrot.slane %v3745_v14, 3  ;;  %v697_v32 = vld [vmem:[%s6455_s1 + $0xd8] sm:$0xff]  ;;  %v491_v34 = vsel %vm378_vm1, %v489_v20, %v490_v21 }
  0x27   : > { %869 = vmatprep.subr.mxu0 %v707_v6  ;;  %v700_v25 = vld [vmem:[%s6455_s1 + $0xf0] sm:$0xff]  ;;  %473 = vrot.lane.b32.xlu1 %v468_v23, %s6389_s27  ;;  %v355_v26 = vsel %vm352_vm0, %v353_v15, %v354_v18  ;;  %345 = vst.msk [vmem:[#allocation2 + $0x40] sm:$0xff] %vm342_vm2, %v3767_v24  ;;  %v381_v29 = vsel %vm378_vm1, %v379_v16, %v380_v19  ;;  %v811_v33 = vld [vmem:[%s6455_s1 + $0x468] sm:$0xff]  ;;  %v527_v35 = vrot.slane %v3732_v9, 4  ;;  %v528_v36 = vrot.slane %v3735_v10, 4  ;;  %v3802_v37 = vld [vmem:[%s3723_s28 + $0x40] sm:$0xff] }
  0x28   : > { %870 = vmatpush1.msra.mxu0 %v706_v7  ;;  %v812_v28 = vld [vmem:[%s6455_s1 + $0x470] sm:$0xff]  ;;  %360 = vrot.lane.b32.xlu0 %v355_v26, %s3548_s17  ;;  %v3805_v38 = vld [vmem:[%s3723_s28 + $0x48] sm:$0xff]  ;;  %v694_v40 = vld [vmem:[%s6455_s1 + $0xc0] sm:$0xff]  ;;  %v407_v44 = vsel %vm404_vm3, %v405_v30, %v406_v31  ;;  %v608_v45 = vrot.slane %v3802_v37, 3  ;;  %v631_v52 = vrot.slane %v3802_v37, 4  ;;  %v570_v57 = vrot.slane %v3802_v37, 1 }
  0x29   : > { %871 = vmatprep.subr.mxu0 %v704_v8  ;;  %v695_v39 = vld [vmem:[%s6455_s1 + $0xc8] sm:$0xff]  ;;  %952 = vmatprep.subr.mxu1 %v812_v28  ;;  %v809_v41 = vld [vmem:[%s6455_s1 + $0x458] sm:$0xff]  ;;  %v692_v42 = vld [vmem:[%s6455_s1 + $0xb0] sm:$0xff]  ;;  %v609_v46 = vrot.slane %v3805_v38, 3  ;;  %v529_v48 = vsel %vm6444_vm4, %v527_v35, %v528_v36  ;;  %v632_v56 = vrot.slane %v3805_v38, 4  ;;  %v571_v58 = vrot.slane %v3805_v38, 1 }
  0x2a   : > { %872 = vmatpush1.msra.mxu0 %v703_v17  ;;  %953 = vmatpush1.msra.mxu1 %v811_v33  ;;  %v808_v43 = vld [vmem:[%s6455_s1 + $0x450] sm:$0xff]  ;;  %v691_v47 = vld [vmem:[%s6455_s1 + $0xa8] sm:$0xff]  ;;  %v689_v49 = vld [vmem:[%s6455_s1 + $0x98] sm:$0xff]  ;;  %v431_v1 = vrot.slane %v3738_v11, 4  ;;  %v432_v6 = vrot.slane %v3745_v14, 4  ;;  %v512_v7 = vrot.slane %v3732_v9, 3 }
  0x2b   : > { %873 = vmatprep.subr.mxu0 %v701_v22  ;;  %386 = vrot.lane.b32.xlu1 %v381_v29, %s6389_s27  ;;  %v688_v50 = vld [vmem:[%s6455_s1 + $0x90] sm:$0xff]  ;;  %v806_v51 = vld [vmem:[%s6455_s1 + $0x440] sm:$0xff]  ;;  %v805_v54 = vld [vmem:[%s6455_s1 + $0x438] sm:$0xff]  ;;  %v610_v55 = vsel %vm404_vm3, %v608_v45, %v609_v46  ;;  %v633_v8 = vsel %vm6444_vm4, %v631_v52, %v632_v56  ;;  %v572_v11 = vsel %vm352_vm0, %v570_v57, %v571_v58  ;;  %v513_v15 = vrot.slane %v3735_v10, 3  ;;  %s6476_s11 = smov 78   ;;  %s6431_s18 = smov 82  }
  0x2c   : > { %874 = vmatpush1.msra.mxu0 %v700_v25  ;;  %496 = vrot.lane.b32.xlu0 %v491_v34, %s6397_s29  ;;  %v686_v53 = vld [vmem:[%s6455_s1 + $0x80] sm:$0xff]  ;;  %v3860_v59 = vld [vmem:[%s3723_s28 + $0x30] sm:$0xff]  ;;  %v685_v61 = vld [vmem:[%s6455_s1 + $0x78] sm:$0xff]  ;;  %v593_v9 = vrot.slane %v3802_v37, 2  ;;  %v433_v17 = vsel %vm6444_vm4, %v431_v1, %v432_v6  ;;  %v594_v20 = vrot.slane %v3805_v38, 2  ;;  %v434_v28 = vrot.slane %v3767_v24, 4 }
  0x2d   : > { %875 = vmatprep.subr.mxu0 %v698_v27  ;;  %954 = vmatprep.subr.mxu1 %v809_v41  ;;  %v3863_v60 = vld [vmem:[%s3723_s28 + $0x50] sm:$0xff]  ;;  %v683_v62 = vld [vmem:[%s6455_s1 + $0x68] sm:$0xff]  ;;  %v682_v63 = vld [vmem:[%s6455_s1 + $0x60] sm:$0xff]  ;;  %v530_v2 = vrot.slane %v3860_v59, 4  ;;  %v515_v22 = vrot.slane %v3860_v59, 3  ;;  %442 = vst.msk [vmem:[#allocation2 + $0x8] sm:$0xff] %vm342_vm2, %v433_v17  ;;  %v514_v27 = vsel %vm404_vm3, %v512_v7, %v513_v15 }
  0x2e   : > { %876 = vmatpush1.msra.mxu0 %v697_v32  ;;  %955 = vmatpush1.msra.mxu1 %v808_v43  ;;  %v803_v0 = vld [vmem:[%s6455_s1 + $0x428] sm:$0xff]  ;;  %v611_v3 = vrot.slane %v3863_v60, 3  ;;  %v680_v4 = vld [vmem:[%s6455_s1 + $0x50] sm:$0xff]  ;;  %v802_v5 = vld [vmem:[%s6455_s1 + $0x420] sm:$0xff]  ;;  %v596_v23 = vrot.slane %v3863_v60, 2  ;;  %523 = vst.msk [vmem:[#allocation2 + $0x10] sm:$0xff] %vm342_vm2, %v514_v27  ;;  %v595_v32 = vsel %vm378_vm1, %v593_v9, %v594_v20 }
  0x2f   : > { %877 = vmatprep.subr.mxu0 %v695_v39  ;;  %412 = vrot.lane.b32.xlu1 %v407_v44, %s6397_s29  ;;  %v679_v12 = vld [vmem:[%s6455_s1 + $0x48] sm:$0xff]  ;;  %v800_v16 = vld [vmem:[%s6455_s1 + $0x410] sm:$0xff]  ;;  %v677_v25 = vld [vmem:[%s6455_s1 + $0x38] sm:$0xff]  ;;  %v516_v33 = vsel %vm404_vm3, %v513_v15, %v515_v22  ;;  %v531_v35 = vsel %vm6444_vm4, %v528_v36, %v530_v2  ;;  %604 = vst.msk [vmem:[#allocation2 + $0x18] sm:$0xff] %vm342_vm2, %v595_v32  ;;  %v492_v27 = vrot.slane %v3860_v59, 2  ;;  %s6480_s15 = smov 82  }
  0x30   : > { %878 = vmatpush1.msra.mxu0 %v694_v40  ;;  %534 = vrot.lane.b32.xlu0 %v529_v48, %s3548_s17  ;;  %v799_v26 = vld [vmem:[%s6455_s1 + $0x408] sm:$0xff]  ;;  %v676_v29 = vld [vmem:[%s6455_s1 + $0x30] sm:$0xff]  ;;  %v797_v30 = vld [vmem:[%s6455_s1 + $0x3f8] sm:$0xff]  ;;  %v597_v34 = vsel %vm378_vm1, %v594_v20, %v596_v23  ;;  %524 = vst.msk [vmem:[#allocation2 + $0x30] sm:$0xff] %vm342_vm2, %v516_v33  ;;  %v435_v39 = vsel %vm6444_vm4, %v432_v6, %v434_v28  ;;  %v634_v40 = vrot.slane %v3863_v60, 4  ;;  %v573_v48 = vrot.slane %v3863_v60, 1 }
  0x31   : > { %879 = vmatprep.subr.mxu0 %v692_v42  ;;  %956 = vmatprep.subr.mxu1 %v806_v51  ;;  %605 = vst.msk [vmem:[#allocation2 + $0x38] sm:$0xff] %vm342_vm2, %v597_v34  ;;  %v612_v36 = vsel %vm404_vm3, %v609_v46, %v611_v3  ;;  %v3951_v41 = vld [vmem:[%s3723_s28 + $0x38] sm:$0xff]  ;;  %v796_v42 = vld [vmem:[%s6455_s1 + $0x3f0] sm:$0xff]  ;;  %443 = vst.msk [vmem:[#allocation2 + $0x28] sm:$0xff] %vm342_vm2, %v435_v39  ;;  %s323_s20 = sand.u32 1, %s3538_s10  }
  0x32   : > { %880 = vmatpush1.msra.mxu0 %v691_v47  ;;  %957 = vmatpush1.msra.mxu1 %v805_v54  ;;  %v673_v43 = vld [vmem:[%s6455_s1 + $0x18] sm:$0xff]  ;;  %v794_v44 = vld [vmem:[%s6455_s1 + $0x3e0] sm:$0xff]  ;;  %v517_v45 = vrot.slane %v3951_v41, 3  ;;  %v671_v46 = vld [vmem:[%s6455_s1 + $0x8] sm:$0xff]  ;;  %v635_v52 = vsel %vm6444_vm4, %v632_v56, %v634_v40 }
  0x33   : > { %881 = vmatprep.subr.mxu0 %v689_v49  ;;  %615 = vrot.lane.b32.xlu1 %v610_v55, %s3548_s17  ;;  %v793_v47 = vld [vmem:[%s6455_s1 + $0x3d8] sm:$0xff]  ;;  %v764_v55 = vld [vmem:[%s6455_s1 + $0x2f0] sm:$0xff]  ;;  %v790_v56 = vld [vmem:[%s6455_s1 + $0x3c0] sm:$0xff] }
  0x34   : > { %882 = vmatpush1.msra.mxu0 %v688_v50  ;;  %554 = vrot.lane.b32.xlu0 %v3802_v37, %s6389_s27  ;;  %v674_v37 = vld [vmem:[%s6455_s1 + $0x20] sm:$0xff]  ;;  %v3974_v49 = vld [vmem:[%s3723_s28 + $0x58] sm:$0xff]  ;;  %v518_v51 = vsel %vm404_vm3, %v515_v22, %v517_v45  ;;  %v763_v57 = vld [vmem:[%s6455_s1 + $0x2e8] sm:$0xff]  ;;  %526 = vst.msk [vmem:[#allocation2 + $0x70] sm:$0xf] %vm346_vm5, %v517_v45 }
  0x35   : > { %883 = vmatprep.subr.mxu0 %v686_v53  ;;  %958 = vmatprep.subr.mxu1 %v803_v0  ;;  %v670_v50 = vld [vmem:[%s6455_s1] sm:$0xff]  ;;  %v791_v53 = vld [vmem:[%s6455_s1 + $0x3c8] sm:$0xff]  ;;  %525 = vst.msk [vmem:[#allocation2 + $0x50] sm:$0xff] %vm342_vm2, %v518_v51  ;;  %v598_v54 = vrot.slane %v3974_v49, 2  ;;  %v356_v0 = vrot.slane %v3767_v24, 1  ;;  %v761_v1 = vld [vmem:[%s6455_s1 + $0x2d8] sm:$0xff] }
  0x36   : > { %884 = vmatpush1.msra.mxu0 %v685_v61  ;;  %959 = vmatpush1.msra.mxu1 %v802_v5  ;;  %v788_v61 = vld [vmem:[%s6455_s1 + $0x3b0] sm:$0xff]  ;;  %v787_v5 = vld [vmem:[%s6455_s1 + $0x3a8] sm:$0xff]  ;;  %v758_v6 = vld [vmem:[%s6455_s1 + $0x2c0] sm:$0xff]  ;;  %v613_v9 = vrot.slane %v3974_v49, 3 }
  0x37   : > { %885 = vmatprep.subr.mxu0 %v683_v62  ;;  %638 = vrot.lane.b32.xlu1 %v633_v8, %s6389_s27  ;;  %v599_v62 = vsel %vm378_vm1, %v596_v23, %v598_v54  ;;  %v784_v7 = vld [vmem:[%s6455_s1 + $0x390] sm:$0xff]  ;;  %v357_v8 = vsel %vm352_vm0, %v354_v18, %v356_v0  ;;  %v782_v18 = vld [vmem:[%s6455_s1 + $0x380] sm:$0xff]  ;;  %v781_v17 = vld [vmem:[%s6455_s1 + $0x378] sm:$0xff]  ;;  %v382_v23 = vrot.slane %v3767_v24, 2  ;;  %607 = vst.msk [vmem:[#allocation2 + $0x78] sm:$0xf] %vm346_vm5, %v598_v54 }
  0x38   : > { %886 = vmatpush1.msra.mxu0 %v682_v63  ;;  %577 = vrot.lane.b32.xlu0 %v572_v11, %s6397_s29  ;;  %v574_v63 = vsel %vm352_vm0, %v571_v58, %v573_v48  ;;  %606 = vst.msk [vmem:[#allocation2 + $0x58] sm:$0xff] %vm342_vm2, %v599_v62  ;;  %v785_v58 = vld [vmem:[%s6455_s1 + $0x398] sm:$0xff]  ;;  %v532_v11 = vrot.slane %v3951_v41, 4  ;;  %v779_v20 = vld [vmem:[%s6455_s1 + $0x368] sm:$0xff]  ;;  %v848_v14 = vld [vmem:[%s6455_s1 + $0x590] sm:$0xff]  ;;  %v471_v62 = vrot.slane %v3951_v41, 1 }
  0x39   : > { %887 = vmatprep.subr.mxu0 %v680_v4  ;;  %960 = vmatprep.subr.mxu1 %v800_v16  ;;  %v469_v4 = vrot.slane %v3860_v59, 1  ;;  %v755_v16 = vld [vmem:[%s6455_s1 + $0x2a8] sm:$0xff]  ;;  %v749_v33 = vld [vmem:[%s6455_s1 + $0x278] sm:$0xff] }
  0x3a   : > { %888 = vmatpush1.msra.mxu0 %v679_v12  ;;  %961 = vmatpush1.msra.mxu1 %v799_v26  ;;  %v757_v12 = vld [vmem:[%s6455_s1 + $0x2b8] sm:$0xff]  ;;  %v533_v22 = vsel %vm6444_vm4, %v530_v2, %v532_v11  ;;  %v614_v26 = vsel %vm404_vm3, %v611_v3, %v613_v9  ;;  %v778_v2 = vld [vmem:[%s6455_s1 + $0x360] sm:$0xff]  ;;  %v776_v3 = vld [vmem:[%s6455_s1 + $0x350] sm:$0xff] }
  0x3b   : > { %889 = vmatprep.subr.mxu0 %v677_v25  ;;  %962 = vmatprep.subr.mxu1 %v797_v30  ;;  %v470_v15 = vsel %vm352_vm0, %v467_v13, %v469_v4  ;;  %v754_v13 = vld [vmem:[%s6455_s1 + $0x2a0] sm:$0xff]  ;;  %v752_v25 = vld [vmem:[%s6455_s1 + $0x290] sm:$0xff]  ;;  %v751_v30 = vld [vmem:[%s6455_s1 + $0x288] sm:$0xff] }
  0x3c   : > { %890 = vmatpush1.msra.mxu0 %v676_v29  ;;  %536 = vrot.lane.b32.xlu1 %v531_v35, %s3548_s17  ;;  %v4087_v29 = vld [vmem:[%s3723_s28 + $0x18] sm:$0xff]  ;;  %v775_v34 = vld [vmem:[%s6455_s1 + $0x348] sm:$0xff]  ;;  %v383_v35 = vsel %vm378_vm1, %v380_v19, %v382_v23  ;;  %s6407_s28 = smov 112  }
  0x3d   : > { %891 = vmatprep.subr.mxu0 %v674_v37  ;;  %617 = vrot.lane.b32.xlu0 %v612_v36, %s3548_s17  ;;  %v436_v32 = vrot.slane %v4087_v29, 4  ;;  %v748_v37 = vld [vmem:[%s6455_s1 + $0x270] sm:$0xff]  ;;  %v493_v36 = vsel %vm378_vm1, %v490_v21, %v492_v27  ;;  %v773_v19 = vld [vmem:[%s6455_s1 + $0x338] sm:$0xff]  ;;  %347 = vst.msk [vmem:[#allocation2 + $0x60] sm:$0xf] %vm346_vm5, %v4087_v29  ;;  %v358_v54 = vrot.slane %v4087_v29, 1 }
  0x3e   : > { %963 = vmatpush1.msra.mxu1 %v796_v42  ;;  %892 = vmatpush1.msra.mxu0 %v673_v43  ;;  %v636_v42 = vrot.slane %v3974_v49, 4  ;;  %v745_v21 = vld [vmem:[%s6455_s1 + $0x258] sm:$0xff]  ;;  %v770_v43 = vld [vmem:[%s6455_s1 + $0x320] sm:$0xff] }
  0x3f   : > { %964 = vmatprep.subr.mxu1 %v794_v44  ;;  %893 = vmatprep.subr.mxu0 %v671_v46  ;;  %v437_v39 = vsel %vm6444_vm4, %v434_v28, %v436_v32  ;;  %v746_v28 = vld [vmem:[%s6455_s1 + $0x260] sm:$0xff]  ;;  %v408_v44 = vrot.slane %v3767_v24, 3  ;;  %v743_v46 = vld [vmem:[%s6455_s1 + $0x248] sm:$0xff]  ;;  %v769_v51 = vld [vmem:[%s6455_s1 + $0x318] sm:$0xff]  ;;  %445 = vst.msk [vmem:[#allocation2 + $0x68] sm:$0xf] %vm346_vm5, %v436_v32 }
  0x40   : > { %965 = vmatpush1.msra.mxu1 %v793_v47  ;;  %556 = vrot.lane.b32.xlu1 %v3805_v38, %s6389_s27  ;;  %v760_v38 = vld [vmem:[%s6455_s1 + $0x2d0] sm:$0xff]  ;;  %444 = vst.msk [vmem:[#allocation2 + $0x48] sm:$0xff] %vm342_vm2, %v437_v39  ;;  %v637_v47 = vsel %vm6444_vm4, %v634_v40, %v636_v42  ;;  %v830_v32 = vld [vmem:[%s6455_s1 + $0x500] sm:$0xff]  ;;  %v821_v24 = vld [vmem:[%s6455_s1 + $0x4b8] sm:$0xff]  ;;  %vm1523_vm2 = vcmask 1045509   ;;  %vm1527_vm5 = vcmask 1047559  }
  0x41   : > { %894 = vmatpush1.msra.mxu0 %v670_v50  ;;  %640 = vrot.lane.b32.xlu0 %v635_v52, %s6389_s27  ;;  %v575_v50 = vrot.slane %v3974_v49, 1  ;;  %v742_v52 = vld [vmem:[%s6455_s1 + $0x240] sm:$0xff]  ;;  %v740_v40 = vld [vmem:[%s6455_s1 + $0x230] sm:$0xff]  ;;  %s6404_s27 = smov 54   ;;  %vm1758_vm4 = vcmask 1015664  }
  0x42   : > { %966 = vmatprep.subr.mxu1 %v791_v53  ;;  %895 = vmatprep.subr.mxu0 %v764_v55  ;;  %v767_v53 = vld [vmem:[%s6455_s1 + $0x308] sm:$0xff]  ;;  %v766_v55 = vld [vmem:[%s6455_s1 + $0x300] sm:$0xff]  ;;  %v824_v39 = vld [vmem:[%s6455_s1 + $0x4d0] sm:$0xff] }
  0x43   : > { %967 = vmatpush1.msra.mxu1 %v790_v56  ;;  %896 = vmatpush2.msra.mxu0 %v763_v57  ;;  %v409_v56 = vsel %vm404_vm3, %v406_v31, %v408_v44  ;;  %v739_v57 = vld [vmem:[%s6455_s1 + $0x228] sm:$0xff]  ;;  %v576_v45 = vsel %vm352_vm0, %v573_v48, %v575_v50  ;;  %v737_v31 = vld [vmem:[%s6455_s1 + $0x218] sm:$0xff]  ;;  %v736_v48 = vld [vmem:[%s6455_s1 + $0x210] sm:$0xff] }
  0x44   : > { %968 = vmatprep.subr.mxu1 %v788_v61  ;;  %579 = vrot.lane.b32.xlu1 %v574_v63, %s6397_s29  ;;  %v845_v61 = vld [vmem:[%s6455_s1 + $0x578] sm:$0xff]  ;;  %v734_v63 = vld [vmem:[%s6455_s1 + $0x200] sm:$0xff] }
  0x45   : > { %897 = vmatprep.subr.mxu0 %v761_v1  ;;  %452 = vrot.lane.b32.xlu0 %v3735_v10, %s3548_s17  ;;  %v772_v10 = vld [vmem:[%s6455_s1 + $0x330] sm:$0xff]  ;;  %v359_v1 = vsel %vm352_vm0, %v356_v0, %v358_v54  ;;  %v731_v0 = vld [vmem:[%s6455_s1 + $0x1e8] sm:$0xff] }
  0x46   : > { %969 = vmatpush1.msra.mxu1 %v787_v5  ;;  %898 = vmatpush2.msra.mxu0 %v760_v38  ;;  %v844_v5 = vld [vmem:[%s6455_s1 + $0x570] sm:$0xff]  ;;  %v733_v38 = vld [vmem:[%s6455_s1 + $0x1f8] sm:$0xff] }
  0x47   : > { %970 = vmatprep.subr.mxu1 %v785_v58  ;;  %899 = vmatprep.subr.mxu0 %v758_v6  ;;  %v842_v58 = vld [vmem:[%s6455_s1 + $0x560] sm:$0xff]  ;;  %v841_v6 = vld [vmem:[%s6455_s1 + $0x558] sm:$0xff] }
  0x48   : > { %971 = vmatpush1.msra.mxu1 %v784_v7  ;;  %362 = vrot.lane.b32.xlu1 %v357_v8, %s3548_s17  ;;  %v472_v7 = vsel %vm352_vm0, %v469_v4, %v471_v62  ;;  %v730_v8 = vld [vmem:[%s6455_s1 + $0x1e0] sm:$0xff]  ;;  %vm1519_vm0 = vcmask 1043459  }
  0x49   : > { %900 = vmatpush2.msra.mxu0 %v757_v12  ;;  %475 = vrot.lane.b32.xlu0 %v470_v15, %s6457_s16  ;;  %v384_v12 = vrot.slane %v4087_v29, 2  ;;  %v839_v15 = vld [vmem:[%s6455_s1 + $0x548] sm:$0xff]  ;;  %v838_v4 = vld [vmem:[%s6455_s1 + $0x540] sm:$0xff] }
  0x4a   : > { %972 = vmatprep.subr.mxu1 %v782_v18  ;;  %901 = vmatprep.subr.mxu0 %v755_v16  ;;  %v728_v18 = vld [vmem:[%s6455_s1 + $0x1d0] sm:$0xff]  ;;  %v727_v16 = vld [vmem:[%s6455_s1 + $0x1c8] sm:$0xff] }
  0x4b   : > { %973 = vmatpush1.msra.mxu1 %v781_v17  ;;  %902 = vmatpush2.msra.mxu0 %v754_v13  ;;  %v836_v17 = vld [vmem:[%s6455_s1 + $0x530] sm:$0xff]  ;;  %v494_v13 = vrot.slane %v3951_v41, 2 }
  0x4c   : > { %974 = vmatprep.subr.mxu1 %v779_v20  ;;  %538 = vrot.lane.b32.xlu1 %v533_v22, %s3548_s17  ;;  %v725_v20 = vld [vmem:[%s6455_s1 + $0x1b8] sm:$0xff]  ;;  %v385_v22 = vsel %vm378_vm1, %v382_v23, %v384_v12  ;;  %v722_v23 = vld [vmem:[%s6455_s1 + $0x1a0] sm:$0xff] }
  0x4d   : > { %903 = vmatprep.subr.mxu0 %v752_v25  ;;  %619 = vrot.lane.b32.xlu0 %v614_v26, %s3548_s17  ;;  %v835_v25 = vld [vmem:[%s6455_s1 + $0x528] sm:$0xff]  ;;  %v833_v26 = vld [vmem:[%s6455_s1 + $0x518] sm:$0xff] }
  0x4e   : > { %975 = vmatpush1.msra.mxu1 %v778_v2  ;;  %904 = vmatpush2.msra.mxu0 %v751_v30  ;;  %v832_v2 = vld [vmem:[%s6455_s1 + $0x510] sm:$0xff]  ;;  %v495_v30 = vsel %vm378_vm1, %v492_v27, %v494_v13  ;;  %v829_v27 = vld [vmem:[%s6455_s1 + $0x4f8] sm:$0xff]  ;;  %vm1521_vm1 = vcmask 1044484  }
  0x4f   : > { %976 = vmatprep.subr.mxu1 %v776_v3  ;;  %905 = vmatprep.subr.mxu0 %v749_v33  ;;  %v410_v3 = vrot.slane %v4087_v29, 3  ;;  %v718_v33 = vld [vmem:[%s6455_s1 + $0x180] sm:$0xff] }
  0x50   : > { %977 = vmatpush1.msra.mxu1 %v775_v34  ;;  %388 = vrot.lane.b32.xlu1 %v383_v35, %s6457_s16  ;;  %v827_v34 = vld [vmem:[%s6455_s1 + $0x4e8] sm:$0xff]  ;;  %v826_v35 = vld [vmem:[%s6455_s1 + $0x4e0] sm:$0xff] }
  0x51   : > { %906 = vmatpush2.msra.mxu0 %v748_v37  ;;  %498 = vrot.lane.b32.xlu0 %v493_v36, %s6397_s29  ;;  %v411_v37 = vsel %vm404_vm3, %v408_v44, %v410_v3  ;;  %v823_v36 = vld [vmem:[%s6455_s1 + $0x4c8] sm:$0xff]  ;;  %v765_v44 = vld [vmem:[%s6455_s1 + $0x2f8] sm:$0xff]  ;;  %vm1525_vm3 = vcmask 1046534  }
  0x52   : > { %978 = vmatprep.subr.mxu1 %v773_v19  ;;  %907 = vmatprep.subr.mxu0 %v746_v28  ;;  %v820_v19 = vld [vmem:[%s6455_s1 + $0x4b0] sm:$0xff]  ;;  %v818_v28 = vld [vmem:[%s6455_s1 + $0x4a0] sm:$0xff] }
  0x53   : > { %979 = vmatpush1.msra.mxu1 %v772_v10  ;;  %908 = vmatpush2.msra.mxu0 %v745_v21  ;;  %v6440_v10 = vmov 0.0   ;;  %v815_v21 = vld [vmem:[%s6455_s1 + $0x488] sm:$0xff] }
  0x54   : > { %980 = vmatprep.subr.mxu1 %v770_v43  ;;  %558 = vrot.lane.b32.xlu1 %v3863_v60, %s6457_s16  ;;  %v847_v60 = vld [vmem:[%s6455_s1 + $0x588] sm:$0xff]  ;;  %v814_v43 = vld [vmem:[%s6455_s1 + $0x480] sm:$0xff] }
  0x55   : > { %909 = vmatprep.subr.mxu0 %v743_v46  ;;  %642 = vrot.lane.b32.xlu0 %v637_v47, %s6457_s16 }
  0x56   : > { %981 = vmatpush1.msra.mxu1 %v769_v51  ;;  %910 = vmatpush2.msra.mxu0 %v742_v52 }
  0x57   : > { %982 = vmatprep.subr.mxu1 %v767_v53  ;;  %911 = vmatprep.subr.mxu0 %v740_v40 }
  0x58   : > { %983 = vmatpush1.msra.mxu1 %v766_v55  ;;  %414 = vrot.lane.b32.xlu1 %v409_v56, %s6397_s29  ;;  %v813_v55 = vld [vmem:[%s6455_s1 + $0x478] sm:$0xff] }
  0x59   : > { %912 = vmatpush2.msra.mxu0 %v739_v57  ;;  %581 = vrot.lane.b32.xlu0 %v576_v45, %s6397_s29 }
  0x5a   : > { %992 = vmatprep.subr.mxu1 %v848_v14  ;;  %913 = vmatprep.subr.mxu0 %v737_v31  ;;  %v807_v14 = vld [vmem:[%s6455_s1 + $0x448] sm:$0xff] }
  0x5b   : > { %993 = vmatpush2.msra.mxu1 %v847_v60  ;;  %914 = vmatpush2.msra.mxu0 %v736_v48  ;;  %v804_v48 = vld [vmem:[%s6455_s1 + $0x430] sm:$0xff] }
  0x5c   : > { %994 = vmatprep.subr.mxu1 %v845_v61  ;;  %454 = vrot.lane.b32.xlu1 %v3860_v59, %s3548_s17  ;;  %v719_v59 = vld [vmem:[%s6455_s1 + $0x188] sm:$0xff]  ;;  %v801_v61 = vld [vmem:[%s6455_s1 + $0x418] sm:$0xff] }
  0x5d   : > { %915 = vmatprep.subr.mxu0 %v734_v63  ;;  %364 = vrot.lane.b32.xlu0 %v359_v1, %s3548_s17  ;;  %v717_v1 = vld [vmem:[%s6455_s1 + $0x178] sm:$0xff] }
  0x5e   : > { %995 = vmatpush2.msra.mxu1 %v844_v5  ;;  %916 = vmatpush2.msra.mxu0 %v733_v38 }
  0x5f   : > { %996 = vmatprep.subr.mxu1 %v842_v58  ;;  %917 = vmatprep.subr.mxu0 %v731_v0  ;;  %v798_v58 = vld [vmem:[%s6455_s1 + $0x400] sm:$0xff] }
  0x60   : > { %997 = vmatpush2.msra.mxu1 %v841_v6  ;;  %477 = vrot.lane.b32.xlu1 %v472_v7, %s6457_s16  ;;  %v762_v0 = vld [vmem:[%s6455_s1 + $0x2e0] sm:$0xff]  ;;  %v795_v7 = vld [vmem:[%s6455_s1 + $0x3e8] sm:$0xff] }
  0x61   : > { %918 = vmatpush2.msra.mxu0 %v730_v8  ;;  %540 = vrot.lane.b32.xlu0 %v532_v11, %s3548_s17  ;;  %v724_v11 = vld [vmem:[%s6455_s1 + $0x1b0] sm:$0xff]  ;;  %v714_v6 = vld [vmem:[%s6455_s1 + $0x160] sm:$0xff]  ;;  %v759_v8 = vld [vmem:[%s6455_s1 + $0x2c8] sm:$0xff] }
  0x62   : > { %998 = vmatprep.subr.mxu1 %v839_v15  ;;  %919 = vmatprep.subr.mxu0 %v728_v18  ;;  %v711_v15 = vld [vmem:[%s6455_s1 + $0x148] sm:$0xff] }
  0x63   : > { %999 = vmatpush2.msra.mxu1 %v838_v4  ;;  %920 = vmatpush2.msra.mxu0 %v727_v16  ;;  %v792_v4 = vld [vmem:[%s6455_s1 + $0x3d0] sm:$0xff] }
  0x64   : > { %1000 = vmatprep.subr.mxu1 %v836_v17  ;;  %621 = vrot.lane.b32.xlu1 %v613_v9, %s3548_s17  ;;  %v721_v9 = vld [vmem:[%s6455_s1 + $0x198] sm:$0xff]  ;;  %v756_v16 = vld [vmem:[%s6455_s1 + $0x2b0] sm:$0xff] }
  0x65   : > { %921 = vmatprep.subr.mxu0 %v725_v20  ;;  %390 = vrot.lane.b32.xlu0 %v385_v22, %s6457_s16  ;;  %v708_v17 = vld [vmem:[%s6455_s1 + $0x130] sm:$0xff]  ;;  %v753_v22 = vld [vmem:[%s6455_s1 + $0x298] sm:$0xff] }
  0x66   : > { %1001 = vmatpush2.msra.mxu1 %v835_v25  ;;  %922 = vmatpush2.msra.mxu0 %v724_v11 }
  0x67   : > { %1002 = vmatprep.subr.mxu1 %v833_v26  ;;  %923 = vmatprep.subr.mxu0 %v722_v23  ;;  %v786_v26 = vld [vmem:[%s6455_s1 + $0x3a0] sm:$0xff]  ;;  %v705_v23 = vld [vmem:[%s6455_s1 + $0x118] sm:$0xff] }
  0x68   : > { %1003 = vmatpush2.msra.mxu1 %v832_v2  ;;  %500 = vrot.lane.b32.xlu1 %v495_v30, %s6397_s29  ;;  %v783_v2 = vld [vmem:[%s6455_s1 + $0x388] sm:$0xff]  ;;  %v750_v30 = vld [vmem:[%s6455_s1 + $0x280] sm:$0xff] }
  0x69   : > { %924 = vmatpush2.msra.mxu0 %v721_v9  ;;  %560 = vrot.lane.b32.xlu0 %v3974_v49, %s6457_s16 }
  0x6a   : > { %1004 = vmatprep.subr.mxu1 %v830_v32  ;;  %925 = vmatprep.subr.mxu0 %v719_v59  ;;  %v702_v32 = vld [vmem:[%s6455_s1 + $0x100] sm:$0xff] }
  0x6b   : > { %1005 = vmatpush2.msra.mxu1 %v829_v27  ;;  %926 = vmatpush2.msra.mxu0 %v718_v33  ;;  %v780_v27 = vld [vmem:[%s6455_s1 + $0x370] sm:$0xff]  ;;  %v747_v33 = vld [vmem:[%s6455_s1 + $0x268] sm:$0xff] }
  0x6c   : > { %1006 = vmatprep.subr.mxu1 %v827_v34  ;;  %644 = vrot.lane.b32.xlu1 %v636_v42, %s6457_s16  ;;  %v817_v42 = vld [vmem:[%s6455_s1 + $0x498] sm:$0xff]  ;;  %v699_v34 = vld [vmem:[%s6455_s1 + $0xe8] sm:$0xff] }
  0x6d   : > { %1007 = vmatpush2.msra.mxu1 %v826_v35  ;;  %416 = vrot.lane.b32.xlu0 %v411_v37, %s6397_s29  ;;  %v777_v35 = vld [vmem:[%s6455_s1 + $0x358] sm:$0xff]  ;;  %v744_v37 = vld [vmem:[%s6455_s1 + $0x250] sm:$0xff] }
  0x6e   : > { %1008 = vmatprep.subr.mxu1 %v824_v39  ;;  %1126 = vmatprep.subr.mxu0 %v6440_v10 }
  0x6f   : > { %1009 = vmatpush2.msra.mxu1 %v823_v36  ;;  %v696_v36 = vld [vmem:[%s6455_s1 + $0xd0] sm:$0xff] }
  0x70   : > { %1010 = vmatprep.subr.mxu1 %v821_v24  ;;  %583 = vrot.lane.b32.xlu1 %v575_v50, %s6397_s29 }
  0x71   : > { %1011 = vmatpush2.msra.mxu1 %v820_v19  ;;  %456 = vrot.lane.b32.xlu0 %v3951_v41, %s3548_s17  ;;  %v774_v19 = vld [vmem:[%s6455_s1 + $0x340] sm:$0xff] }
  0x72   : > { %1012 = vmatprep.subr.mxu1 %v818_v28  ;;  %v741_v28 = vld [vmem:[%s6455_s1 + $0x238] sm:$0xff] }
  0x73   : > { %1013 = vmatpush2.msra.mxu1 %v817_v42  ;;  %v693_v42 = vld [vmem:[%s6455_s1 + $0xb8] sm:$0xff] }
  0x74   : > { %1014 = vmatprep.subr.mxu1 %v815_v21  ;;  %366 = vrot.lane.b32.xlu1 %v358_v54, %s3548_s17  ;;  %v810_v54 = vld [vmem:[%s6455_s1 + $0x460] sm:$0xff]  ;;  %v771_v21 = vld [vmem:[%s6455_s1 + $0x328] sm:$0xff]  ;;  %s6401_s17 = smov 110  }
  0x75   : > { %1015 = vmatpush2.msra.mxu1 %v814_v43  ;;  %479 = vrot.lane.b32.xlu0 %v471_v62, %s6457_s16  ;;  %v738_v43 = vld [vmem:[%s6455_s1 + $0x220] sm:$0xff] }
  0x76   : > { %3288 = vmatprep.subr.mxu1 %v765_v44 }
  0x78   : > { %392 = vrot.lane.b32.xlu1 %v384_v12, %s6457_s16 }
  0x79   : > { %502 = vrot.lane.b32.xlu0 %v494_v13, %s6397_s29  ;;  %v789_v13 = vld [vmem:[%s6455_s1 + $0x3b8] sm:$0xff] }
  0x7c   : > { %418 = vrot.lane.b32.xlu1 %v410_v3, %s6397_s29 }
  0x96   : > { %v451_v49 = vpop.permute.xlu0 %450 }
  0x97   : > { %462 = vst.msk [vmem:[#allocation2 + $0x8] sm:$0xff] %vm372_vm6, %v451_v49  ;;  %v690_v49 = vld [vmem:[%s6455_s1 + $0xa0] sm:$0xff] }
  0x99   : > { %v474_v46 = vpop.permute.xlu1 %473 }
  0x9a   : > { %485 = vst.msk [vmem:[#allocation2 + $0x8] sm:$0xff] %vm398_vm7, %v474_v46  ;;  %v361_v47 = vpop.permute.xlu0 %360 }
  0x9b   : > { %373 = vst.msk [vmem:[#allocation2] sm:$0xff] %vm372_vm6, %v361_v47  ;;  %v768_v47 = vld [vmem:[%s6455_s1 + $0x310] sm:$0xff] }
  0x9d   : > { %v387_v29 = vpop.permute.xlu1 %386 }
  0x9e   : > { %399 = vst.msk [vmem:[#allocation2] sm:$0xff] %vm398_vm7, %v387_v29  ;;  %v497_v50 = vpop.permute.xlu0 %496  ;;  %v735_v29 = vld [vmem:[%s6455_s1 + $0x208] sm:$0xff] }
  0x9f   : > { %508 = vst.msk [vmem:[#allocation2 + $0x8] sm:$0xff] %vm424_vm8, %v497_v50  ;;  %v687_v50 = vld [vmem:[%s6455_s1 + $0x88] sm:$0xff] }
  0xa1   : > { %v413_v41 = vpop.permute.xlu1 %412 }
  0xa2   : > { %425 = vst.msk [vmem:[#allocation2] sm:$0xff] %vm424_vm8, %v413_v41  ;;  %v535_v51 = vpop.permute.xlu0 %534  ;;  %v849_v41 = vld [vmem:[%s6455_s1 + $0x598] sm:$0xff] }
  0xa3   : > { %546 = vst.msk [vmem:[#allocation2 + $0x10] sm:$0xff] %vm372_vm6, %v535_v51 }
  0xa5   : > { %v616_v52 = vpop.permute.xlu1 %615 }
  0xa6   : > { %627 = vst.msk [vmem:[#allocation2 + $0x18] sm:$0xff] %vm372_vm6, %v616_v52  ;;  %v555_v53 = vpop.permute.xlu0 %554  ;;  %v4380_v40 = vld [vmem:[#allocation2 + $0x8] sm:$0xff]  ;;  %v732_v52 = vld [vmem:[%s6455_s1 + $0x1f0] sm:$0xff] }
  0xa7   : > { %566 = vst.msk [vmem:[#allocation2 + $0x10] sm:$0xff] %vm398_vm7, %v555_v53  ;;  %927 = vmatprep.mubr.f32.mxu0 %v4380_v40 }
  0xa9   : > { %v639_v56 = vpop.permute.xlu1 %638  ;;  %v4387_v57 = vld [vmem:[#allocation2] sm:$0xff] }
  0xaa   : > { %650 = vst.msk [vmem:[#allocation2 + $0x18] sm:$0xff] %vm398_vm7, %v639_v56  ;;  %v578_v45 = vpop.permute.xlu0 %577  ;;  %928 = vmatmul.mubr.f32.vlgmr.msra.gmra.mxu0 %v4387_v57  ;;  %v684_v56 = vld [vmem:[%s6455_s1 + $0x70] sm:$0xff] }
  0xab   : > { %589 = vst.msk [vmem:[#allocation2 + $0x10] sm:$0xff] %vm424_vm8, %v578_v45  ;;  %1127 = vmatpush1.msra.mxu0 %v813_v55  ;;  %v846_v45 = vld [vmem:[%s6455_s1 + $0x580] sm:$0xff] }
  0xac   : > { %1128 = vmatprep.subr.mxu0 %v6440_v10 }
  0xad   : > { %1129 = vmatpush1.msra.mxu0 %v810_v54  ;;  %v729_v54 = vld [vmem:[%s6455_s1 + $0x1d8] sm:$0xff] }
  0xae   : > { %v537_v31 = vpop.permute.xlu1 %536  ;;  %1130 = vmatprep.subr.mxu0 %v6440_v10 }
  0xaf   : > { %547 = vst.msk [vmem:[#allocation2 + $0x30] sm:$0xff] %vm372_vm6, %v537_v31  ;;  %v618_v60 = vpop.permute.xlu0 %617  ;;  %1131 = vmatpush1.msra.mxu0 %v807_v14  ;;  %v681_v14 = vld [vmem:[%s6455_s1 + $0x58] sm:$0xff] }
  0xb0   : > { %628 = vst.msk [vmem:[#allocation2 + $0x38] sm:$0xff] %vm372_vm6, %v618_v60  ;;  %1132 = vmatprep.subr.mxu0 %v6440_v10  ;;  %v843_v60 = vld [vmem:[%s6455_s1 + $0x568] sm:$0xff] }
  0xb1   : > { %v4409_v63 = vld [vmem:[#allocation2 + $0x18] sm:$0xff]  ;;  %1133 = vmatpush1.msra.mxu0 %v804_v48  ;;  %v726_v48 = vld [vmem:[%s6455_s1 + $0x1c0] sm:$0xff] }
  0xb2   : > { %v557_v62 = vpop.permute.xlu1 %556  ;;  %3249 = vmatprep.mubr.msk.f32.mxu1 %vm850_vm9, %v4409_v63  ;;  %v4417_v38 = vld [vmem:[#allocation2 + $0x10] sm:$0xff]  ;;  %1134 = vmatprep.subr.mxu0 %v6440_v10 }
  0xb3   : > { %567 = vst.msk [vmem:[#allocation2 + $0x30] sm:$0xff] %vm398_vm7, %v557_v62  ;;  %v641_v5 = vpop.permute.xlu0 %640  ;;  %1017 = vmatmul.mubr.f32.vlgmr.msra.gmra.mxu1 %v4417_v38  ;;  %1135 = vmatpush1.msra.mxu0 %v801_v61 }
  0xb4   : > { %651 = vst.msk [vmem:[#allocation2 + $0x38] sm:$0xff] %vm398_vm7, %v641_v5  ;;  %1136 = vmatprep.subr.mxu0 %v6440_v10  ;;  %3289 = vmatpush3.msra.mxu1 %v717_v1  ;;  %v678_v1 = vld [vmem:[%s6455_s1 + $0x40] sm:$0xff]  ;;  %v723_v5 = vld [vmem:[%s6455_s1 + $0x1a8] sm:$0xff] }
  0xb5   : > { %1137 = vmatpush1.msra.mxu0 %v798_v58  ;;  %3290 = vmatprep.subr.mxu1 %v762_v0  ;;  %v840_v58 = vld [vmem:[%s6455_s1 + $0x550] sm:$0xff] }
  0xb6   : > { %v580_v12 = vpop.permute.xlu1 %579  ;;  %1138 = vmatprep.subr.mxu0 %v6440_v10  ;;  %3291 = vmatpush3.msra.mxu1 %v714_v6 }
  0xb7   : > { %590 = vst.msk [vmem:[#allocation2 + $0x30] sm:$0xff] %vm424_vm8, %v580_v12  ;;  %v453_v18 = vpop.permute.xlu0 %452  ;;  %1139 = vmatpush1.msra.mxu0 %v795_v7  ;;  %3292 = vmatprep.subr.mxu1 %v759_v8  ;;  %v675_v7 = vld [vmem:[%s6455_s1 + $0x28] sm:$0xff] }
  0xb8   : > { %463 = vst.msk [vmem:[#allocation2 + $0x28] sm:$0xff] %vm372_vm6, %v453_v18  ;;  %1140 = vmatprep.subr.mxu0 %v6440_v10  ;;  %3293 = vmatpush3.msra.mxu1 %v711_v15  ;;  %v837_v15 = vld [vmem:[%s6455_s1 + $0x538] sm:$0xff]  ;;  %v720_v18 = vld [vmem:[%s6455_s1 + $0x190] sm:$0xff] }
  0xb9   : > { %1141 = vmatpush1.msra.mxu0 %v792_v4  ;;  %3294 = vmatprep.subr.mxu1 %v756_v16  ;;  %v672_v4 = vld [vmem:[%s6455_s1 + $0x10] sm:$0xff]  ;;  %v834_v16 = vld [vmem:[%s6455_s1 + $0x520] sm:$0xff] }
  0xba   : > { %v363_v20 = vpop.permute.xlu1 %362  ;;  %1142 = vmatprep.subr.mxu0 %v6440_v10  ;;  %3295 = vmatpush3.msra.mxu1 %v708_v17 }
  0xbb   : > { %374 = vst.msk [vmem:[#allocation2 + $0x20] sm:$0xff] %vm372_vm6, %v363_v20  ;;  %v476_v25 = vpop.permute.xlu0 %475  ;;  %v4461_v11 = vld [vmem:[#allocation2 + $0x38] sm:$0xff]  ;;  %1143 = vmatpush1.msra.mxu0 %v789_v13  ;;  %3296 = vmatprep.subr.mxu1 %v753_v22  ;;  %v831_v20 = vld [vmem:[%s6455_s1 + $0x508] sm:$0xff]  ;;  %v828_v22 = vld [vmem:[%s6455_s1 + $0x4f0] sm:$0xff] }
  0xbc   : > { %486 = vst.msk [vmem:[#allocation2 + $0x28] sm:$0xff] %vm398_vm7, %v476_v25  ;;  %3250 = vmatprep.mubr.msk.f32.mxu1 %vm850_vm9, %v4461_v11  ;;  %1144 = vmatprep.subr.mxu0 %v6440_v10 }
  0xbd   : > { %1145 = vmatpush1.msra.mxu0 %v786_v26  ;;  %3297 = vmatpush3.msra.mxu1 %v705_v23  ;;  %v825_v23 = vld [vmem:[%s6455_s1 + $0x4d8] sm:$0xff] }
  0xbe   : > { %v539_v9 = vpop.permute.xlu1 %538  ;;  %v4480_v3 = vld [vmem:[#allocation2 + $0x30] sm:$0xff]  ;;  %1146 = vmatprep.subr.mxu0 %v6440_v10  ;;  %3298 = vmatprep.subr.mxu1 %v750_v30 }
  0xbf   : > { %548 = vst.msk [vmem:[#allocation2 + $0x50] sm:$0xff] %vm372_vm6, %v539_v9  ;;  %1023 = vmatmul.mubr.f32.gmra.mxu1 %v4480_v3  ;;  %v620_v59 = vpop.permute.xlu0 %619  ;;  %1147 = vmatpush1.msra.mxu0 %v783_v2  ;;  %v822_v2 = vld [vmem:[%s6455_s1 + $0x4c0] sm:$0xff] }
  0xc0   : > { %629 = vst.msk [vmem:[#allocation2 + $0x58] sm:$0xff] %vm372_vm6, %v620_v59  ;;  %1148 = vmatprep.subr.mxu0 %v6440_v10  ;;  %3299 = vmatpush3.msra.mxu1 %v702_v32  ;;  %v819_v32 = vld [vmem:[%s6455_s1 + $0x4a8] sm:$0xff]  ;;  %v816_v59 = vld [vmem:[%s6455_s1 + $0x490] sm:$0xff]  ;;  %s3581_s1 = smov 26  }
  0xc1   : > { %1149 = vmatpush1.msra.mxu0 %v780_v27  ;;  %3300 = vmatprep.subr.mxu1 %v747_v33 }
  0xc2   : > { %v389_v39 = vpop.permute.xlu1 %388  ;;  %1150 = vmatprep.subr.mxu0 %v6440_v10  ;;  %3301 = vmatpush3.msra.mxu1 %v699_v34 }
  0xc3   : > { %400 = vst.msk [vmem:[#allocation2 + $0x20] sm:$0xff] %vm398_vm7, %v389_v39  ;;  %v499_v24 = vpop.permute.xlu0 %498  ;;  %1151 = vmatpush1.msra.mxu0 %v777_v35  ;;  %3302 = vmatprep.subr.mxu1 %v744_v37 }
  0xc4   : > { %509 = vst.msk [vmem:[#allocation2 + $0x28] sm:$0xff] %vm424_vm8, %v499_v24  ;;  %1152 = vmatprep.subr.mxu0 %v6440_v10  ;;  %3303 = vmatpush3.msra.mxu1 %v696_v36 }
  0xc5   : > { %1153 = vmatpush1.msra.mxu0 %v774_v19  ;;  %3304 = vmatprep.subr.mxu1 %v741_v28 }
  0xc6   : > { %v559_v44 = vpop.permute.xlu1 %558  ;;  %1154 = vmatprep.subr.mxu0 %v6440_v10  ;;  %3305 = vmatpush3.msra.mxu1 %v693_v42 }
  0xc7   : > { %568 = vst.msk [vmem:[#allocation2 + $0x50] sm:$0xff] %vm398_vm7, %v559_v44  ;;  %v643_v46 = vpop.permute.xlu0 %642  ;;  %1155 = vmatpush1.msra.mxu0 %v771_v21  ;;  %3306 = vmatprep.subr.mxu1 %v738_v43 }
  0xc8   : > { %652 = vst.msk [vmem:[#allocation2 + $0x58] sm:$0xff] %vm398_vm7, %v643_v46  ;;  %1156 = vmatprep.subr.mxu0 %v6440_v10  ;;  %3307 = vmatpush3.msra.mxu1 %v690_v49 }
  0xc9   : > { %1157 = vmatpush1.msra.mxu0 %v768_v47  ;;  %3308 = vmatprep.subr.mxu1 %v735_v29 }
  0xca   : > { %v415_v51 = vpop.permute.xlu1 %414  ;;  %1166 = vmatprep.subr.mxu0 %v6440_v10  ;;  %3309 = vmatpush3.msra.mxu1 %v687_v50 }
  0xcb   : > { %426 = vst.msk [vmem:[#allocation2 + $0x20] sm:$0xff] %vm424_vm8, %v415_v51  ;;  %v582_v53 = vpop.permute.xlu0 %581  ;;  %v4550_v55 = vld [vmem:[#allocation2 + $0x28] sm:$0xff]  ;;  %1167 = vmatpush2.msra.mxu0 %v849_v41  ;;  %3310 = vmatprep.subr.mxu1 %v732_v52 }
  0xcc   : > { %591 = vst.msk [vmem:[#allocation2 + $0x50] sm:$0xff] %vm424_vm8, %v582_v53  ;;  %933 = vmatprep.mubr.f32.mxu0 %v4550_v55  ;;  %1168 = vmatprep.subr.mxu0 %v6440_v10 }
  0xcd   : > { %3311 = vmatpush3.msra.mxu1 %v684_v56  ;;  %1169 = vmatpush2.msra.mxu0 %v846_v45 }
  0xce   : > { %v455_v31 = vpop.permute.xlu1 %454  ;;  %3312 = vmatprep.subr.mxu1 %v729_v54  ;;  %1170 = vmatprep.subr.mxu0 %v6440_v10 }
  0xcf   : > { %464 = vst.msk [vmem:[#allocation2 + $0x48] sm:$0xff] %vm372_vm6, %v455_v31  ;;  %v365_v61 = vpop.permute.xlu0 %364  ;;  %v4575_v62 = vld [vmem:[#allocation2 + $0x58] sm:$0xff]  ;;  %3313 = vmatpush3.msra.mxu1 %v681_v14  ;;  %1171 = vmatpush2.msra.mxu0 %v843_v60 }
  0xd0   : > { %375 = vst.msk [vmem:[#allocation2 + $0x40] sm:$0xff] %vm372_vm6, %v365_v61  ;;  %3251 = vmatprep.mubr.msk.f32.mxu1 %vm850_vm9, %v4575_v62  ;;  %3314 = vmatprep.subr.mxu1 %v726_v48  ;;  %vm1532_vm6 = vcmask 113664  }
  0xd1   : > { %1172 = vmatprep.subr.mxu0 %v6440_v10  ;;  %3315 = vmatpush3.msra.mxu1 %v678_v1 }
  0xd2   : > { %v478_v0 = vpop.permute.xlu1 %477  ;;  %v4590_v6 = vld [vmem:[#allocation2 + $0x20] sm:$0xff]  ;;  %3316 = vmatprep.subr.mxu1 %v723_v5  ;;  %1173 = vmatpush2.msra.mxu0 %v840_v58 }
  0xd3   : > { %487 = vst.msk [vmem:[#allocation2 + $0x48] sm:$0xff] %vm398_vm7, %v478_v0  ;;  %v541_v8 = vpop.permute.xlu0 %540  ;;  %934 = vmatmul.mubr.f32.gmra.mxu0 %v4590_v6  ;;  %v4598_v12 = vld [vmem:[#allocation2 + $0x50] sm:$0xff]  ;;  %1174 = vmatprep.subr.mxu0 %v6440_v10 }
  0xd4   : > { %549 = vst.msk [vmem:[#allocation2 + $0x70] sm:$0xf] %vm376_vm10, %v541_v8  ;;  %1029 = vmatmul.mubr.f32.gmra.mxu1 %v4598_v12  ;;  %1175 = vmatpush2.msra.mxu0 %v837_v15 }
  0xd5   : > { %3317 = vmatpush3.msra.mxu1 %v675_v7  ;;  %1176 = vmatprep.subr.mxu0 %v6440_v10 }
  0xd6   : > { %v622_v17 = vpop.permute.xlu1 %621  ;;  %3318 = vmatprep.subr.mxu1 %v720_v18  ;;  %1177 = vmatpush2.msra.mxu0 %v834_v16 }
  0xd7   : > { %630 = vst.msk [vmem:[#allocation2 + $0x78] sm:$0xf] %vm376_vm10, %v622_v17  ;;  %v391_v13 = vpop.permute.xlu0 %390  ;;  %3319 = vmatpush3.msra.mxu1 %v672_v4  ;;  %1178 = vmatprep.subr.mxu0 %v6440_v10 }
  0xd8   : > { %401 = vst.msk [vmem:[#allocation2 + $0x40] sm:$0xff] %vm398_vm7, %v391_v13  ;;  %1179 = vmatpush2.msra.mxu0 %v831_v20  ;;  %vm1534_vm7 = vcmask 107520  }
  0xd9   : > { %1180 = vmatprep.subr.mxu0 %v6440_v10 }
  0xda   : > { %v501_v25 = vpop.permute.xlu1 %500  ;;  %1181 = vmatpush2.msra.mxu0 %v828_v22 }
  0xdb   : > { %510 = vst.msk [vmem:[#allocation2 + $0x48] sm:$0xff] %vm424_vm8, %v501_v25  ;;  %v561_v26 = vpop.permute.xlu0 %560  ;;  %1182 = vmatprep.subr.mxu0 %v6440_v10 }
  0xdc   : > { %569 = vst.msk [vmem:[#allocation2 + $0x70] sm:$0xf] %vm402_vm11, %v561_v26  ;;  %1183 = vmatpush2.msra.mxu0 %v825_v23 }
  0xdd   : > { %1184 = vmatprep.subr.mxu0 %v6440_v10 }
  0xde   : > { %v645_v30 = vpop.permute.xlu1 %644  ;;  %1185 = vmatpush2.msra.mxu0 %v822_v2 }
  0xdf   : > { %653 = vst.msk [vmem:[#allocation2 + $0x78] sm:$0xf] %vm402_vm11, %v645_v30  ;;  %v417_v9 = vpop.permute.xlu0 %416  ;;  %1186 = vmatprep.subr.mxu0 %v6440_v10 }
  0xe0   : > { %427 = vst.msk [vmem:[#allocation2 + $0x40] sm:$0xff] %vm424_vm8, %v417_v9  ;;  %1187 = vmatpush2.msra.mxu0 %v819_v32  ;;  %v6438_v32 = vlaneseq  ;;  %vm2109_vm8 = vcmask 31744  }
  0xe1   : > { %1188 = vmatprep.subr.mxu0 %v6440_v10 }
  0xe2   : > { %v584_v27 = vpop.permute.xlu1 %583  ;;  %v663_v33 = vld [vmem:[#allocation2 + $0x48] sm:$0xff]  ;;  %1189 = vmatpush2.msra.mxu0 %v816_v59  ;;  %v4697_v59 = vshrl.u32 %v6438_v32, 7 }
  0xe3   : > { %592 = vst.msk [vmem:[#allocation2 + $0x70] sm:$0xf] %vm428_vm12, %v584_v27  ;;  %939 = vmatprep.mubr.f32.mxu0 %v663_v33  ;;  %v457_v34 = vpop.permute.xlu0 %456 }
  0xe4   : > { %465 = vst.msk [vmem:[#allocation2 + $0x68] sm:$0xf] %vm376_vm10, %v457_v34  ;;  %v4700_v27 = vsub.s32 0, %v4697_v59  ;;  %v1397_v34 = vld [vmem:[%s6458_s2] sm:$0x3]  ;;  %s6433_s2 = smov 122  }
  0xe6   : > { %v367_v35 = vpop.permute.xlu1 %366  ;;  %v669_v37 = vld [vmem:[#allocation2 + $0x78] sm:$0xf] }
  0xe7   : > { %377 = vst.msk [vmem:[#allocation2 + $0x60] sm:$0xf] %vm376_vm10, %v367_v35  ;;  %3252 = vmatprep.mubr.msk.f32.mxu1 %vm850_vm9, %v669_v37  ;;  %v662_v39 = vld [vmem:[#allocation2 + $0x40] sm:$0xff]  ;;  %v480_v36 = vpop.permute.xlu0 %479  ;;  %v3553_v35 = vmov 1983009808   ;;  %vm1958_vm10 = vcmask 48128  }
  0xe8   : > { %940 = vmatmul.mubr.f32.gmra.mxu0 %v662_v39  ;;  %488 = vst.msk [vmem:[#allocation2 + $0x68] sm:$0xf] %vm402_vm11, %v480_v36 }
  0xea   : > { %v393_v24 = vpop.permute.xlu1 %392  ;;  %v668_v19 = vld [vmem:[#allocation2 + $0x70] sm:$0xf] }
  0xeb   : > { %403 = vst.msk [vmem:[#allocation2 + $0x60] sm:$0xf] %vm402_vm11, %v393_v24  ;;  %1035 = vmatmul.mubr.f32.gmra.mxu1 %v668_v19  ;;  %v503_v28 = vpop.permute.xlu0 %502  ;;  %vm2139_vm11 = vcmask 146464  }
  0xec   : > { %1105 = vmatprep.mubr.f32.mxu1 %v4380_v40  ;;  %511 = vst.msk [vmem:[#allocation2 + $0x68] sm:$0xf] %vm428_vm12, %v503_v28 }
  0xee   : > { %v419_v42 = vpop.permute.xlu1 %418 }
  0xef   : > { %429 = vst.msk [vmem:[#allocation2 + $0x60] sm:$0xf] %vm428_vm12, %v419_v42  ;;  %1106 = vmatmul.mubr.f32.vlgmr.msra.gmra.mxu1 %v4387_v57  ;;  %vm1578_vm12 = vcmask 343264  }
  0xf0   : > { %1110 = vmatprep.mubr.f32.mxu1 %v4550_v55 }
  0xf3   : > { %1111 = vmatmul.mubr.f32.gmra.mxu1 %v4590_v6  ;;  %v667_v21 = vld [vmem:[#allocation2 + $0x68] sm:$0xf] }
  0xf4   : > { %1115 = vmatprep.mubr.f32.mxu1 %v663_v33  ;;  %945 = vmatprep.mubr.f32.mxu0 %v667_v21  ;;  %v6437_v33 = vsub.s32 1, %v4697_v59 }
  0xf6   : > { %v666_v43 = vld [vmem:[#allocation2 + $0x60] sm:$0xf]  ;;  %v1406_v36 = vrot.slane %v1397_v34, %v6437_v33 }
  0xf7   : > { %946 = vmatmul.mubr.f32.gmra.mxu0 %v666_v43  ;;  %1116 = vmatmul.mubr.f32.gmra.mxu1 %v662_v39  ;;  %v1402_v39 = vrot.slane %v1397_v34, %v4700_v27 }
  0xf8   : > { %1120 = vmatprep.mubr.f32.mxu1 %v667_v21  ;;  %3253 = vmatprep.mubr.msk.f32.mxu0 %vm850_vm9, %v4409_v63 }
  0xf9   : > { %v1408_v42 = vcombine.high %v1402_v39, %v1406_v36 }
  0xfb   : > { %1121 = vmatmul.mubr.f32.gmra.mxu1 %v666_v43  ;;  %1191 = vmatmul.mubr.f32.vlgmr.msra.gmra.mxu0 %v4417_v38 }
  0xfc   : > { %3254 = vmatprep.mubr.msk.f32.mxu0 %vm850_vm9, %v4461_v11 }
  0xff   : > { %1196 = vmatmul.mubr.f32.gmra.mxu0 %v4480_v3 }
 0x100   : > { %3255 = vmatprep.mubr.msk.f32.mxu0 %vm850_vm9, %v4575_v62 }
 0x103   : > { %1201 = vmatmul.mubr.f32.gmra.mxu0 %v4598_v12 }
 0x104   : > { %3256 = vmatprep.mubr.msk.f32.mxu0 %vm850_vm9, %v669_v37  ;;  %v1267_v37 = vunpack.c.l.s4 %v3553_v35  ;;  %vm1555_vm9 = vcmask 228464  }
 0x106   : > { %v1268_v24 = vunpack.c.0.s8 %v1267_v37 }
 0x107   : > { %1206 = vmatmul.mubr.f32.gmra.mxu0 %v668_v19  ;;  %v1407_v19 = vcombine.low %v1402_v39, %v1406_v36 }
 0x108   : > { %v4710_v28 = vsub.s32 %v1268_v24, %v4697_v59 }
 0x10a   : > { %v4713_v21 = vrot.slane %v1407_v19, %v4710_v28 }
 0x16a   : > { %v929_v40 = vpop.f32.mrf.mxu0 }
 0x16c   : > { %v931_v63 = vpop.f32.mrf.mxu0 }
 0x173   : > { %v1018_v57 = vpop.f32.mrf.mxu1 }
 0x174   : > { %v4668_v44 = vadd.f32 %v1018_v57, %v929_v40 }
 0x175   : > { %v1020_v49 = vpop.f32.mrf.mxu1 }
 0x176   : > { %v4670_v38 = vadd.f32 %v1020_v49, %v931_v63  ;;  %v4718_v49 = vrot.slane %v1408_v42, %v4710_v28 }
 0x178   : > { %1219 = vrot.lane.b32.xlu0 %v4670_v38, %s3552_s14 }
 0x17f   : > { %v1024_v11 = vpop.f32.mrf.mxu1 }
 0x181   : > { %v1026_v47 = vpop.f32.mrf.mxu1 }
 0x193   : > { %v935_v3 = vpop.f32.mrf.mxu0 }
 0x194   : > { %v4674_v46 = vadd.f32 %v1024_v11, %v935_v3  ;;  %v1030_v41 = vpop.f32.mrf.mxu1  ;;  %v4723_v3 = vcombine.high %v4713_v21, %v4713_v21 }
 0x195   : > { %v937_v29 = vpop.f32.mrf.mxu0 }
 0x196   : > { %v4676_v50 = vadd.f32 %v1026_v47, %v937_v29  ;;  %v1032_v52 = vpop.f32.mrf.mxu1 }
 0x198   : > { %1223 = vrot.lane.b32.xlu0 %v4676_v50, %s3552_s14 }
 0x1a8   : > { %v941_v51 = vpop.f32.mrf.mxu0 }
 0x1a9   : > { %v4680_v53 = vadd.f32 %v1030_v41, %v941_v51 }
 0x1aa   : > { %v943_v55 = vpop.f32.mrf.mxu0 }
 0x1ab   : > { %v4682_v56 = vadd.f32 %v1032_v52, %v943_v55  ;;  %v1036_v45 = vpop.f32.mrf.mxu1  ;;  %v4727_v52 = vcombine.high %v4718_v49, %v4718_v49 }
 0x1ad   : > { %v1038_v54 = vpop.f32.mrf.mxu1  ;;  %1227 = vrot.lane.b32.xlu0 %v4682_v56, %s3552_s14 }
 0x1af   : > { %v3320_v14 = vpop.f32.mrf.mxu1 }
 0x1b1   : > { %v3321_v31 = vpop.f32.mrf.mxu1 }
 0x1b2   : > { %v3322_v58 = vadd.f32 %v3321_v31, %v3320_v14  ;;  %v1425_v14 = vrot.slane %v4713_v21, 1  ;;  %v1426_v31 = vrot.slane %v4723_v3, 1 }
 0x1b3   : > { %v3323_v60 = vpop.f32.mrf.mxu1 }
 0x1b5   : > { %v3324_v48 = vpop.f32.mrf.mxu1 }
 0x1b6   : > { %v3325_v15 = vadd.f32 %v3324_v48, %v3323_v60  ;;  %v4737_v60 = vsub.s32 2, %v4697_v59 }
 0x1b7   : > { %v947_v61 = vpop.f32.mrf.mxu0  ;;  %v3326_v62 = vpop.f32.mrf.mxu1 }
 0x1b8   : > { %v4686_v1 = vadd.f32 %v1036_v45, %v947_v61  ;;  %6459 = vst [vmem:[#allocation12_spill] sm:$0xff] %v4737_v60 }
 0x1b9   : > { %v949_v5 = vpop.f32.mrf.mxu0  ;;  %v3327_v6 = vpop.f32.mrf.mxu1 }
 0x1ba   : > { %v4688_v0 = vadd.f32 %v1038_v54, %v949_v5  ;;  %v3328_v13 = vadd.f32 %v3327_v6, %v3326_v62  ;;  %v1428_v6 = vrot.slane %v4727_v52, 1 }
 0x1bb   : > { %v1192_v7 = vpop.f32.mrf.mxu0  ;;  %v3329_v18 = vpop.f32.mrf.mxu1 }
 0x1bc   : > { %v1193_v8 = vadd.f32 %v3322_v58, %v1192_v7  ;;  %1231 = vrot.lane.b32.xlu0 %v4688_v0, %s3552_s14 }
 0x1bd   : > { %v1194_v12 = vpop.f32.mrf.mxu0  ;;  %v3330_v20 = vpop.f32.mrf.mxu1 }
 0x1be   : > { %1221 = vrot.lane.b32.xlu1 %v1193_v8, %s3552_s14  ;;  %v3331_v23 = vadd.f32 %v3330_v20, %v3329_v18 }
 0x1bf   : > { %v1197_v4 = vpop.f32.mrf.mxu0 }
 0x1c0   : > { %v1198_v16 = vadd.f32 %v3325_v15, %v1197_v4 }
 0x1c1   : > { %v1199_v17 = vpop.f32.mrf.mxu0 }
 0x1c2   : > { %1225 = vrot.lane.b32.xlu1 %v1198_v16, %s3552_s14 }
 0x1c3   : > { %v1202_v22 = vpop.f32.mrf.mxu0 }
 0x1c4   : > { %v1203_v25 = vadd.f32 %v3328_v13, %v1202_v22 }
 0x1c5   : > { %v1204_v26 = vpop.f32.mrf.mxu0 }
 0x1c6   : > { %1229 = vrot.lane.b32.xlu1 %v1203_v25, %s3552_s14 }
 0x1c7   : > { %v1207_v2 = vpop.f32.mrf.mxu0 }
 0x1c8   : > { %v1208_v30 = vadd.f32 %v3331_v23, %v1207_v2 }
 0x1c9   : > { %v1209_v9 = vpop.f32.mrf.mxu0 }
 0x1ca   : > { %1233 = vrot.lane.b32.xlu1 %v1208_v30, %s3552_s14  ;;  %s6393_s14 = smov 8  }
 0x1ea   : > { %v1220_v43 = vpop.permute.xlu0 %1219 }
 0x20a   : > { %v1224_v47 = vpop.permute.xlu0 %1223 }
 0x230   : > { %v1222_v40 = vpop.permute.xlu1 %1221 }
 0x231   : > { %v1236_v57 = vsel %vm6443_vm13, %v1220_v43, %v1222_v40  ;;  %v1249_v63 = vmax.f32 %v4670_v38, %v1222_v40 }
 0x232   : > { %v1248_v11 = vmax.f32 %v4668_v44, %v1236_v57 }
 0x234   : > { %v1264_v29 = vcombine.low %v1248_v11, %v1249_v63  ;;  %v1265_v41 = vcombine.high %v1248_v11, %v1249_v63  ;;  %v1226_v51 = vpop.permute.xlu1 %1225 }
 0x235   : > { %v1237_v55 = vsel %vm6443_vm13, %v1224_v47, %v1226_v51  ;;  %v1251_v38 = vmax.f32 %v4676_v50, %v1226_v51  ;;  %v1427_v50 = vrot.slane %v4718_v49, 1 }
 0x236   : > { %v1272_v45 = vrot.slane %v1264_v29, %v4710_v28  ;;  %v1279_v44 = vrot.slane %v1265_v41, %v4710_v28  ;;  %v1250_v54 = vmax.f32 %v4674_v46, %v1237_v55  ;;  %v1228_v46 = vpop.permute.xlu0 %1227 }
 0x238   : > { %v1280_v48 = vcombine.high %v1272_v45, %v1272_v45  ;;  %v1281_v61 = vcombine.high %v1279_v44, %v1279_v44  ;;  %v3257_v62 = vrot.slane %v1272_v45, 9  ;;  %v3259_v5 = vrot.slane %v1279_v44, 9  ;;  %v1230_v58 = vpop.permute.xlu1 %1229 }
 0x239   : > { %v1282_v7 = vcombine.low %v1250_v54, %v1251_v38  ;;  %v1283_v8 = vcombine.high %v1250_v54, %v1251_v38  ;;  %v1238_v13 = vsel %vm6443_vm13, %v1228_v46, %v1230_v58  ;;  %v1253_v20 = vmax.f32 %v4682_v56, %v1230_v58 }
 0x23a   : > { %v3258_v12 = vrot.slane %v1280_v48, 9  ;;  %v3260_v15 = vrot.slane %v1281_v61, 9  ;;  %v1383_v18 = vmax.f32 %v1272_v45, %v3257_v62  ;;  %v1385_v4 = vmax.f32 %v1279_v44, %v3259_v5 }
 0x23b   : > { %v1290_v16 = vrot.slane %v1282_v7, %v4710_v28  ;;  %v1297_v17 = vrot.slane %v1283_v8, %v4710_v28  ;;  %v1252_v63 = vmax.f32 %v4680_v53, %v1238_v13 }
 0x23c   : > { %v1384_v22 = vmax.f32 %v1280_v48, %v3258_v12  ;;  %v1386_v25 = vmax.f32 %v1281_v61, %v3260_v15  ;;  %v1437_v26 = vadd.f32 %v4713_v21, %v1383_v18  ;;  %v1439_v23 = vadd.f32 %v4723_v3, %v1385_v4 }
 0x23d   : > { %v1298_v2 = vcombine.high %v1290_v16, %v1290_v16  ;;  %v1299_v30 = vcombine.high %v1297_v17, %v1297_v17  ;;  %v3261_v9 = vrot.slane %v1290_v16, 9  ;;  %v3263_v34 = vrot.slane %v1297_v17, 9 }
 0x23e   : > { %v1438_v35 = vadd.f32 %v1425_v14, %v1384_v22  ;;  %v1440_v37 = vadd.f32 %v1426_v31, %v1386_v25  ;;  %v1451_v39 = vmax.f32 %v1437_v26, 0.0  ;;  %v1453_v36 = vmax.f32 %v1439_v23, 0.0 }
 0x23f   : > { %v3262_v56 = vrot.slane %v1298_v2, 9  ;;  %v3264_v24 = vrot.slane %v1299_v30, 9  ;;  %v1387_v19 = vmax.f32 %v1290_v16, %v3261_v9  ;;  %v1389_v42 = vmax.f32 %v1297_v17, %v3263_v34 }
 0x240   : > { %v1452_v43 = vmax.f32 %v1438_v35, 0.0  ;;  %v1454_v40 = vmax.f32 %v1440_v37, 0.0  ;;  %v1478_v57 = vrot.slane %v1451_v39, %v4700_v27  ;;  %v1486_v11 = vrot.slane %v1453_v36, %v4700_v27 }
 0x241   : > { %v4755_v47 = vrot.slane %v1451_v39, %v4737_v60  ;;  %v1388_v29 = vmax.f32 %v1298_v2, %v3262_v56  ;;  %v1390_v41 = vmax.f32 %v1299_v30, %v3264_v24  ;;  %v4763_v45 = vrot.slane %v1453_v36, %v4737_v60  ;;  %v1234_v36 = vpop.permute.xlu1 %1233 }
 0x242   : > { %v1482_v51 = vrot.slane %v1452_v43, %v4700_v27  ;;  %v1490_v55 = vrot.slane %v1454_v40, %v4700_v27  ;;  %v4760_v38 = vrot.slane %v1452_v43, %v4737_v60  ;;  %v1441_v44 = vadd.f32 %v4718_v49, %v1387_v19  ;;  %v1232_v43 = vpop.permute.xlu0 %1231 }
 0x243   : > { %v1442_v53 = vadd.f32 %v1427_v50, %v1388_v29  ;;  %v4769_v54 = vadd.f32 %v4727_v52, %v1389_v42  ;;  %v4771_v48 = vadd.f32 %v1428_v6, %v1390_v41  ;;  %v1300_v58 = vcombine.low %v1252_v63, %v1253_v20 }
 0x244   : > { %v1516_v61 = vsel %vm1515_vm14, %v1482_v51, %v1478_v57  ;;  %v1541_v62 = vsel %vm1515_vm14, %v1486_v11, %v1482_v51  ;;  %v1564_v5 = vsel %vm1515_vm14, %v1490_v55, %v1486_v11  ;;  %v1455_v46 = vmax.f32 %v1441_v44, 0.0 }
 0x245   : > { %v1518_v7 = vsel %vm1517_vm15, %v1486_v11, %v1516_v61  ;;  %v1542_v8 = vsel %vm1517_vm15, %v1490_v55, %v1541_v62  ;;  %v1456_v12 = vmax.f32 %v1442_v53, 0.0  ;;  %v1457_v6 = vmax.f32 %v4769_v54, 0.0 }
 0x246   : > { %v1520_v52 = vsel %vm1519_vm0, %v1490_v55, %v1518_v7  ;;  %v1458_v15 = vmax.f32 %v4771_v48, 0.0  ;;  %v1301_v18 = vcombine.high %v1252_v63, %v1253_v20  ;;  %v4782_v4 = vrot.slane %v1454_v40, %v4737_v60 }
 0x247   : > { %v1494_v16 = vrot.slane %v1455_v46, %v4700_v27  ;;  %v1498_v17 = vrot.slane %v1456_v12, %v4700_v27  ;;  %v4787_v13 = vrot.slane %v1455_v46, %v4737_v60  ;;  %v1502_v22 = vrot.slane %v1457_v6, %v4700_v27 }
 0x248   : > { %v4793_v25 = vrot.slane %v1458_v15, %v4700_v27  ;;  %v1308_v20 = vrot.slane %v1300_v58, %v4710_v28  ;;  %v1315_v26 = vrot.slane %v1301_v18, %v4710_v28  ;;  %v1239_v51 = vsel %vm6443_vm13, %v1232_v43, %v1234_v36 }
 0x249   : > { %v1522_v23 = vsel %vm1521_vm1, %v1494_v16, %v1520_v52  ;;  %v1543_v2 = vsel %vm1519_vm0, %v1494_v16, %v1542_v8  ;;  %v1565_v30 = vsel %vm1517_vm15, %v1494_v16, %v1564_v5  ;;  %v1587_v9 = vsel %vm1515_vm14, %v1494_v16, %v1490_v55 }
 0x24a   : > { %v1544_v34 = vsel %vm1521_vm1, %v1498_v17, %v1543_v2  ;;  %v1566_v35 = vsel %vm1519_vm0, %v1498_v17, %v1565_v30  ;;  %v1588_v37 = vsel %vm1517_vm15, %v1498_v17, %v1587_v9  ;;  %v1610_v39 = vsel %vm1515_vm14, %v1498_v17, %v1494_v16 }
 0x24b   : > { %v4806_v56 = vsel %vm1521_vm1, %v1502_v22, %v1566_v35  ;;  %v1589_v24 = vsel %vm1519_vm0, %v1502_v22, %v1588_v37  ;;  %v1611_v19 = vsel %vm1517_vm15, %v1502_v22, %v1610_v39  ;;  %v1316_v42 = vcombine.high %v1308_v20, %v1308_v20 }
 0x24c   : > { %v4812_v40 = vsel %vm1521_vm1, %v4793_v25, %v1589_v24  ;;  %v1612_v57 = vsel %vm1519_vm0, %v4793_v25, %v1611_v19  ;;  %v1317_v63 = vcombine.high %v1315_v26, %v1315_v26  ;;  %v3265_v11 = vrot.slane %v1308_v20, 9 }
 0x24d   : > { %v3266_v29 = vrot.slane %v1316_v42, 9  ;;  %v3267_v41 = vrot.slane %v1315_v26, 9  ;;  %v1255_v55 = vmax.f32 %v4688_v0, %v1234_v36  ;;  %v1254_v54 = vmax.f32 %v4686_v1, %v1239_v51 }
 0x24e   : > { %v3268_v44 = vrot.slane %v1317_v63, 9  ;;  %v1391_v53 = vmax.f32 %v1308_v20, %v3265_v11  ;;  %v1524_v61 = vsel %vm1523_vm2, %v1498_v17, %v1522_v23  ;;  %v4821_v62 = vrot.slane %v1456_v12, %v4737_v60 }
 0x24f   : > { %v1392_v5 = vmax.f32 %v1316_v42, %v3266_v29  ;;  %v1393_v58 = vmax.f32 %v1315_v26, %v3267_v41  ;;  %v1526_v7 = vsel %vm1525_vm3, %v1502_v22, %v1524_v61  ;;  %v1318_v52 = vcombine.low %v1254_v54, %v1255_v55 }
 0x250   : > { %v1394_v8 = vmax.f32 %v1317_v63, %v3268_v44  ;;  %v1445_v46 = vadd.f32 %v4713_v21, %v1391_v53  ;;  %v4827_v0 = vsel %vm1527_vm5, %v4793_v25, %v1526_v7  ;;  %v4841_v12 = vrot.slane %v1457_v6, %v4737_v60 }
 0x251   : > { %v4831_v1 = vadd.f32 %v1425_v14, %v1392_v5  ;;  %v4834_v18 = vadd.f32 %v4723_v3, %v1393_v58  ;;  %1682 = vrot.lane.b32.xlu1 %v4827_v0, %s6407_s28  ;;  %1628 = vrot.lane.b32.xlu0 %v4827_v0, %s6414_s21  ;;  %1533 = vst.msk [vmem:[#allocation3] sm:$0xff] %vm1532_vm6, %v4827_v0  ;;  %vm1962_vm6 = vcmask 41984   ;;  %vm1748_vm13 = vcmask 900864  }
 0x252   : > { %v4847_v21 = vadd.f32 %v1426_v31, %v1394_v8  ;;  %v1459_v14 = vmax.f32 %v1445_v46, 0.0  ;;  %v1325_v16 = vrot.slane %v1318_v52, %v4710_v28  ;;  %v2084_v17 = vsel %vm1515_vm14, %v4760_v38, %v4755_v47 }
 0x253   : > { %v1460_v20 = vmax.f32 %v4831_v1, 0.0  ;;  %v1461_v26 = vmax.f32 %v4834_v18, 0.0  ;;  %v2085_v6 = vsel %vm1517_vm15, %v4763_v45, %v2084_v17  ;;  %v1545_v23 = vsel %vm1523_vm2, %v1502_v22, %v1544_v34 }
 0x254   : > { %v1462_v3 = vmax.f32 %v4847_v21, 0.0  ;;  %v1510_v31 = vrot.slane %v1459_v14, %v4700_v27  ;;  %v1326_v2 = vcombine.high %v1325_v16, %v1325_v16  ;;  %v3269_v30 = vrot.slane %v1325_v16, 9 }
 0x255   : > { %v4861_v9 = vrot.slane %v1460_v20, %v4700_v27  ;;  %1732 = vrot.lane.b32.xlu1 %v4827_v0, %s6402_s22  ;;  %1786 = vrot.lane.b32.xlu0 %v4827_v0, %s6397_s29  ;;  %v4870_v47 = vrot.slane %v1458_v15, %v4737_v60  ;;  %v2086_v22 = vsel %vm1519_vm0, %v4782_v4, %v2085_v6  ;;  %s6405_s29 = smov 78   ;;  %s6406_s22 = smov 94  }
 0x256   : > { %v4875_v34 = vrot.slane %v1461_v26, %v4700_v27  ;;  %v1613_v35 = vsel %vm1521_vm1, %v1510_v31, %v1612_v57  ;;  %v3270_v37 = vrot.slane %v1326_v2, 9  ;;  %v1395_v39 = vmax.f32 %v1325_v16, %v3269_v30 }
 0x257   : > { %v4881_v36 = vrot.slane %v1462_v3, %v4700_v27  ;;  %v1614_v48 = vsel %vm1523_vm2, %v4861_v9, %v1613_v35  ;;  %v2087_v15 = vsel %vm1521_vm1, %v4787_v13, %v2086_v22  ;;  %v1546_v24 = vsel %vm1525_vm3, %v4793_v25, %v1545_v23 }
 0x258   : > { %v1615_v19 = vsel %vm1525_vm3, %v4875_v34, %v1614_v48  ;;  %v1396_v42 = vmax.f32 %v1326_v2, %v3270_v37  ;;  %v4892_v43 = vadd.f32 %v4718_v49, %v1395_v39  ;;  %v4895_v57 = vrot.slane %v1459_v14, %v4737_v60 }
 0x259   : > { %v4899_v63 = vsel %vm1527_vm5, %v4881_v36, %v1615_v19  ;;  %1890 = vrot.lane.b32.xlu1 %v4827_v0, %s6399_s23  ;;  %1994 = vrot.lane.b32.xlu0 %v4827_v0, %s6457_s16  ;;  %v2088_v11 = vsel %vm1523_vm2, %v4821_v62, %v2087_v15  ;;  %v4908_v29 = vsel %vm1527_vm5, %v1510_v31, %v1546_v24  ;;  %s6416_s23 = smov 22  }
 0x25a   : > { %v1450_v41 = vadd.f32 %v1427_v50, %v1396_v42  ;;  %v1463_v51 = vmax.f32 %v4892_v43, 0.0  ;;  %v2089_v55 = vsel %vm1525_vm3, %v4841_v12, %v2088_v11  ;;  %v2119_v44 = vsel %vm1515_vm14, %v4763_v45, %v4760_v38 }
 0x25b   : > { %v2090_v53 = vsel %vm1527_vm5, %v4870_v47, %v2089_v55  ;;  %v2120_v54 = vsel %vm1517_vm15, %v4782_v4, %v2119_v44  ;;  %v1568_v49 = vsel %vm1523_vm2, %v4793_v25, %v4806_v56  ;;  %v4927_v50 = vsel %vm1515_vm14, %v4861_v9, %v1510_v31 }
 0x25c   : > { %v1464_v61 = vmax.f32 %v1450_v41, 0.0  ;;  %v1586_v5 = vrot.slane %v1463_v51, %v4700_v27  ;;  %v2121_v38 = vsel %vm1519_vm0, %v4787_v13, %v2120_v54  ;;  %v1569_v58 = vsel %vm1525_vm3, %v1510_v31, %v1568_v49  ;;  %1535 = vst.msk [vmem:[#allocation3 + $0x30] sm:$0x3] %vm1534_vm7, %v4927_v50  ;;  %v2268_v54 = vld [vmem:[%s6382_s3 + $0xd0] sm:$0xff]  ;;  %v2267_v49 = vld [vmem:[%s6382_s3 + $0xc8] sm:$0xff] }
 0x25d   : > { %2094 = vrot.lane.b32.xlu1 %v2090_v53, %s6395_s24  ;;  %1836 = vrot.lane.b32.xlu0 %v4827_v0, %s6391_s25  ;;  %v2122_v25 = vsel %vm1521_vm1, %v4821_v62, %v2121_v38  ;;  %v4941_v56 = vsel %vm1527_vm5, %v4861_v9, %v1569_v58  ;;  %v2083_v52 = vrot.slane %v1460_v20, %v4737_v60  ;;  %s3564_s25 = smov 14   ;;  %v2269_v53 = vld [vmem:[%s6382_s3 + $0xd8] sm:$0xff]  ;;  %v2264_v38 = vld [vmem:[%s6382_s3 + $0xb0] sm:$0xff]  ;;  %vm1972_vm7 = vcmask 156720  }
 0x25e   : > { %v4945_v7 = vsel %vm1515_vm14, %v1586_v5, %v4881_v36  ;;  %v1609_v8 = vrot.slane %v1464_v61, %v4700_v27  ;;  %v2123_v46 = vsel %vm1523_vm2, %v4841_v12, %v2122_v25  ;;  %v2147_v18 = vsel %vm1515_vm14, %v4782_v4, %v4763_v45  ;;  %v2263_v58 = vld [vmem:[%s6382_s3 + $0xa8] sm:$0xff]  ;;  %v2262_v25 = vld [vmem:[%s6382_s3 + $0xa0] sm:$0xff] }
 0x25f   : > { %v2124_v1 = vsel %vm1525_vm3, %v4870_v47, %v2123_v46  ;;  %v2118_v14 = vrot.slane %v1461_v26, %v4737_v60  ;;  %v1591_v16 = vsel %vm1523_vm2, %v1510_v31, %v4812_v40  ;;  %v2148_v20 = vsel %vm1517_vm15, %v4787_v13, %v2147_v18  ;;  %v2337_v46 = vld [vmem:[%s6382_s3 + $0x2f8] sm:$0xff]  ;;  %v2336_v18 = vld [vmem:[%s6382_s3 + $0x2f0] sm:$0xff] }
 0x260   : > { %v4960_v17 = vsel %vm1515_vm14, %v1609_v8, %v1586_v5  ;;  %v2125_v6 = vsel %vm1527_vm5, %v4895_v57, %v2124_v1  ;;  %v4968_v23 = vsel %vm1515_vm14, %v2083_v52, %v4895_v57  ;;  %v2149_v45 = vsel %vm1519_vm0, %v4821_v62, %v2148_v20  ;;  %v2265_v5 = vld [vmem:[%s6382_s3 + $0xb8] sm:$0xff]  ;;  %v2260_v8 = vld [vmem:[%s6382_s3 + $0x90] sm:$0xff]  ;;  %2508 = vmatprep.subr.mxu0 %v2337_v46  ;;  %v2258_v1 = vld [vmem:[%s6382_s3 + $0x80] sm:$0xff] }
 0x261   : > { %1692 = vrot.lane.b32.xlu1 %v4908_v29, %s3560_s26  ;;  %1940 = vrot.lane.b32.xlu0 %v4827_v0, %s6393_s14  ;;  %v4977_v40 = vsel %vm1515_vm14, %v2118_v14, %v2083_v52  ;;  %v1592_v26 = vsel %vm1525_vm3, %v4861_v9, %v1591_v16  ;;  %v2150_v31 = vsel %vm1521_vm1, %v4841_v12, %v2149_v45  ;;  %s6410_s14 = smov 6   ;;  %v2335_v16 = vld [vmem:[%s6382_s3 + $0x2e8] sm:$0xff]  ;;  %v2256_v20 = vld [vmem:[%s6382_s3 + $0x70] sm:$0xff] }
 0x262   : > { %v4985_v2 = vsel %vm1527_vm5, %v4875_v34, %v1592_v26  ;;  %v2146_v30 = vrot.slane %v1462_v3, %v4737_v60  ;;  %v2176_v22 = vsel %vm1515_vm14, %v4787_v13, %v4782_v4  ;;  %v2151_v35 = vsel %vm1523_vm2, %v4870_v47, %v2150_v31  ;;  %2509 = vmatpush1.msra.mxu0 %v2336_v18  ;;  %v2255_v45 = vld [vmem:[%s6382_s3 + $0x68] sm:$0xff]  ;;  %v2253_v26 = vld [vmem:[%s6382_s3 + $0x58] sm:$0xff]  ;;  %v2332_v31 = vld [vmem:[%s6382_s3 + $0x2d0] sm:$0xff] }
 0x263   : > { %v2177_v37 = vsel %vm1517_vm15, %v4821_v62, %v2176_v22  ;;  %v2205_v39 = vsel %vm1515_vm14, %v4821_v62, %v4787_v13  ;;  %v2152_v48 = vsel %vm1525_vm3, %v4895_v57, %v2151_v35  ;;  %v2175_v19 = vrot.slane %v1463_v51, %v4737_v60  ;;  %2510 = vmatprep.subr.mxu0 %v2335_v16  ;;  %v2317_v18 = vld [vmem:[%s6382_s3 + $0x258] sm:$0xff]  ;;  %v2316_v16 = vld [vmem:[%s6382_s3 + $0x250] sm:$0xff] }
 0x264   : > { %v5003_v21 = vsel %vm1515_vm14, %v2146_v30, %v2118_v14  ;;  %v2178_v3 = vsel %vm1519_vm0, %v4841_v12, %v2177_v37  ;;  %v2206_v4 = vsel %vm1517_vm15, %v4841_v12, %v2205_v39  ;;  %v2153_v13 = vsel %vm1527_vm5, %v2083_v52, %v2152_v48  ;;  %v2252_v37 = vld [vmem:[%s6382_s3 + $0x50] sm:$0xff]  ;;  %v2330_v39 = vld [vmem:[%s6382_s3 + $0x2c0] sm:$0xff]  ;;  %v2329_v48 = vld [vmem:[%s6382_s3 + $0x2b8] sm:$0xff] }
 0x265   : > { %1742 = vrot.lane.b32.xlu1 %v4908_v29, %s6404_s27  ;;  %2092 = vrot.lane.b32.xlu0 %v4827_v0, %s6395_s24  ;;  %v2179_v62 = vsel %vm1521_vm1, %v4870_v47, %v2178_v3  ;;  %v2207_v15 = vsel %vm1519_vm0, %v4870_v47, %v2206_v4  ;;  %v2204_v42 = vrot.slane %v1464_v61, %v4737_v60  ;;  %s3566_s24 = smov 70   ;;  %s3571_s27 = smov 68   ;;  %v2266_v61 = vld [vmem:[%s6382_s3 + $0xc0] sm:$0xff]  ;;  %v2251_v3 = vld [vmem:[%s6382_s3 + $0x48] sm:$0xff]  ;;  %vm1580_vm15 = vcmask 337120  }
 0x266   : > { %v2180_v24 = vsel %vm1523_vm2, %v4895_v57, %v2179_v62  ;;  %v2208_v12 = vsel %vm1521_vm1, %v4895_v57, %v2207_v15  ;;  %v5031_v47 = vsel %vm1515_vm14, %v2175_v19, %v2146_v30  ;;  %v5064_v51 = vsel %vm1515_vm14, %v4875_v34, %v4861_v9  ;;  %v2273_v9 = vld [vmem:[%s6382_s3 + $0xf8] sm:$0xff]  ;;  %v2328_v4 = vld [vmem:[%s6382_s3 + $0x2b0] sm:$0xff]  ;;  %v2327_v62 = vld [vmem:[%s6382_s3 + $0x2a8] sm:$0xff] }
 0x267   : > { %v2181_v0 = vsel %vm1525_vm3, %v2083_v52, %v2180_v24  ;;  %v2209_v43 = vsel %vm1523_vm2, %v2083_v52, %v2208_v12  ;;  %v5034_v55 = vsel %vm1515_vm14, %v2204_v42, %v2175_v19  ;;  %v5073_v44 = vsel %vm1515_vm14, %v4881_v36, %v4875_v34  ;;  %v2272_v34 = vld [vmem:[%s6382_s3 + $0xf0] sm:$0xff]  ;;  %v2271_v36 = vld [vmem:[%s6382_s3 + $0xe8] sm:$0xff]  ;;  %2431 = vmatprep.subr.mxu1 %v2273_v9  ;;  %v2249_v12 = vld [vmem:[%s6382_s3 + $0x38] sm:$0xff] }
 0x268   : > { %v5027_v11 = vsel %vm1527_vm5, %v2118_v14, %v2181_v0  ;;  %v2210_v41 = vsel %vm1525_vm3, %v2118_v14, %v2209_v43  ;;  %2432 = vmatpush1.msra.mxu1 %v2272_v34  ;;  %v2259_v52 = vld [vmem:[%s6382_s3 + $0x88] sm:$0xff]  ;;  %v2257_v14 = vld [vmem:[%s6382_s3 + $0x78] sm:$0xff]  ;;  %v2326_v19 = vld [vmem:[%s6382_s3 + $0x2a0] sm:$0xff]  ;;  %vm1557_vm14 = vcmask 222320   ;;  %vm1970_vm0 = vcmask 162864  }
 0x269   : > { %1796 = vrot.lane.b32.xlu1 %v4908_v29, %s6401_s17  ;;  %1549 = vrot.lane.b32.xlu0 %v4908_v29, %s3564_s25  ;;  %v5041_v57 = vsel %vm1527_vm5, %v2146_v30, %v2210_v41  ;;  %s3569_s17 = smov 12   ;;  %v2331_v30 = vld [vmem:[%s6382_s3 + $0x2c8] sm:$0xff]  ;;  %v2248_v42 = vld [vmem:[%s6382_s3 + $0x30] sm:$0xff]  ;;  %vm1864_vm1 = vcmask 64512   ;;  %vm1868_vm2 = vcmask 58368   ;;  %vm2163_vm3 = vcmask 162816  }
 0x26a   : > { %2433 = vmatprep.subr.mxu1 %v2271_v36  ;;  %v2325_v0 = vld [vmem:[%s6382_s3 + $0x298] sm:$0xff]  ;;  %v2247_v43 = vld [vmem:[%s6382_s3 + $0x28] sm:$0xff]  ;;  %v2324_v41 = vld [vmem:[%s6382_s3 + $0x290] sm:$0xff]  ;;  %vm2168_vm5 = vcmask 261264  }
 0x26b   : > { %v2246_v36 = vld [vmem:[%s6382_s3 + $0x20] sm:$0xff] }
 0x26d   : > { %2129 = vrot.lane.b32.xlu1 %v2125_v6, %s6410_s14  ;;  %1638 = vrot.lane.b32.xlu0 %v4908_v29, %s3566_s24  ;;  %v2334_v6 = vld [vmem:[%s6382_s3 + $0x2e0] sm:$0xff] }
 0x26e   : > { %2511 = vmatpush1.msra.mxu0 %v2334_v6  ;;  %v2302_v6 = vld [vmem:[%s6382_s3 + $0x1e0] sm:$0xff] }
 0x271   : > { %2004 = vrot.lane.b32.xlu1 %v4908_v29, %s6405_s29  ;;  %1950 = vrot.lane.b32.xlu0 %v4908_v29, %s6416_s23  ;;  %s6409_s29 = smov 38   ;;  %s6468_s23 = smov 120  }
 0x275   : > { %1702 = vrot.lane.b32.xlu1 %v4941_v56, %s3569_s17  ;;  %1900 = vrot.lane.b32.xlu0 %v4908_v29, %s6406_s22  ;;  %s6412_s22 = smov 28  }
 0x279   : > { %1752 = vrot.lane.b32.xlu1 %v4941_v56, %s3571_s27  ;;  %2127 = vrot.lane.b32.xlu0 %v4908_v29, %s6410_s14  ;;  %s6460_s14 = smov 54  }
 0x27d   : > { %1684 = vrot.lane.b32.xlu1 %v4927_v50, %s6407_s28  ;;  %1846 = vrot.lane.b32.xlu0 %v4908_v29, %s6409_s29  ;;  %s3574_s28 = smov 84   ;;  %s3576_s29 = smov 52   ;;  %v2270_v29 = vld [vmem:[%s6382_s3 + $0xe0] sm:$0xff] }
 0x27e   : > { %2434 = vmatpush1.msra.mxu1 %v2270_v29  ;;  %v2245_v29 = vld [vmem:[%s6382_s3 + $0x18] sm:$0xff] }
 0x27f   : > { %2435 = vmatprep.subr.mxu1 %v2269_v53  ;;  %v2322_v53 = vld [vmem:[%s6382_s3 + $0x280] sm:$0xff] }
 0x280   : > { %2436 = vmatpush1.msra.mxu1 %v2268_v54  ;;  %v2244_v54 = vld [vmem:[%s6382_s3 + $0x10] sm:$0xff] }
 0x281   : > { %1694 = vrot.lane.b32.xlu1 %v5064_v51, %s3560_s26  ;;  %1572 = vrot.lane.b32.xlu0 %v4941_v56, %s6412_s22  ;;  %s6419_s26 = smov 36  }
 0x282   : > { %2437 = vmatprep.subr.mxu1 %v2267_v49  ;;  %v2321_v49 = vld [vmem:[%s6382_s3 + $0x278] sm:$0xff] }
 0x283   : > { %2438 = vmatpush1.msra.mxu1 %v2266_v61 }
 0x284   : > { %2439 = vmatprep.subr.mxu1 %v2265_v5 }
 0x285   : > { %1574 = vrot.lane.b32.xlu1 %v5073_v44, %s6412_s22  ;;  %1648 = vrot.lane.b32.xlu0 %v4941_v56, %s3574_s28  ;;  %s6418_s22 = smov 108  }
 0x286   : > { %2440 = vmatpush1.msra.mxu1 %v2264_v38  ;;  %v2320_v38 = vld [vmem:[%s6382_s3 + $0x270] sm:$0xff] }
 0x287   : > { %2441 = vmatprep.subr.mxu1 %v2263_v58  ;;  %v2242_v58 = vld [vmem:[%s6382_s3] sm:$0xff] }
 0x288   : > { %2442 = vmatpush1.msra.mxu1 %v2262_v25  ;;  %v2319_v25 = vld [vmem:[%s6382_s3 + $0x268] sm:$0xff] }
 0x289   : > { %1630 = vrot.lane.b32.xlu1 %v4927_v50, %s6414_s21  ;;  %1551 = vrot.lane.b32.xlu0 %v5064_v51, %s3564_s25  ;;  %s6461_s21 = smov 40   ;;  %s6417_s25 = smov 124  }
 0x28d   : > { %1964 = vrot.lane.b32.xlu1 %v4941_v56, %s6419_s26  ;;  %1856 = vrot.lane.b32.xlu0 %v4941_v56, %s3576_s29 }
 0x291   : > { %1744 = vrot.lane.b32.xlu1 %v5064_v51, %s6460_s14  ;;  %1704 = vrot.lane.b32.xlu0 %v5073_v44, %s3569_s17  ;;  %s6420_s14 = smov 20   ;;  %s6462_s17 = smov 80  }
 0x295   : > { %1910 = vrot.lane.b32.xlu1 %v4941_v56, %s6418_s22  ;;  %1734 = vrot.lane.b32.xlu0 %v4927_v50, %s6461_s21  ;;  %s6422_s22 = smov 92  }
 0x299   : > { %1650 = vrot.lane.b32.xlu1 %v5073_v44, %s3574_s28  ;;  %1640 = vrot.lane.b32.xlu0 %v5064_v51, %s3566_s24  ;;  %s6466_s24 = smov 108   ;;  %s6485_s28 = smov 50  }
 0x29d   : > { %1858 = vrot.lane.b32.xlu1 %v5073_v44, %s3576_s29  ;;  %1806 = vrot.lane.b32.xlu0 %v4941_v56, %s6417_s25  ;;  %s6463_s25 = smov 110   ;;  %s6465_s29 = smov 96  }
 0x2a1   : > { %2157 = vrot.lane.b32.xlu1 %v2153_v13, %s6420_s14  ;;  %1754 = vrot.lane.b32.xlu0 %v5073_v44, %s3571_s27  ;;  %v2250_v13 = vld [vmem:[%s6382_s3 + $0x40] sm:$0xff]  ;;  %s6426_s27 = smov 66  }
 0x2a5   : > { %1892 = vrot.lane.b32.xlu1 %v4927_v50, %s6462_s17  ;;  %2155 = vrot.lane.b32.xlu0 %v4941_v56, %s6420_s14  ;;  %s6486_s14 = smov 34  }
 0x2a9   : > { %1798 = vrot.lane.b32.xlu1 %v5064_v51, %s6463_s25  ;;  %2014 = vrot.lane.b32.xlu0 %v4941_v56, %s6422_s22  ;;  %s6464_s25 = smov 36   ;;  %v2261_v56 = vld [vmem:[%s6382_s3 + $0x98] sm:$0xff]  ;;  %s6472_s22 = smov 8  }
 0x2aa   : > { %2443 = vmatprep.subr.mxu1 %v2261_v56  ;;  %v2305_v56 = vld [vmem:[%s6382_s3 + $0x1f8] sm:$0xff] }
 0x2ab   : > { %2444 = vmatpush1.msra.mxu1 %v2260_v8  ;;  %v2318_v8 = vld [vmem:[%s6382_s3 + $0x260] sm:$0xff] }
 0x2ac   : > { %2445 = vmatprep.subr.mxu1 %v2259_v52 }
 0x2ad   : > { %1966 = vrot.lane.b32.xlu1 %v5073_v44, %s6464_s25  ;;  %1788 = vrot.lane.b32.xlu0 %v4927_v50, %s6465_s29  ;;  %s6467_s25 = smov 22  }
 0x2ae   : > { %2446 = vmatpush1.msra.mxu1 %v2258_v1  ;;  %v2304_v1 = vld [vmem:[%s6382_s3 + $0x1f0] sm:$0xff] }
 0x2af   : > { %2447 = vmatprep.subr.mxu1 %v2257_v14  ;;  %v2303_v14 = vld [vmem:[%s6382_s3 + $0x1e8] sm:$0xff] }
 0x2b0   : > { %2448 = vmatpush1.msra.mxu1 %v2256_v20  ;;  %v2315_v20 = vld [vmem:[%s6382_s3 + $0x248] sm:$0xff] }
 0x2b1   : > { %1912 = vrot.lane.b32.xlu1 %v5073_v44, %s6466_s24  ;;  %1952 = vrot.lane.b32.xlu0 %v5064_v51, %s6467_s25  ;;  %s6469_s24 = smov 94   ;;  %s6471_s25 = smov 124  }
 0x2b2   : > { %2449 = vmatprep.subr.mxu1 %v2255_v45 }
 0x2b5   : > { %2098 = vrot.lane.b32.xlu1 %v4968_v23, %s6468_s23  ;;  %1902 = vrot.lane.b32.xlu0 %v5064_v51, %s6469_s24  ;;  %s6470_s24 = smov 6   ;;  %v2333_v23 = vld [vmem:[%s6382_s3 + $0x2d8] sm:$0xff] }
 0x2b6   : > { %2512 = vmatprep.subr.mxu0 %v2333_v23 }
 0x2b7   : > { %2513 = vmatpush1.msra.mxu0 %v2332_v31  ;;  %v2300_v31 = vld [vmem:[%s6382_s3 + $0x1d0] sm:$0xff] }
 0x2b8   : > { %2514 = vmatprep.subr.mxu0 %v2331_v30  ;;  %v2313_v30 = vld [vmem:[%s6382_s3 + $0x238] sm:$0xff] }
 0x2b9   : > { %2133 = vrot.lane.b32.xlu1 %v4977_v40, %s6470_s24  ;;  %1808 = vrot.lane.b32.xlu0 %v5073_v44, %s6471_s25  ;;  %v2254_v40 = vld [vmem:[%s6382_s3 + $0x60] sm:$0xff]  ;;  %s6475_s25 = smov 24  }
 0x2ba   : > { %2450 = vmatpush1.msra.mxu1 %v2254_v40  ;;  %2515 = vmatpush1.msra.mxu0 %v2330_v39  ;;  %v2301_v40 = vld [vmem:[%s6382_s3 + $0x1d8] sm:$0xff]  ;;  %v2312_v39 = vld [vmem:[%s6382_s3 + $0x230] sm:$0xff] }
 0x2bb   : > { %2451 = vmatprep.subr.mxu1 %v2253_v26  ;;  %2516 = vmatprep.subr.mxu0 %v2329_v48  ;;  %v2314_v26 = vld [vmem:[%s6382_s3 + $0x240] sm:$0xff] }
 0x2bc   : > { %2452 = vmatpush1.msra.mxu1 %v2252_v37  ;;  %2517 = vmatpush1.msra.mxu0 %v2328_v4  ;;  %v2299_v37 = vld [vmem:[%s6382_s3 + $0x1c8] sm:$0xff]  ;;  %v2298_v4 = vld [vmem:[%s6382_s3 + $0x1c0] sm:$0xff] }
 0x2bd   : > { %1942 = vrot.lane.b32.xlu1 %v4927_v50, %s6472_s22  ;;  %1996 = vrot.lane.b32.xlu0 %v4927_v50, %s6457_s16 }
 0x2be   : > { %2453 = vmatprep.subr.mxu1 %v2251_v3  ;;  %2518 = vmatprep.subr.mxu0 %v2327_v62  ;;  %v2297_v62 = vld [vmem:[%s6382_s3 + $0x1b8] sm:$0xff] }
 0x2bf   : > { %2454 = vmatpush1.msra.mxu1 %v2250_v13  ;;  %2519 = vmatpush1.msra.mxu0 %v2326_v19  ;;  %v2311_v13 = vld [vmem:[%s6382_s3 + $0x228] sm:$0xff]  ;;  %v2296_v19 = vld [vmem:[%s6382_s3 + $0x1b0] sm:$0xff] }
 0x2c0   : > { %2455 = vmatprep.subr.mxu1 %v2249_v12  ;;  %2520 = vmatprep.subr.mxu0 %v2325_v0  ;;  %v2310_v12 = vld [vmem:[%s6382_s3 + $0x220] sm:$0xff] }
 0x2c1   : > { %2159 = vrot.lane.b32.xlu1 %v5073_v44, %s6473_s0  ;;  %2131 = vrot.lane.b32.xlu0 %v5064_v51, %s6470_s24  ;;  %s6474_s24 = smov 38  }
 0x2c2   : > { %2456 = vmatpush1.msra.mxu1 %v2248_v42  ;;  %2521 = vmatpush1.msra.mxu0 %v2324_v41  ;;  %v2309_v42 = vld [vmem:[%s6382_s3 + $0x218] sm:$0xff]  ;;  %v2295_v41 = vld [vmem:[%s6382_s3 + $0x1a8] sm:$0xff] }
 0x2c3   : > { %v5217_v22 = vpop.permute.xlu1 %1682  ;;  %v5219_v35 = vpop.permute.xlu0 %1628  ;;  %2457 = vmatprep.subr.mxu1 %v2247_v43 }
 0x2c4   : > { %2458 = vmatpush1.msra.mxu1 %v2246_v36  ;;  %v2293_v36 = vld [vmem:[%s6382_s3 + $0x198] sm:$0xff] }
 0x2c5   : > { %1848 = vrot.lane.b32.xlu1 %v5064_v51, %s6474_s24  ;;  %1838 = vrot.lane.b32.xlu0 %v4927_v50, %s6475_s25  ;;  %s6429_s24 = smov 98  }
 0x2c6   : > { %2459 = vmatprep.subr.mxu1 %v2245_v29  ;;  %v2307_v29 = vld [vmem:[%s6382_s3 + $0x208] sm:$0xff] }
 0x2c7   : > { %v5246_v15 = vpop.permute.xlu1 %1732  ;;  %v5248_v24 = vpop.permute.xlu0 %1786  ;;  %2460 = vmatpush1.msra.mxu1 %v2244_v54 }
 0x2c9   : > { %1712 = vrot.lane.b32.xlu1 %v4985_v2, %s3581_s1  ;;  %2006 = vrot.lane.b32.xlu0 %v5064_v51, %s6476_s11  ;;  %v2323_v51 = vld [vmem:[%s6382_s3 + $0x288] sm:$0xff]  ;;  %s6427_s11 = smov 42  }
 0x2ca   : > { %2522 = vmatprep.subr.mxu0 %v2323_v51  ;;  %v2308_v51 = vld [vmem:[%s6382_s3 + $0x210] sm:$0xff] }
 0x2cb   : > { %v5272_v9 = vpop.permute.xlu1 %1890  ;;  %v5274_v34 = vpop.permute.xlu0 %1994  ;;  %2523 = vmatpush1.msra.mxu0 %v2322_v53 }
 0x2cc   : > { %2524 = vmatprep.subr.mxu0 %v2321_v49  ;;  %v2306_v49 = vld [vmem:[%s6382_s3 + $0x200] sm:$0xff] }
 0x2cd   : > { %1762 = vrot.lane.b32.xlu1 %v4985_v2, %s6431_s18  ;;  %2161 = vrot.lane.b32.xlu0 %v5003_v21, %s6473_s0  ;;  %v2243_v21 = vld [vmem:[%s6382_s3 + $0x8] sm:$0xff]  ;;  %s6430_s0 = smov 50   ;;  %s6432_s18 = smov 106  }
 0x2ce   : > { %2461 = vmatprep.subr.mxu1 %v2243_v21  ;;  %2525 = vmatpush1.msra.mxu0 %v2320_v38  ;;  %v2369_v21 = vld [vmem:[%s6382_s3 + $0x3f8] sm:$0xff]  ;;  %v2291_v38 = vld [vmem:[%s6382_s3 + $0x188] sm:$0xff] }
 0x2cf   : > { %v5298_v61 = vpop.permute.xlu1 %2094  ;;  %v5300_v5 = vpop.permute.xlu0 %1836  ;;  %2462 = vmatpush1.msra.mxu1 %v2242_v58  ;;  %2526 = vmatprep.subr.mxu0 %v2319_v25  ;;  %v2368_v58 = vld [vmem:[%s6382_s3 + $0x3f0] sm:$0xff]  ;;  %v2290_v25 = vld [vmem:[%s6382_s3 + $0x180] sm:$0xff] }
 0x2d0   : > { %2110 = vst.msk [vmem:[#allocation3 + $0x28] sm:$0xff] %vm2109_vm8, %v5298_v61  ;;  %2463 = vmatprep.subr.mxu1 %v2305_v56  ;;  %2527 = vmatpush1.msra.mxu0 %v2318_v8  ;;  %v2367_v56 = vld [vmem:[%s6382_s3 + $0x3e8] sm:$0xff]  ;;  %vm2113_vm8 = vcmask 25600  }
 0x2d1   : > { %1870 = vrot.lane.b32.xlu1 %v4985_v2, %s6426_s27  ;;  %1595 = vrot.lane.b32.xlu0 %v4985_v2, %s6427_s11  ;;  %s6428_s11 = smov 10   ;;  %s6479_s27 = smov 92  }
 0x2d2   : > { %2464 = vmatpush2.msra.mxu1 %v2304_v1  ;;  %2528 = vmatprep.subr.mxu0 %v2317_v18  ;;  %v2289_v18 = vld [vmem:[%s6382_s3 + $0x178] sm:$0xff] }
 0x2d3   : > { %v5325_v46 = vpop.permute.xlu1 %1692  ;;  %v5327_v52 = vpop.permute.xlu0 %1940  ;;  %2465 = vmatprep.subr.mxu1 %v2303_v14  ;;  %2529 = vmatpush1.msra.mxu0 %v2316_v16  ;;  %v2366_v14 = vld [vmem:[%s6382_s3 + $0x3e0] sm:$0xff]  ;;  %v2288_v16 = vld [vmem:[%s6382_s3 + $0x170] sm:$0xff] }
 0x2d4   : > { %2466 = vmatpush2.msra.mxu1 %v2302_v6  ;;  %2530 = vmatprep.subr.mxu0 %v2315_v20  ;;  %v2365_v6 = vld [vmem:[%s6382_s3 + $0x3d8] sm:$0xff]  ;;  %v2287_v20 = vld [vmem:[%s6382_s3 + $0x168] sm:$0xff] }
 0x2d5   : > { %1816 = vrot.lane.b32.xlu1 %v4985_v2, %s6428_s11  ;;  %1658 = vrot.lane.b32.xlu0 %v4985_v2, %s6429_s24  ;;  %s6434_s24 = smov 34   ;;  %s6478_s11 = smov 56  }
 0x2d6   : > { %2467 = vmatprep.subr.mxu1 %v2301_v40  ;;  %2531 = vmatpush1.msra.mxu0 %v2314_v26  ;;  %v2364_v40 = vld [vmem:[%s6382_s3 + $0x3d0] sm:$0xff] }
 0x2d7   : > { %v5351_v23 = vpop.permute.xlu1 %1742  ;;  %v5353_v45 = vpop.permute.xlu0 %2092  ;;  %2468 = vmatpush2.msra.mxu1 %v2300_v31  ;;  %2532 = vmatprep.subr.mxu0 %v2313_v30  ;;  %v2286_v30 = vld [vmem:[%s6382_s3 + $0x160] sm:$0xff] }
 0x2d8   : > { %2469 = vmatprep.subr.mxu1 %v2299_v37  ;;  %2533 = vmatpush1.msra.mxu0 %v2312_v39  ;;  %v2363_v37 = vld [vmem:[%s6382_s3 + $0x3c8] sm:$0xff] }
 0x2d9   : > { %2184 = vrot.lane.b32.xlu1 %v4985_v2, %s6434_s24  ;;  %1974 = vrot.lane.b32.xlu0 %v4985_v2, %s6430_s0 }
 0x2da   : > { %2470 = vmatpush2.msra.mxu1 %v2298_v4  ;;  %2534 = vmatprep.subr.mxu0 %v2311_v13  ;;  %v2362_v4 = vld [vmem:[%s6382_s3 + $0x3c0] sm:$0xff]  ;;  %v2284_v13 = vld [vmem:[%s6382_s3 + $0x150] sm:$0xff] }
 0x2db   : > { %v5377_v48 = vpop.permute.xlu1 %1796  ;;  %v1550_v3 = vpop.permute.xlu0 %1549  ;;  %2471 = vmatprep.subr.mxu1 %v2297_v62  ;;  %2535 = vmatpush1.msra.mxu0 %v2310_v12  ;;  %v2361_v62 = vld [vmem:[%s6382_s3 + $0x3b8] sm:$0xff] }
 0x2dc   : > { %1556 = vst.msk [vmem:[#allocation3] sm:$0xff] %vm1555_vm9, %v1550_v3  ;;  %2472 = vmatpush2.msra.mxu1 %v2296_v19  ;;  %2536 = vmatprep.subr.mxu0 %v2309_v42  ;;  %v2285_v3 = vld [vmem:[%s6382_s3 + $0x158] sm:$0xff]  ;;  %v2360_v42 = vld [vmem:[%s6382_s3 + $0x3b0] sm:$0xff]  ;;  %vm2141_vm9 = vcmask 140320  }
 0x2dd   : > { %2024 = vrot.lane.b32.xlu1 %v4985_v2, %s6432_s18  ;;  %1920 = vrot.lane.b32.xlu0 %v4985_v2, %s6433_s2  ;;  %v2294_v2 = vld [vmem:[%s6382_s3 + $0x1a0] sm:$0xff]  ;;  %s6477_s2 = smov 112   ;;  %s6481_s18 = smov 42  }
 0x2de   : > { %2473 = vmatprep.subr.mxu1 %v2295_v41  ;;  %2537 = vmatpush1.msra.mxu0 %v2308_v51  ;;  %v2359_v41 = vld [vmem:[%s6382_s3 + $0x3a8] sm:$0xff] }
 0x2df   : > { %v2130_v0 = vpop.permute.xlu1 %2129  ;;  %v5401_v43 = vpop.permute.xlu0 %1638  ;;  %2474 = vmatpush2.msra.mxu1 %v2294_v2  ;;  %2538 = vmatprep.subr.mxu0 %v2307_v29  ;;  %v2281_v2 = vld [vmem:[%s6382_s3 + $0x138] sm:$0xff] }
 0x2e0   : > { %2475 = vmatprep.subr.mxu1 %v2293_v36  ;;  %2539 = vmatpush1.msra.mxu0 %v2306_v49  ;;  %v2358_v36 = vld [vmem:[%s6382_s3 + $0x3a0] sm:$0xff]  ;;  %v2357_v49 = vld [vmem:[%s6382_s3 + $0x398] sm:$0xff] }
 0x2e1   : > { %1722 = vrot.lane.b32.xlu1 %v4899_v63, %s6461_s21  ;;  %2186 = vrot.lane.b32.xlu0 %v5027_v11, %s6434_s24  ;;  %v2292_v11 = vld [vmem:[%s6382_s3 + $0x190] sm:$0xff]  ;;  %s6483_s24 = smov 98  }
 0x2e2   : > { %2476 = vmatpush2.msra.mxu1 %v2292_v11  ;;  %2540 = vmatprep.subr.mxu0 %v2369_v21  ;;  %v2280_v11 = vld [vmem:[%s6382_s3 + $0x130] sm:$0xff]  ;;  %v2279_v21 = vld [vmem:[%s6382_s3 + $0x128] sm:$0xff] }
 0x2e3   : > { %v5422_v53 = vpop.permute.xlu1 %2004  ;;  %v5424_v54 = vpop.permute.xlu0 %1950  ;;  %2477 = vmatprep.subr.mxu1 %v2291_v38  ;;  %2541 = vmatpush2.msra.mxu0 %v2368_v58  ;;  %v2356_v38 = vld [vmem:[%s6382_s3 + $0x390] sm:$0xff]  ;;  %v2278_v58 = vld [vmem:[%s6382_s3 + $0x120] sm:$0xff] }
 0x2e4   : > { %1959 = vst.msk [vmem:[#allocation3 + $0x20] sm:$0xff] %vm1958_vm10, %v5424_v54  ;;  %2478 = vmatpush2.msra.mxu1 %v2290_v25  ;;  %2542 = vmatprep.subr.mxu0 %v2367_v56  ;;  %v2355_v25 = vld [vmem:[%s6382_s3 + $0x388] sm:$0xff] }
 0x2e5   : > { %1668 = vrot.lane.b32.xlu0 %v4899_v63, %s6477_s2  ;;  %1714 = vrot.lane.b32.xlu1 %v4945_v7, %s3581_s1  ;;  %s6484_s1 = smov 10  }
 0x2e6   : > { %2479 = vmatprep.subr.mxu1 %v2289_v18  ;;  %2543 = vmatpush2.msra.mxu0 %v2366_v14  ;;  %v2277_v14 = vld [vmem:[%s6382_s3 + $0x118] sm:$0xff] }
 0x2e7   : > { %v5453_v8 = vpop.permute.xlu1 %1702  ;;  %v5455_v1 = vpop.permute.xlu0 %1900  ;;  %2480 = vmatpush2.msra.mxu1 %v2288_v16  ;;  %2544 = vmatprep.subr.mxu0 %v2365_v6  ;;  %v2354_v16 = vld [vmem:[%s6382_s3 + $0x380] sm:$0xff]  ;;  %v2276_v6 = vld [vmem:[%s6382_s3 + $0x110] sm:$0xff] }
 0x2e8   : > { %2481 = vmatprep.subr.mxu1 %v2287_v20  ;;  %2545 = vmatpush2.msra.mxu0 %v2364_v40  ;;  %v2353_v20 = vld [vmem:[%s6382_s3 + $0x378] sm:$0xff]  ;;  %v2275_v40 = vld [vmem:[%s6382_s3 + $0x108] sm:$0xff] }
 0x2e9   : > { %1618 = vrot.lane.b32.xlu0 %v4899_v63, %s6478_s11  ;;  %1880 = vrot.lane.b32.xlu1 %v4899_v63, %s6462_s17 }
 0x2ea   : > { %2482 = vmatpush2.msra.mxu1 %v2286_v30  ;;  %2546 = vmatprep.subr.mxu0 %v2363_v37 }
 0x2eb   : > { %v5479_v26 = vpop.permute.xlu1 %1752  ;;  %v2128_v31 = vpop.permute.xlu0 %2127  ;;  %2483 = vmatprep.subr.mxu1 %v2285_v3  ;;  %2547 = vmatpush2.msra.mxu0 %v2362_v4  ;;  %v2351_v3 = vld [vmem:[%s6382_s3 + $0x368] sm:$0xff]  ;;  %v2401_v4 = vld [vmem:[%s6382_s3 + $0x4f8] sm:$0xff] }
 0x2ec   : > { %v2135_v39 = vsel %vm1958_vm10, %v2128_v31, %v2130_v0  ;;  %2484 = vmatpush2.msra.mxu1 %v2284_v13  ;;  %v2282_v0 = vld [vmem:[%s6382_s3 + $0x140] sm:$0xff]  ;;  %2548 = vmatprep.subr.mxu0 %v2361_v62  ;;  %v2352_v31 = vld [vmem:[%s6382_s3 + $0x370] sm:$0xff]  ;;  %v2349_v62 = vld [vmem:[%s6382_s3 + $0x358] sm:$0xff] }
 0x2ed   : > { %2140 = vst.msk [vmem:[#allocation3 + $0x28] sm:$0xff] %vm2139_vm11, %v2135_v39  ;;  %2016 = vrot.lane.b32.xlu0 %v5073_v44, %s6479_s27  ;;  %1984 = vrot.lane.b32.xlu1 %v4899_v63, %s6457_s16  ;;  %v2283_v44 = vld [vmem:[%s6382_s3 + $0x148] sm:$0xff]  ;;  %s6482_s27 = smov 66   ;;  %v2274_v39 = vld [vmem:[%s6382_s3 + $0x100] sm:$0xff]  ;;  %vm1770_vm11 = vcmask 80896  }
 0x2ee   : > { %2485 = vmatprep.subr.mxu1 %v2283_v44  ;;  %2549 = vmatpush2.msra.mxu0 %v2360_v42  ;;  %v2350_v13 = vld [vmem:[%s6382_s3 + $0x360] sm:$0xff] }
 0x2ef   : > { %v5504_v12 = vpop.permute.xlu1 %1684  ;;  %v5506_v19 = vpop.permute.xlu0 %1846  ;;  %2486 = vmatpush2.msra.mxu1 %v2282_v0  ;;  %2550 = vmatprep.subr.mxu0 %v2359_v41  ;;  %v2347_v0 = vld [vmem:[%s6382_s3 + $0x348] sm:$0xff]  ;;  %v2346_v41 = vld [vmem:[%s6382_s3 + $0x340] sm:$0xff] }
 0x2f0   : > { %2487 = vmatprep.subr.mxu1 %v2281_v2  ;;  %2551 = vmatpush2.msra.mxu0 %v2358_v36 }
 0x2f1   : > { %1764 = vrot.lane.b32.xlu1 %v4945_v7, %s6480_s15  ;;  %1597 = vrot.lane.b32.xlu0 %v4945_v7, %s6481_s18  ;;  %s3591_s15 = smov 48   ;;  %s6488_s18 = smov 106  }
 0x2f2   : > { %2488 = vmatpush2.msra.mxu1 %v2280_v11  ;;  %2552 = vmatprep.subr.mxu0 %v2357_v49  ;;  %v2344_v11 = vld [vmem:[%s6382_s3 + $0x330] sm:$0xff] }
 0x2f3   : > { %v5530_v51 = vpop.permute.xlu1 %1694  ;;  %v1573_v29 = vpop.permute.xlu0 %1572  ;;  %2489 = vmatprep.subr.mxu1 %v2279_v21  ;;  %2553 = vmatpush2.msra.mxu0 %v2356_v38  ;;  %v2342_v38 = vld [vmem:[%s6382_s3 + $0x320] sm:$0xff] }
 0x2f4   : > { %1579 = vst.msk [vmem:[#allocation3] sm:$0xff] %vm1578_vm12, %v1573_v29  ;;  %2490 = vmatpush2.msra.mxu1 %v2278_v58  ;;  %2554 = vmatprep.subr.mxu0 %v2355_v25  ;;  %v2345_v29 = vld [vmem:[%s6382_s3 + $0x338] sm:$0xff]  ;;  %v2340_v25 = vld [vmem:[%s6382_s3 + $0x310] sm:$0xff]  ;;  %vm2170_vm12 = vcmask 255120  }
 0x2f5   : > { %1930 = vrot.lane.b32.xlu1 %v4899_v63, %s6472_s22  ;;  %1776 = vrot.lane.b32.xlu0 %v4899_v63, %s6465_s29  ;;  %v2341_v58 = vld [vmem:[%s6382_s3 + $0x318] sm:$0xff] }
 0x2f6   : > { %2491 = vmatprep.subr.mxu1 %v2277_v14  ;;  %2555 = vmatpush2.msra.mxu0 %v2354_v16  ;;  %v2339_v16 = vld [vmem:[%s6382_s3 + $0x308] sm:$0xff] }
 0x2f7   : > { %v1575_v56 = vpop.permute.xlu1 %1574  ;;  %v5554_v18 = vpop.permute.xlu0 %1648  ;;  %2492 = vmatpush2.msra.mxu1 %v2276_v6  ;;  %2556 = vmatprep.subr.mxu0 %v2353_v20  ;;  %v2338_v6 = vld [vmem:[%s6382_s3 + $0x300] sm:$0xff] }
 0x2f8   : > { %2493 = vmatprep.subr.mxu1 %v2275_v40  ;;  %2557 = vmatpush2.msra.mxu0 %v2352_v31 }
 0x2f9   : > { %1872 = vrot.lane.b32.xlu1 %v4945_v7, %s6482_s27  ;;  %1660 = vrot.lane.b32.xlu0 %v4945_v7, %s6483_s24 }
 0x2fa   : > { %2494 = vmatpush2.msra.mxu1 %v2274_v39  ;;  %2558 = vmatprep.subr.mxu0 %v2351_v3 }
 0x2fb   : > { %v5578_v30 = vpop.permute.xlu1 %1630  ;;  %v1552_v37 = vpop.permute.xlu0 %1551  ;;  %2585 = vmatprep.subr.mxu1 %v2401_v4  ;;  %2559 = vmatpush2.msra.mxu0 %v2350_v13 }
 0x2fc   : > { %1558 = vst.msk [vmem:[#allocation3 + $0x30] sm:$0x3] %vm1557_vm14, %v1552_v37  ;;  %2560 = vmatprep.subr.mxu0 %v2349_v62  ;;  %vm1876_vm14 = vcmask 179264  }
 0x2fd   : > { %2215 = vrot.lane.b32.xlu1 %v5041_v57, %s3591_s15  ;;  %1826 = vrot.lane.b32.xlu0 %v4899_v63, %s6475_s25  ;;  %1581 = vst.msk [vmem:[#allocation3 + $0x30] sm:$0x3] %vm1580_vm15, %v1575_v56  ;;  %v2348_v57 = vld [vmem:[%s6382_s3 + $0x350] sm:$0xff]  ;;  %vm1980_vm15 = vcmask 277664  }
 0x2fe   : > { %2561 = vmatpush2.msra.mxu0 %v2348_v57 }
 0x2ff   : > { %v1965_v44 = vpop.permute.xlu1 %1964  ;;  %v5600_v42 = vpop.permute.xlu0 %1856  ;;  %2562 = vmatprep.subr.mxu0 %v2347_v0 }
 0x300   : > { %1971 = vst.msk [vmem:[#allocation3 + $0x20] sm:$0xff] %vm1970_vm0, %v1965_v44  ;;  %2563 = vmatpush2.msra.mxu0 %v2346_v41  ;;  %vm6445_vm0 = vcmask 277504  }
 0x301   : > { %1865 = vst.msk [vmem:[#allocation3 + $0x18] sm:$0xff] %vm1864_vm1, %v5600_v42  ;;  %2034 = vrot.lane.b32.xlu1 %v4899_v63, %s6468_s23  ;;  %2213 = vrot.lane.b32.xlu0 %v4899_v63, %s3591_s15  ;;  %v2343_v63 = vld [vmem:[%s6382_s3 + $0x328] sm:$0xff]  ;;  %vm2197_vm1 = vcmask 376064  }
 0x302   : > { %2564 = vmatprep.subr.mxu0 %v2345_v29 }
 0x303   : > { %v5616_v2 = vpop.permute.xlu1 %1744  ;;  %v5618_v36 = vpop.permute.xlu0 %1704  ;;  %2565 = vmatpush2.msra.mxu0 %v2344_v11 }
 0x304   : > { %2566 = vmatprep.subr.mxu0 %v2343_v63 }
 0x305   : > { %1818 = vrot.lane.b32.xlu1 %v4945_v7, %s6484_s1  ;;  %1976 = vrot.lane.b32.xlu0 %v4945_v7, %s6485_s28  ;;  %s6487_s1 = smov 122  }
 0x306   : > { %2567 = vmatpush2.msra.mxu0 %v2342_v38 }
 0x307   : > { %v5633_v49 = vpop.permute.xlu1 %1910  ;;  %v5635_v21 = vpop.permute.xlu0 %1734  ;;  %2568 = vmatprep.subr.mxu0 %v2341_v58 }
 0x308   : > { %2569 = vmatpush2.msra.mxu0 %v2340_v25 }
 0x309   : > { %2188 = vrot.lane.b32.xlu1 %v4945_v7, %s6486_s14  ;;  %1922 = vrot.lane.b32.xlu0 %v4945_v7, %s6487_s1 }
 0x30a   : > { %2570 = vmatprep.subr.mxu0 %v2339_v16 }
 0x30b   : > { %v5650_v56 = vpop.permute.xlu1 %1650  ;;  %v5652_v14 = vpop.permute.xlu0 %1640  ;;  %2571 = vmatpush2.msra.mxu0 %v2338_v6 }
 0x30d   : > { %2026 = vrot.lane.b32.xlu1 %v4945_v7, %s6488_s18  ;;  %1670 = vrot.lane.b32.xlu0 %v4960_v17, %s6477_s2  ;;  %s6494_s18 = smov 28   ;;  %s3593_s2 = smov 100  }
 0x30f   : > { %v5664_v20 = vpop.permute.xlu1 %1858  ;;  %v5666_v40 = vpop.permute.xlu0 %1806 }
 0x310   : > { %1869 = vst.msk [vmem:[#allocation3 + $0x48] sm:$0x3] %vm1868_vm2, %v5664_v20  ;;  %vm1676_vm2 = vcmask 97280  }
 0x311   : > { %1724 = vrot.lane.b32.xlu1 %v4960_v17, %s6461_s21  ;;  %2190 = vrot.lane.b32.xlu0 %v5031_v47, %s6486_s14 }
 0x313   : > { %v2158_v31 = vpop.permute.xlu1 %2157  ;;  %v5673_v7 = vpop.permute.xlu0 %1754 }
 0x315   : > { %1778 = vrot.lane.b32.xlu1 %v4960_v17, %s6465_s29  ;;  %1620 = vrot.lane.b32.xlu0 %v4960_v17, %s6478_s11  ;;  %s3594_s11 = smov 72  }
 0x317   : > { %v5679_v37 = vpop.permute.xlu1 %1892  ;;  %v2156_v39 = vpop.permute.xlu0 %2155 }
 0x318   : > { %v2164_v3 = vsel %vm2163_vm3, %v2156_v39, %v2158_v31 }
 0x319   : > { %2169 = vst.msk [vmem:[#allocation3 + $0x28] sm:$0xff] %vm2168_vm5, %v2164_v3  ;;  %1986 = vrot.lane.b32.xlu1 %v4960_v17, %s6457_s16  ;;  %1882 = vrot.lane.b32.xlu0 %v4960_v17, %s6462_s17  ;;  %vm1698_vm5 = vcmask 326864   ;;  %s3595_s16 = smov 44  }
 0x31b   : > { %v5686_v47 = vpop.permute.xlu1 %1798  ;;  %v5688_v4 = vpop.permute.xlu0 %2014 }
 0x31d   : > { %1932 = vrot.lane.b32.xlu1 %v4960_v17, %s6472_s22  ;;  %1828 = vrot.lane.b32.xlu0 %v4960_v17, %s6475_s25  ;;  %s3177_s22 = scalar_lea.sflag [#allocation6], %s323_s20 }
 0x31f   : > { %v1967_v13 = vpop.permute.xlu1 %1966  ;;  %v5694_v62 = vpop.permute.xlu0 %1788 }
 0x321   : > { %2219 = vrot.lane.b32.xlu1 %v5034_v55, %s3591_s15  ;;  %2217 = vrot.lane.b32.xlu0 %v4960_v17, %s3591_s15 }
 0x323   : > { %v5700_v44 = vpop.permute.xlu1 %1912  ;;  %v5702_v57 = vpop.permute.xlu0 %1952 }
 0x324   : > { %1963 = vst.msk [vmem:[#allocation3 + $0x50] sm:$0x3] %vm1962_vm6, %v5702_v57  ;;  %vm1708_vm6 = vcmask 441664  }
 0x325   : > { %2096 = vrot.lane.b32.xlu1 %v4927_v50, %s6468_s23  ;;  %2036 = vrot.lane.b32.xlu0 %v4960_v17, %s6468_s23  ;;  %1973 = vst.msk [vmem:[#allocation3 + $0x50] sm:$0x3] %vm1972_vm7, %v1967_v13  ;;  %vm1718_vm7 = vcmask 556464  }
 0x327   : > { %v5709_v55 = vpop.permute.xlu1 %2098  ;;  %v5711_v0 = vpop.permute.xlu0 %1902 }
 0x328   : > { %2114 = vst.msk [vmem:[#allocation3 + $0x58] sm:$0x3] %vm2113_vm8, %v5709_v55  ;;  %vm1624_vm8 = vcmask 572864  }
 0x32b   : > { %v2134_v41 = vpop.permute.xlu1 %2133  ;;  %v5714_v29 = vpop.permute.xlu0 %1808 }
 0x32f   : > { %v5716_v11 = vpop.permute.xlu1 %1942  ;;  %v5718_v63 = vpop.permute.xlu0 %1996 }
 0x333   : > { %v2160_v50 = vpop.permute.xlu1 %2159  ;;  %v2132_v38 = vpop.permute.xlu0 %2131 }
 0x334   : > { %v2136_v17 = vsel %vm1958_vm10, %v2132_v38, %v2134_v41  ;;  %vm1601_vm10 = vcmask 458064  }
 0x335   : > { %2142 = vst.msk [vmem:[#allocation3 + $0x58] sm:$0x3] %vm2141_vm9, %v2136_v17  ;;  %vm1886_vm9 = vcmask 294064  }
 0x337   : > { %v5721_v58 = vpop.permute.xlu1 %1848  ;;  %v5723_v25 = vpop.permute.xlu0 %1838 }
 0x33b   : > { %v1713_v16 = vpop.permute.xlu1 %1712  ;;  %v5725_v6 = vpop.permute.xlu0 %2006 }
 0x33f   : > { %v5727_v31 = vpop.permute.xlu1 %1762  ;;  %v2162_v39 = vpop.permute.xlu0 %2161 }
 0x340   : > { %1771 = vst.msk [vmem:[#allocation3 + $0x10] sm:$0xff] %vm1770_vm11, %v5727_v31  ;;  %v2165_v3 = vsel %vm2163_vm3, %v2160_v50, %v2162_v39  ;;  %vm1688_vm3 = vcmask 212064   ;;  %vm1728_vm11 = vcmask 671264  }
 0x341   : > { %2171 = vst.msk [vmem:[#allocation3 + $0x58] sm:$0x3] %vm2170_vm12, %v2165_v3  ;;  %vm1634_vm12 = vcmask 687664  }
 0x343   : > { %v1871_v13 = vpop.permute.xlu1 %1870  ;;  %v1596_v41 = vpop.permute.xlu0 %1595 }
 0x344   : > { %1877 = vst.msk [vmem:[#allocation3 + $0x18] sm:$0xff] %vm1876_vm14, %v1871_v13  ;;  %vm1896_vm14 = vcmask 408864  }
 0x345   : > { %1602 = vst.msk [vmem:[#allocation3] sm:$0xff] %vm1601_vm10, %v1596_v41  ;;  %vm1738_vm10 = vcmask 786064  }
 0x347   : > { %v5731_v38 = vpop.permute.xlu1 %1816  ;;  %v1659_v17 = vpop.permute.xlu0 %1658 }
 0x34b   : > { %v2185_v33 = vpop.permute.xlu1 %2184  ;;  %v1975_v32 = vpop.permute.xlu0 %1974 }
 0x34c   : > { %1981 = vst.msk [vmem:[#allocation3 + $0x20] sm:$0xff] %vm1980_vm15, %v1975_v32  ;;  %vm1644_vm15 = vcmask 802464  }
 0x34f   : > { %v5733_v10 = vpop.permute.xlu1 %2024  ;;  %v1921_v60 = vpop.permute.xlu0 %1920 }
 0x353   : > { %v1723_v50 = vpop.permute.xlu1 %1722  ;;  %v2187_v39 = vpop.permute.xlu0 %2186 }
 0x354   : > { %v2193_v3 = vsel %vm6445_vm0, %v2185_v33, %v2187_v39  ;;  %vm1664_vm0 = vcmask 1032064   ;;  %v2388_v39 = vld [vmem:[%s6382_s3 + $0x490] sm:$0xff] }
 0x355   : > { %2198 = vst.msk [vmem:[#allocation3 + $0x28] sm:$0xff] %vm2197_vm1, %v2193_v3  ;;  %vm1768_vm1 = vcmask 1048544  }
 0x357   : > { %v1669_v13 = vpop.permute.xlu0 %1668  ;;  %v5736_v41 = vpop.permute.xlu1 %1714 }
 0x358   : > { %1677 = vst.msk [vmem:[#allocation3 + $0x8] sm:$0xff] %vm1676_vm2, %v1669_v13  ;;  %vm1654_vm2 = vcmask 917264  }
 0x359   : > { %1689 = vst.msk [vmem:[#allocation3 + $0x8] sm:$0xff] %vm1688_vm3, %v5217_v22  ;;  %vm1916_vm3 = vcmask 638464  }
 0x35a   : > { %1699 = vst.msk [vmem:[#allocation3 + $0x8] sm:$0xff] %vm1698_vm5, %v5325_v46  ;;  %vm1990_vm5 = vcmask 392464  }
 0x35b   : > { %1709 = vst.msk [vmem:[#allocation3 + $0x8] sm:$0xff] %vm1708_vm6, %v5453_v8  ;;  %v1619_v32 = vpop.permute.xlu0 %1618  ;;  %v1881_v33 = vpop.permute.xlu1 %1880  ;;  %vm1926_vm6 = vcmask 753264   ;;  %v2397_v8 = vld [vmem:[%s6382_s3 + $0x4d8] sm:$0xff] }
 0x35c   : > { %1719 = vst.msk [vmem:[#allocation3 + $0x8] sm:$0xff] %vm1718_vm7, %v1713_v16  ;;  %vm1674_vm7 = vcmask 1048560   ;;  %v2391_v16 = vld [vmem:[%s6382_s3 + $0x4a8] sm:$0xff] }
 0x35d   : > { %1625 = vst.msk [vmem:[#allocation3] sm:$0xff] %vm1624_vm8, %v1619_v32  ;;  %vm6489_vm8 = vcmask 523664   ;;  %v2384_v32 = vld [vmem:[%s6382_s3 + $0x470] sm:$0xff] }
 0x35e   : > { %1887 = vst.msk [vmem:[#allocation3 + $0x18] sm:$0xff] %vm1886_vm9, %v1881_v33  ;;  %vm2000_vm9 = vcmask 507264   ;;  %v2383_v33 = vld [vmem:[%s6382_s3 + $0x468] sm:$0xff] }
 0x35f   : > { %1729 = vst.msk [vmem:[#allocation3 + $0x8] sm:$0xff] %vm1728_vm11, %v1723_v50  ;;  %v5756_v22 = vpop.permute.xlu0 %2016  ;;  %vm2010_vm11 = vcmask 622064  }
 0x360   : > { %1635 = vst.msk [vmem:[#allocation3] sm:$0xff] %vm1634_vm12, %v5219_v35  ;;  %v1985_v35 = vpop.permute.xlu1 %1984  ;;  %vm1774_vm12 = vcmask 74752  }
 0x361   : > { %1897 = vst.msk [vmem:[#allocation3 + $0x18] sm:$0xff] %vm1896_vm14, %v5272_v9  ;;  %vm1603_vm14 = vcmask 451920  }
 0x362   : > { %1739 = vst.msk [vmem:[#allocation3 + $0x8] sm:$0xff] %vm1738_vm10, %v5246_v15  ;;  %vm2030_vm10 = vcmask 851664  }
 0x363   : > { %1645 = vst.msk [vmem:[#allocation3] sm:$0xff] %vm1644_vm15, %v5401_v43  ;;  %v1598_v9 = vpop.permute.xlu0 %1597  ;;  %vm1946_vm15 = vcmask 982864   ;;  %v2400_v43 = vld [vmem:[%s6382_s3 + $0x4f0] sm:$0xff] }
 0x364   : > { %1907 = vst.msk [vmem:[#allocation3 + $0x18] sm:$0xff] %vm6489_vm8, %v5455_v1  ;;  %v5770_v15 = vpop.permute.xlu1 %1764  ;;  %vm1832_vm8 = vcmask 769664   ;;  %v2394_v1 = vld [vmem:[%s6382_s3 + $0x4c0] sm:$0xff] }
 0x365   : > { %1749 = vst.msk [vmem:[#allocation3 + $0x8] sm:$0xff] %vm1748_vm13, %v5351_v23  ;;  %vm2020_vm13 = vcmask 736864  }
 0x366   : > { %1655 = vst.msk [vmem:[#allocation3] sm:$0xff] %vm1654_vm2, %v5554_v18  ;;  %vm1956_vm2 = vcmask 1048512  }
 0x367   : > { %1917 = vst.msk [vmem:[#allocation3 + $0x18] sm:$0xff] %vm1916_vm3, %v5633_v49  ;;  %vm1802_vm3 = vcmask 425264   ;;  %v2393_v49 = vld [vmem:[%s6382_s3 + $0x4b8] sm:$0xff] }
 0x368   : > { %1759 = vst.msk [vmem:[#allocation3 + $0x8] sm:$0xff] %vm1758_vm4, %v5479_v26  ;;  %vm1936_vm4 = vcmask 868064  }
 0x369   : > { %1665 = vst.msk [vmem:[#allocation3] sm:$0xff] %vm1664_vm0, %v1659_v17  ;;  %vm1782_vm0 = vcmask 195664   ;;  %v2389_v17 = vld [vmem:[%s6382_s3 + $0x498] sm:$0xff] }
 0x36a   : > { %1991 = vst.msk [vmem:[#allocation3 + $0x20] sm:$0xff] %vm1990_vm5, %v1985_v35  ;;  %vm1812_vm5 = vcmask 540064  }
 0x36b   : > { %1927 = vst.msk [vmem:[#allocation3 + $0x18] sm:$0xff] %vm1926_vm6, %v1921_v60  ;;  %v1931_v60 = vpop.permute.xlu1 %1930  ;;  %vm1878_vm6 = vcmask 173120  }
 0x36c   : > { %1769 = vst.msk [vmem:[#allocation3 + $0x8] sm:$0xff] %vm1768_vm1, %v5727_v31  ;;  %vm1792_vm1 = vcmask 310464   ;;  %v2390_v31 = vld [vmem:[%s6382_s3 + $0x4a0] sm:$0xff] }
 0x36d   : > { %1675 = vst.msk [vmem:[#allocation3] sm:$0xff] %vm1674_vm7, %v1669_v13  ;;  %vm1822_vm7 = vcmask 654864   ;;  %v2385_v13 = vld [vmem:[%s6382_s3 + $0x478] sm:$0xff] }
 0x36e   : > { %2001 = vst.msk [vmem:[#allocation3 + $0x20] sm:$0xff] %vm2000_vm9, %v5274_v34  ;;  %v1777_v34 = vpop.permute.xlu0 %1776  ;;  %vm1842_vm9 = vcmask 884464  }
 0x36f   : > { %2011 = vst.msk [vmem:[#allocation3 + $0x20] sm:$0xff] %vm2010_vm11, %v5422_v53  ;;  %v2398_v53 = vld [vmem:[%s6382_s3 + $0x4e0] sm:$0xff]  ;;  %vm1852_vm11 = vcmask 999264  }
 0x370   : > { %2021 = vst.msk [vmem:[#allocation3 + $0x20] sm:$0xff] %vm2020_vm13, %v5688_v4  ;;  %vm1862_vm13 = vcmask 1048528  }
 0x371   : > { %1775 = vst.msk [vmem:[#allocation3 + $0x40] sm:$0x3] %vm1774_vm12, %v5770_v15  ;;  %vm2100_vm12 = vcmask 982016  }
 0x372   : > { %1604 = vst.msk [vmem:[#allocation3 + $0x30] sm:$0x3] %vm1603_vm14, %v1598_v9  ;;  %vm2040_vm14 = vcmask 966464   ;;  %v2382_v9 = vld [vmem:[%s6382_s3 + $0x460] sm:$0xff] }
 0x373   : > { %2031 = vst.msk [vmem:[#allocation3 + $0x20] sm:$0xff] %vm2030_vm10, %v5733_v10  ;;  %v2231_v46 = vld [vmem:[#allocation3 + $0x8] sm:$0xff]  ;;  %vm2221_vm10 = vcmask 392192  }
 0x374   : > { %1937 = vst.msk [vmem:[#allocation3 + $0x18] sm:$0xff] %vm1936_vm4, %v1931_v60  ;;  %v2230_v23 = vld [vmem:[#allocation3] sm:$0xff]  ;;  %2495 = vmatprep.mubr.f32.mxu1 %v2231_v46  ;;  %v2399_v10 = vld [vmem:[%s6382_s3 + $0x4e8] sm:$0xff]  ;;  %vm2107_vm4 = vcmask 1048496   ;;  %v2381_v46 = vld [vmem:[%s6382_s3 + $0x458] sm:$0xff] }
 0x375   : > { %1783 = vst.msk [vmem:[#allocation3 + $0x10] sm:$0xff] %vm1782_vm0, %v1777_v34  ;;  %2496 = vmatmul.mubr.f32.vlgmr.msra.gmra.mxu1 %v2230_v23  ;;  %vm2226_vm0 = vcmask 490864   ;;  %v2380_v23 = vld [vmem:[%s6382_s3 + $0x450] sm:$0xff] }
 0x376   : > { %1947 = vst.msk [vmem:[#allocation3 + $0x18] sm:$0xff] %vm1946_vm15, %v5327_v52  ;;  %2586 = vmatpush1.msra.mxu1 %v2400_v43  ;;  %v1873_v52 = vpop.permute.xlu1 %1872  ;;  %vm1982_vm15 = vcmask 271520   ;;  %v2379_v43 = vld [vmem:[%s6382_s3 + $0x448] sm:$0xff] }
 0x377   : > { %1793 = vst.msk [vmem:[#allocation3 + $0x10] sm:$0xff] %vm1792_vm1, %v5248_v24  ;;  %v5789_v24 = vpop.permute.xlu0 %1660  ;;  %2587 = vmatprep.subr.mxu1 %v2399_v10  ;;  %vm1680_vm1 = vcmask 91136   ;;  %v2378_v10 = vld [vmem:[%s6382_s3 + $0x440] sm:$0xff] }
 0x378   : > { %1957 = vst.msk [vmem:[#allocation3 + $0x18] sm:$0xff] %vm1956_vm2, %v5424_v54  ;;  %2588 = vmatpush1.msra.mxu1 %v2398_v53  ;;  %v2395_v54 = vld [vmem:[%s6382_s3 + $0x4c8] sm:$0xff]  ;;  %vm1690_vm2 = vcmask 205920  }
 0x379   : > { %1803 = vst.msk [vmem:[#allocation3 + $0x10] sm:$0xff] %vm1802_vm3, %v5377_v48  ;;  %v2396_v48 = vld [vmem:[%s6382_s3 + $0x4d0] sm:$0xff]  ;;  %2589 = vmatprep.subr.mxu1 %v2397_v8  ;;  %vm1700_vm3 = vcmask 320720   ;;  %v2377_v8 = vld [vmem:[%s6382_s3 + $0x438] sm:$0xff] }
 0x37a   : > { %1813 = vst.msk [vmem:[#allocation3 + $0x10] sm:$0xff] %vm1812_vm5, %v5666_v40  ;;  %2590 = vmatpush1.msra.mxu1 %v2396_v48  ;;  %v2216_v26 = vpop.permute.xlu1 %2215  ;;  %v2392_v40 = vld [vmem:[%s6382_s3 + $0x4b0] sm:$0xff]  ;;  %vm1710_vm5 = vcmask 435520  }
 0x37b   : > { %1879 = vst.msk [vmem:[#allocation3 + $0x48] sm:$0x3] %vm1878_vm6, %v1873_v52  ;;  %v1827_v18 = vpop.permute.xlu0 %1826  ;;  %2591 = vmatprep.subr.mxu1 %v2395_v54  ;;  %v2376_v48 = vld [vmem:[%s6382_s3 + $0x430] sm:$0xff]  ;;  %v2375_v54 = vld [vmem:[%s6382_s3 + $0x428] sm:$0xff]  ;;  %vm1720_vm6 = vcmask 550320  }
 0x37c   : > { %1823 = vst.msk [vmem:[#allocation3 + $0x10] sm:$0xff] %vm1822_vm7, %v5731_v38  ;;  %2592 = vmatpush1.msra.mxu1 %v2394_v1  ;;  %vm1730_vm7 = vcmask 665120   ;;  %v2374_v1 = vld [vmem:[%s6382_s3 + $0x420] sm:$0xff] }
 0x37d   : > { %1833 = vst.msk [vmem:[#allocation3 + $0x10] sm:$0xff] %vm1832_vm8, %v1827_v18  ;;  %2593 = vmatprep.subr.mxu1 %v2393_v49  ;;  %vm2199_vm8 = vcmask 369920   ;;  %v2373_v18 = vld [vmem:[%s6382_s3 + $0x418] sm:$0xff]  ;;  %v2372_v49 = vld [vmem:[%s6382_s3 + $0x410] sm:$0xff] }
 0x37e   : > { %1843 = vst.msk [vmem:[#allocation3 + $0x10] sm:$0xff] %vm1842_vm9, %v5300_v5  ;;  %2594 = vmatpush1.msra.mxu1 %v2392_v40  ;;  %v2035_v5 = vpop.permute.xlu1 %2034  ;;  %vm1740_vm9 = vcmask 779920  }
 0x37f   : > { %v2233_v4 = vld [vmem:[#allocation3 + $0x18] sm:$0xff]  ;;  %1853 = vst.msk [vmem:[#allocation3 + $0x10] sm:$0xff] %vm1852_vm11, %v5506_v19  ;;  %v2214_v38 = vpop.permute.xlu0 %2213  ;;  %v2101_v19 = vsel %vm2100_vm12, %v5353_v45, %v5298_v61  ;;  %2595 = vmatprep.subr.mxu1 %v2391_v16  ;;  %v2386_v61 = vld [vmem:[%s6382_s3 + $0x480] sm:$0xff]  ;;  %vm1750_vm11 = vcmask 894720  }
 0x380   : > { %2572 = vmatprep.mubr.f32.mxu0 %v2233_v4  ;;  %1863 = vst.msk [vmem:[#allocation3 + $0x10] sm:$0xff] %vm1862_vm13, %v5600_v42  ;;  %v2222_v50 = vsel %vm2221_vm10, %v2214_v38, %v2216_v26  ;;  %2596 = vmatpush1.msra.mxu1 %v2390_v31  ;;  %v2387_v42 = vld [vmem:[%s6382_s3 + $0x488] sm:$0xff]  ;;  %vm6490_vm13 = vcmask 277504   ;;  %v2417_v16 = vld [vmem:[%s6382_s3 + $0x578] sm:$0xf]  ;;  %v2402_v38 = vld [vmem:[%s6382_s3 + $0x500] sm:$0xff] }
 0x381   : > { %2041 = vst.msk [vmem:[#allocation3 + $0x20] sm:$0xff] %vm2040_vm14, %v2035_v5  ;;  %2597 = vmatprep.subr.mxu1 %v2389_v17  ;;  %vm1760_vm14 = vcmask 1009520   ;;  %v2404_v5 = vld [vmem:[%s6382_s3 + $0x510] sm:$0xff] }
 0x382   : > { %2108 = vst.msk [vmem:[#allocation3 + $0x20] sm:$0xff] %vm2107_vm4, %v2101_v19  ;;  %2598 = vmatpush1.msra.mxu1 %v2388_v39  ;;  %v5837_v45 = vpop.permute.xlu1 %1818  ;;  %vm1784_vm4 = vcmask 189520  }
 0x383   : > { %2227 = vst.msk [vmem:[#allocation3 + $0x28] sm:$0xff] %vm2226_vm0, %v2222_v50  ;;  %v1977_v3 = vpop.permute.xlu0 %1976  ;;  %2599 = vmatprep.subr.mxu1 %v2387_v42  ;;  %vm1626_vm0 = vcmask 566720  }
 0x384   : > { %1983 = vst.msk [vmem:[#allocation3 + $0x50] sm:$0x3] %vm1982_vm15, %v1977_v3  ;;  %2600 = vmatpush1.msra.mxu1 %v2386_v61  ;;  %vm1772_vm15 = vcmask 1042400  }
 0x385   : > { %2601 = vmatprep.subr.mxu1 %v2385_v13 }
 0x386   : > { %2602 = vmatpush1.msra.mxu1 %v2384_v32  ;;  %v2189_v60 = vpop.permute.xlu1 %2188 }
 0x387   : > { %v2232_v35 = vld [vmem:[#allocation3 + $0x10] sm:$0xff]  ;;  %v5851_v34 = vpop.permute.xlu0 %1922  ;;  %2603 = vmatprep.subr.mxu1 %v2383_v33 }
 0x388   : > { %2573 = vmatmul.mubr.f32.vlgmr.msra.gmra.mxu0 %v2232_v35  ;;  %2604 = vmatpush1.msra.mxu1 %v2382_v9 }
 0x389   : > { %2605 = vmatprep.subr.mxu1 %v2381_v46  ;;  %v2234_v39 = vld [vmem:[#allocation3 + $0x20] sm:$0xff] }
 0x38a   : > { %2606 = vmatpush1.msra.mxu1 %v2380_v23  ;;  %v5865_v53 = vpop.permute.xlu1 %2026 }
 0x38b   : > { %v5867_v52 = vpop.permute.xlu0 %1670  ;;  %2607 = vmatprep.subr.mxu1 %v2379_v43 }
 0x38c   : > { %1681 = vst.msk [vmem:[#allocation3 + $0x38] sm:$0x3] %vm1680_vm1, %v5867_v52  ;;  %2608 = vmatpush1.msra.mxu1 %v2378_v10  ;;  %vm1794_vm1 = vcmask 304320  }
 0x38d   : > { %1691 = vst.msk [vmem:[#allocation3 + $0x38] sm:$0x3] %vm1690_vm2, %v5504_v12  ;;  %2609 = vmatprep.subr.mxu1 %v2377_v8  ;;  %vm1636_vm2 = vcmask 681520  }
 0x38e   : > { %1701 = vst.msk [vmem:[#allocation3 + $0x38] sm:$0x3] %vm1700_vm3, %v5530_v51  ;;  %2610 = vmatpush1.msra.mxu1 %v2376_v48  ;;  %v1725_v26 = vpop.permute.xlu1 %1724  ;;  %vm1804_vm3 = vcmask 419120  }
 0x38f   : > { %1711 = vst.msk [vmem:[#allocation3 + $0x38] sm:$0x3] %vm1710_vm5, %v5618_v36  ;;  %v2191_v12 = vpop.permute.xlu0 %2190  ;;  %2611 = vmatprep.subr.mxu1 %v2375_v54  ;;  %v2371_v36 = vld [vmem:[%s6382_s3 + $0x408] sm:$0xff]  ;;  %vm1646_vm5 = vcmask 796320  }
 0x390   : > { %1721 = vst.msk [vmem:[#allocation3 + $0x38] sm:$0x3] %vm1720_vm6, %v5736_v41  ;;  %v2194_v51 = vsel %vm6490_vm13, %v2189_v60, %v2191_v12  ;;  %2612 = vmatpush1.msra.mxu1 %v2374_v1  ;;  %v2370_v41 = vld [vmem:[%s6382_s3 + $0x400] sm:$0xff]  ;;  %vm1656_vm6 = vcmask 911120   ;;  %vm1824_vm13 = vcmask 648720  }
 0x391   : > { %1731 = vst.msk [vmem:[#allocation3 + $0x38] sm:$0x3] %vm1730_vm7, %v1725_v26  ;;  %2613 = vmatprep.subr.mxu1 %v2373_v18  ;;  %vm1814_vm7 = vcmask 533920  }
 0x392   : > { %2200 = vst.msk [vmem:[#allocation3 + $0x58] sm:$0x3] %vm2199_vm8, %v2194_v51  ;;  %2614 = vmatpush1.msra.mxu1 %v2372_v49  ;;  %v1779_v40 = vpop.permute.xlu1 %1778  ;;  %vm1666_vm8 = vcmask 1025920   ;;  %v2893_v51 = vld [vmem:[%s6384_s5 + $0x178] sm:$0xff]  ;;  %v2892_v49 = vld [vmem:[%s6384_s5 + $0x170] sm:$0xff] }
 0x393   : > { %1741 = vst.msk [vmem:[#allocation3 + $0x38] sm:$0x3] %vm1740_vm9, %v5635_v21  ;;  %v1621_v4 = vpop.permute.xlu0 %1620  ;;  %2615 = vmatprep.subr.mxu1 %v2371_v36  ;;  %v2415_v21 = vld [vmem:[%s6382_s3 + $0x568] sm:$0xff]  ;;  %vm1992_vm9 = vcmask 386320  }
 0x394   : > { %1751 = vst.msk [vmem:[#allocation3 + $0x38] sm:$0x3] %vm1750_vm11, %v5616_v2  ;;  %v2416_v2 = vld [vmem:[%s6382_s3 + $0x570] sm:$0xf]  ;;  %2616 = vmatpush1.msra.mxu1 %v2370_v41  ;;  %vm1888_vm11 = vcmask 287920   ;;  %v2891_v36 = vld [vmem:[%s6384_s5 + $0x168] sm:$0xff] }
 0x395   : > { %1761 = vst.msk [vmem:[#allocation3 + $0x38] sm:$0x3] %vm1760_vm14, %v5673_v7  ;;  %vm1678_vm14 = vcmask 1042416   ;;  %v2890_v41 = vld [vmem:[%s6384_s5 + $0x160] sm:$0xff] }
 0x396   : > { %1785 = vst.msk [vmem:[#allocation3 + $0x40] sm:$0x3] %vm1784_vm4, %v1779_v40  ;;  %vm6491_vm4 = vcmask 1043456   ;;  %v1987_v7 = vpop.permute.xlu1 %1986  ;;  %v2877_v40 = vld [vmem:[%s6384_s5 + $0xf8] sm:$0xff] }
 0x397   : > { %1627 = vst.msk [vmem:[#allocation3 + $0x30] sm:$0x3] %vm1626_vm0, %v1621_v4  ;;  %3271 = vmatprep.subr.msk.mxu1 %vm6491_vm4, %v2417_v16  ;;  %vm2002_vm0 = vcmask 501120   ;;  %v2861_v4 = vld [vmem:[%s6384_s5 + $0x78] sm:$0xff]  ;;  %3332 = vmatprep.subr.mxu0 %v2877_v40  ;;  %v2902_v40 = vld [vmem:[%s6384_s5 + $0x1c0] sm:$0xff] }
 0x398   : > { %1773 = vst.msk [vmem:[#allocation3 + $0x38] sm:$0x3] %vm1772_vm15, %v5770_v15  ;;  %vm1898_vm15 = vcmask 402720   ;;  %v2406_v15 = vld [vmem:[%s6382_s3 + $0x520] sm:$0xff]  ;;  %v2889_v16 = vld [vmem:[%s6384_s5 + $0x158] sm:$0xff]  ;;  %3333 = vmatpush3.msra.mxu0 %v2861_v4 }
 0x399   : > { %1795 = vst.msk [vmem:[#allocation3 + $0x40] sm:$0x3] %vm1794_vm1, %v5694_v62  ;;  %vm6492_vm1 = vmmov %vm6491_vm4  ;;  %v2411_v62 = vld [vmem:[%s6382_s3 + $0x548] sm:$0xff]  ;;  %vm1854_vm4 = vcmask 993120  }
 0x39a   : > { %1637 = vst.msk [vmem:[#allocation3 + $0x30] sm:$0x3] %vm1636_vm2, %v5578_v30  ;;  %v2414_v30 = vld [vmem:[%s6382_s3 + $0x560] sm:$0xff]  ;;  %3272 = vmatpush2.msk.msra.mxu1 %vm6492_vm1, %v2416_v2  ;;  %vm2012_vm2 = vcmask 615920   ;;  %vm2228_vm1 = vcmask 484720   ;;  %v2876_v2 = vld [vmem:[%s6384_s5 + $0xf0] sm:$0xff] }
 0x39b   : > { %1805 = vst.msk [vmem:[#allocation3 + $0x40] sm:$0x3] %vm1804_vm3, %v5686_v47  ;;  %vm1908_vm3 = vcmask 517520   ;;  %v1883_v47 = vpop.permute.xlu0 %1882  ;;  %2635 = vmatprep.subr.mxu1 %v2415_v21  ;;  %v2860_v21 = vld [vmem:[%s6384_s5 + $0x70] sm:$0xff]  ;;  %3334 = vmatprep.subr.mxu0 %v2876_v2 }
 0x39c   : > { %1647 = vst.msk [vmem:[#allocation3 + $0x30] sm:$0x3] %vm1646_vm5, %v5652_v14  ;;  %v2413_v14 = vld [vmem:[%s6382_s3 + $0x558] sm:$0xff]  ;;  %vm1918_vm5 = vcmask 632320   ;;  %2636 = vmatpush2.msra.mxu1 %v2414_v30  ;;  %v2875_v30 = vld [vmem:[%s6384_s5 + $0xe8] sm:$0xff]  ;;  %3335 = vmatpush3.msra.mxu0 %v2860_v21 }
 0x39d   : > { %1657 = vst.msk [vmem:[#allocation3 + $0x30] sm:$0x3] %vm1656_vm6, %v5650_v56  ;;  %v2412_v56 = vld [vmem:[%s6382_s3 + $0x550] sm:$0xff]  ;;  %vm2022_vm6 = vcmask 730720   ;;  %2637 = vmatprep.subr.mxu1 %v2413_v14  ;;  %v2874_v14 = vld [vmem:[%s6384_s5 + $0xe0] sm:$0xff]  ;;  %3336 = vmatprep.subr.mxu0 %v2875_v30  ;;  %v2869_v30 = vld [vmem:[%s6384_s5 + $0xb8] sm:$0xff] }
 0x39e   : > { %1815 = vst.msk [vmem:[#allocation3 + $0x40] sm:$0x3] %vm1814_vm7, %v5714_v29  ;;  %vm1928_vm7 = vcmask 747120   ;;  %2638 = vmatpush2.msra.mxu1 %v2412_v56  ;;  %v1933_v29 = vpop.permute.xlu1 %1932  ;;  %v2887_v56 = vld [vmem:[%s6384_s5 + $0x148] sm:$0xff] }
 0x39f   : > { %1667 = vst.msk [vmem:[#allocation3 + $0x30] sm:$0x3] %vm1666_vm8, %v5789_v24  ;;  %vm1834_vm8 = vcmask 763520   ;;  %2639 = vmatprep.subr.mxu1 %v2411_v62  ;;  %v2858_v62 = vld [vmem:[%s6384_s5 + $0x60] sm:$0xff] }
 0x3a0   : > { %1993 = vst.msk [vmem:[#allocation3 + $0x50] sm:$0x3] %vm1992_vm9, %v1987_v7  ;;  %vm2032_vm9 = vcmask 845520   ;;  %v2888_v7 = vld [vmem:[%s6384_s5 + $0x150] sm:$0xff] }
 0x3a1   : > { %1889 = vst.msk [vmem:[#allocation3 + $0x48] sm:$0x3] %vm1888_vm11, %v1883_v47  ;;  %vm1938_vm11 = vcmask 861920   ;;  %v2859_v47 = vld [vmem:[%s6384_s5 + $0x68] sm:$0xff] }
 0x3a2   : > { %1825 = vst.msk [vmem:[#allocation3 + $0x40] sm:$0x3] %vm1824_vm13, %v5837_v45  ;;  %vm1844_vm13 = vcmask 878320   ;;  %v6493_v45 = vmov 0.0   ;;  %3337 = vmatpush3.msra.mxu0 %v2859_v47 }
 0x3a3   : > { %1679 = vst.msk [vmem:[#allocation3 + $0x30] sm:$0x3] %vm1678_vm14, %v5867_v52  ;;  %vm1948_vm14 = vcmask 976720   ;;  %3338 = vmatprep.subr.mxu0 %v2874_v14  ;;  %v6496_v14 = vlaneseq }
 0x3a4   : > { %2003 = vst.msk [vmem:[#allocation3 + $0x50] sm:$0x3] %vm2002_vm0, %v5718_v63  ;;  %v1829_v63 = vpop.permute.xlu0 %1828  ;;  %vm1960_vm0 = vcmask 1042368   ;;  %3339 = vmatpush3.msra.mxu0 %v2858_v62  ;;  %v2901_v62 = vld [vmem:[%s6384_s5 + $0x1b8] sm:$0xff] }
 0x3a5   : > { %1899 = vst.msk [vmem:[#allocation3 + $0x48] sm:$0x3] %vm1898_vm15, %v5679_v37  ;;  %v2410_v37 = vld [vmem:[%s6382_s3 + $0x540] sm:$0xff]  ;;  %vm1866_vm15 = vcmask 1042384  }
 0x3a6   : > { %2013 = vst.msk [vmem:[#allocation3 + $0x50] sm:$0x3] %vm2012_vm2, %v5725_v6  ;;  %v2409_v6 = vld [vmem:[%s6382_s3 + $0x538] sm:$0xff]  ;;  %2640 = vmatpush2.msra.mxu1 %v2410_v37  ;;  %vm2418_vm2 = vcmask 490496  }
 0x3a7   : > { %1909 = vst.msk [vmem:[#allocation3 + $0x48] sm:$0x3] %vm1908_vm3, %v5711_v0  ;;  %v2237_v0 = vld [vmem:[#allocation3 + $0x38] sm:$0x3]  ;;  %2641 = vmatprep.subr.mxu1 %v2409_v6  ;;  %vm2042_vm3 = vcmask 960320   ;;  %v2872_v6 = vld [vmem:[%s6384_s5 + $0xd0] sm:$0xff] }
 0x3a8   : > { %1919 = vst.msk [vmem:[#allocation3 + $0x48] sm:$0x3] %vm1918_vm5, %v5700_v44  ;;  %v2408_v44 = vld [vmem:[%s6382_s3 + $0x530] sm:$0xff]  ;;  %2501 = vmatprep.mubr.f32.mxu1 %v2237_v0  ;;  %v2218_v24 = vpop.permute.xlu0 %2217  ;;  %vm2111_vm5 = vcmask 1042352   ;;  %v2873_v37 = vld [vmem:[%s6384_s5 + $0xd8] sm:$0xff] }
 0x3a9   : > { %2023 = vst.msk [vmem:[#allocation3 + $0x50] sm:$0x3] %vm2022_vm6, %v5756_v22  ;;  %v2407_v22 = vld [vmem:[%s6382_s3 + $0x528] sm:$0xff]  ;;  %2642 = vmatpush2.msra.mxu1 %v2408_v44  ;;  %v2885_v0 = vld [vmem:[%s6384_s5 + $0x138] sm:$0xff]  ;;  %3340 = vmatprep.subr.mxu0 %v2873_v37  ;;  %v2856_v44 = vld [vmem:[%s6384_s5 + $0x50] sm:$0xff]  ;;  %vm6178_vm6 = vcmp.lt.s32.totalorder %v6496_v14, 100 }
 0x3aa   : > { %1929 = vst.msk [vmem:[#allocation3 + $0x48] sm:$0x3] %vm1928_vm7, %v5851_v34  ;;  %2643 = vmatprep.subr.mxu1 %v2407_v22  ;;  %v2236_v31 = vld [vmem:[#allocation3 + $0x30] sm:$0x3]  ;;  %v2871_v22 = vld [vmem:[%s6384_s5 + $0xc8] sm:$0xff]  ;;  %vm6265_vm7 = vcmp.ge.s32.totalorder %v6496_v14, 100 }
 0x3ab   : > { %1835 = vst.msk [vmem:[#allocation3 + $0x40] sm:$0x3] %vm1834_vm8, %v1829_v63  ;;  %2644 = vmatpush2.msra.mxu1 %v2406_v15  ;;  %v2857_v63 = vld [vmem:[%s6384_s5 + $0x58] sm:$0xff]  ;;  %v2884_v15 = vld [vmem:[%s6384_s5 + $0x130] sm:$0xff]  ;;  %vm6270_vm8 = vcmp.lt.s32.totalorder %v6496_v14, 200 }
 0x3ac   : > { %2033 = vst.msk [vmem:[#allocation3 + $0x50] sm:$0x3] %vm2032_vm9, %v5865_v53  ;;  %2502 = vmatmul.mubr.f32.gmra.mxu1 %v2236_v31  ;;  %v2037_v19 = vpop.permute.xlu0 %2036  ;;  %3341 = vmatpush3.msra.mxu0 %v2857_v63  ;;  %v2879_v31 = vld [vmem:[%s6384_s5 + $0x108] sm:$0xff]  ;;  %v2868_v37 = vld [vmem:[%s6384_s5 + $0xb0] sm:$0xff]  ;;  %vm6275_vm9 = vcmp.ge.s32.totalorder %v6496_v14, 72 }
 0x3ad   : > { %1939 = vst.msk [vmem:[#allocation3 + $0x48] sm:$0x3] %vm1938_vm11, %v1933_v29  ;;  %v2886_v29 = vld [vmem:[%s6384_s5 + $0x140] sm:$0xff]  ;;  %3342 = vmatprep.subr.mxu0 %v2872_v6  ;;  %vm6280_vm11 = vcmp.lt.s32.totalorder %v6496_v14, 172 }
 0x3ae   : > { %1845 = vst.msk [vmem:[#allocation3 + $0x40] sm:$0x3] %vm1844_vm13, %v5723_v25  ;;  %v2220_v25 = vpop.permute.xlu1 %2219  ;;  %3343 = vmatpush3.msra.mxu0 %v2856_v44  ;;  %vm2805_vm13 = vcmask 588800  }
 0x3af   : > { %1949 = vst.msk [vmem:[#allocation3 + $0x48] sm:$0x3] %vm1948_vm14, %v5716_v11  ;;  %v2405_v11 = vld [vmem:[%s6382_s3 + $0x518] sm:$0xff]  ;;  %3344 = vmatprep.subr.mxu0 %v2871_v22  ;;  %vm2787_vm14 = vcmask 818176  }
 0x3b0   : > { %1855 = vst.msk [vmem:[#allocation3 + $0x40] sm:$0x3] %vm1854_vm4, %v5721_v58  ;;  %v2223_v58 = vsel %vm2221_vm10, %v2218_v24, %v2220_v25  ;;  %2645 = vmatprep.subr.mxu1 %v2405_v11  ;;  %v2883_v25 = vld [vmem:[%s6384_s5 + $0x128] sm:$0xff]  ;;  %v2882_v24 = vld [vmem:[%s6384_s5 + $0x120] sm:$0xff]  ;;  %v2881_v11 = vld [vmem:[%s6384_s5 + $0x118] sm:$0xff]  ;;  %vm2674_vm10 = vcmask 228352  }
 0x3b1   : > { %1961 = vst.msk [vmem:[#allocation3 + $0x48] sm:$0x3] %vm1960_vm0, %v5702_v57  ;;  %v2235_v57 = vld [vmem:[#allocation3 + $0x28] sm:$0xff]  ;;  %2646 = vmatpush2.msra.mxu1 %v2404_v5  ;;  %v2878_v5 = vld [vmem:[%s6384_s5 + $0x100] sm:$0xff]  ;;  %vm2792_vm4 = vmand %vm6265_vm7, %vm6270_vm8  ;;  %vm6511_vm7 = vcmask 949248   ;;  %vm3597_vm8 = vmmov 0  }
 0x3b2   : > { %1867 = vst.msk [vmem:[#allocation3 + $0x40] sm:$0x3] %vm1866_vm15, %v5664_v20  ;;  %v2403_v20 = vld [vmem:[%s6382_s3 + $0x508] sm:$0xff]  ;;  %3273 = vmatprep.mubr.msk.f32.mxu1 %vm2418_vm2, %v2235_v57  ;;  %v2097_v17 = vpop.permute.xlu1 %2096  ;;  %vm2810_vm0 = vmand %vm6275_vm9, %vm6280_vm11  ;;  %vm6293_vm15 = vcmp.ge.s32.totalorder %v6496_v14, 44  ;;  %vm3084_vm9 = vcmask 408576   ;;  %vm3162_vm11 = vcmask 344064  }
 0x3b3   : > { %2229 = vst.msk [vmem:[#allocation3 + $0x58] sm:$0x3] %vm2228_vm1, %v2223_v58  ;;  %2647 = vmatprep.subr.mxu1 %v2403_v20  ;;  %v2102_v50 = vsel %vm2100_vm12, %v2097_v17, %v5709_v55  ;;  %v2880_v58 = vld [vmem:[%s6384_s5 + $0x110] sm:$0xff]  ;;  %v2907_v57 = vld [vmem:[%s6384_s5 + $0x1e8] sm:$0xff]  ;;  %vm6495_vm12 = vcmask 1043456   ;;  %v2905_v17 = vld [vmem:[%s6384_s5 + $0x1d8] sm:$0xff] }
 0x3b4   : > { %2043 = vst.msk [vmem:[#allocation3 + $0x50] sm:$0x3] %vm2042_vm3, %v2037_v19  ;;  %2648 = vmatpush2.msra.mxu1 %v2402_v38  ;;  %v2908_v20 = vld [vmem:[%s6384_s5 + $0x1f0] sm:$0xf]  ;;  %v2906_v38 = vld [vmem:[%s6384_s5 + $0x1e0] sm:$0xff]  ;;  %vm2827_vm1 = vcmp.lt.s32.totalorder %v6496_v14, 144 }
 0x3b5   : > { %2112 = vst.msk [vmem:[#allocation3 + $0x50] sm:$0x3] %vm2111_vm5, %v2102_v50  ;;  %2650 = vmatmul.mubr.f32.vlgmr.msra.gmra.mxu1 %v2234_v39  ;;  %3005 = vmatprep.subr.mxu1 %v6493_v45  ;;  %v2904_v19 = vld [vmem:[%s6384_s5 + $0x1d0] sm:$0xff]  ;;  %v3280_v50 = vld [vmem:[%s6383_s4] ss:$0 sm:$0xff]  ;;  %vm2842_vm3 = vcmp.lt.s32.totalorder %v6496_v14, 116 }
 0x3b6   : > { %3006 = vmatpush1.msra.mxu1 %v2893_v51  ;;  %vm2823_vm5 = vcmask 359424  }
 0x3b7   : > { %3007 = vmatprep.subr.mxu1 %v6493_v45 }
 0x3b8   : > { %v2239_v42 = vld [vmem:[#allocation3 + $0x48] sm:$0x3]  ;;  %3008 = vmatpush1.msra.mxu1 %v2892_v49 }
 0x3b9   : > { %v2238_v61 = vld [vmem:[#allocation3 + $0x40] sm:$0x3]  ;;  %2578 = vmatprep.mubr.f32.mxu0 %v2239_v42  ;;  %3009 = vmatprep.subr.mxu1 %v6493_v45 }
 0x3ba   : > { %2579 = vmatmul.mubr.f32.gmra.mxu0 %v2238_v61  ;;  %v2241_v3 = vld [vmem:[#allocation3 + $0x58] sm:$0x3]  ;;  %3010 = vmatpush1.msra.mxu1 %v2891_v36  ;;  %v2870_v36 = vld [vmem:[%s6384_s5 + $0xc0] sm:$0xff] }
 0x3bb   : > { %3274 = vmatprep.mubr.msk.f32.mxu1 %vm2418_vm2, %v2241_v3  ;;  %3011 = vmatprep.subr.mxu1 %v6493_v45  ;;  %v2745_v3 = vrot.slane %v3280_v50, %v4710_v28  ;;  %vm2841_vm2 = vcmp.ge.s32.totalorder %v6496_v14, 16 }
 0x3bc   : > { %v2240_v13 = vld [vmem:[#allocation3 + $0x50] sm:$0x3]  ;;  %3012 = vmatpush1.msra.mxu1 %v2890_v41  ;;  %v2854_v41 = vld [vmem:[%s6384_s5 + $0x40] sm:$0xff] }
 0x3bd   : > { %2656 = vmatmul.mubr.f32.gmra.mxu1 %v2240_v13  ;;  %3013 = vmatprep.subr.mxu1 %v6493_v45 }
 0x3be   : > { %3014 = vmatpush1.msra.mxu1 %v2889_v16 }
 0x3bf   : > { %3015 = vmatprep.subr.mxu1 %v6493_v45 }
 0x3c0   : > { %3016 = vmatpush1.msra.mxu1 %v2888_v7 }
 0x3c1   : > { %3017 = vmatprep.subr.mxu1 %v6493_v45 }
 0x3c2   : > { %3018 = vmatpush1.msra.mxu1 %v2887_v56 }
 0x3c3   : > { %3019 = vmatprep.subr.mxu1 %v6493_v45 }
 0x3c4   : > { %3020 = vmatpush1.msra.mxu1 %v2886_v29 }
 0x3c5   : > { %3021 = vmatprep.subr.mxu1 %v6493_v45 }
 0x3c6   : > { %3022 = vmatpush1.msra.mxu1 %v2885_v0 }
 0x3c7   : > { %3023 = vmatprep.subr.mxu1 %v6493_v45 }
 0x3c8   : > { %3024 = vmatpush1.msra.mxu1 %v2884_v15  ;;  %v2852_v15 = vld [vmem:[%s6384_s5 + $0x30] sm:$0xff] }
 0x3c9   : > { %3025 = vmatprep.subr.mxu1 %v6493_v45 }
 0x3ca   : > { %3026 = vmatpush1.msra.mxu1 %v2883_v25  ;;  %v2900_v25 = vld [vmem:[%s6384_s5 + $0x1b0] sm:$0xff] }
 0x3cb   : > { %3027 = vmatprep.subr.mxu1 %v6493_v45 }
 0x3cc   : > { %3028 = vmatpush1.msra.mxu1 %v2882_v24 }
 0x3cd   : > { %3029 = vmatprep.subr.mxu1 %v6493_v45 }
 0x3ce   : > { %3030 = vmatpush1.msra.mxu1 %v2881_v11 }
 0x3cf   : > { %3031 = vmatprep.subr.mxu1 %v6493_v45 }
 0x3d0   : > { %3032 = vmatpush1.msra.mxu1 %v2880_v58 }
 0x3d1   : > { %3033 = vmatprep.subr.mxu1 %v6493_v45 }
 0x3d2   : > { %3034 = vmatpush1.msra.mxu1 %v2879_v31 }
 0x3d3   : > { %3035 = vmatprep.subr.mxu1 %v6493_v45 }
 0x3d4   : > { %3036 = vmatpush1.msra.mxu1 %v2878_v5  ;;  %v2851_v5 = vld [vmem:[%s6384_s5 + $0x28] sm:$0xff] }
 0x3d5   : > { %3039 = vmatprep.subr.mxu1 %v6493_v45 }
 0x3d6   : > { %3281 = vmatpush2.msk.msra.mxu1 %vm6495_vm12, %v2908_v20  ;;  %vm2828_vm12 = vmand %vm6293_vm15, %vm2827_vm1 }
 0x3d7   : > { %3041 = vmatprep.subr.mxu1 %v6493_v45 }
 0x3d8   : > { %3042 = vmatpush2.msra.mxu1 %v2907_v57 }
 0x3d9   : > { %3043 = vmatprep.subr.mxu1 %v6493_v45 }
 0x3da   : > { %3044 = vmatpush2.msra.mxu1 %v2906_v38 }
 0x3db   : > { %3045 = vmatprep.subr.mxu1 %v6493_v45 }
 0x3dc   : > { %3046 = vmatpush2.msra.mxu1 %v2905_v17 }
 0x3dd   : > { %3047 = vmatprep.subr.mxu1 %v6493_v45 }
 0x3de   : > { %3048 = vmatpush2.msra.mxu1 %v2904_v19  ;;  %v2899_v19 = vld [vmem:[%s6384_s5 + $0x1a8] sm:$0xff] }
 0x3df   : > { %3049 = vmatprep.subr.mxu1 %v6493_v45 }
 0x435   : > { %v2497_v32 = vpop.f32.mrf.mxu1 }
 0x437   : > { %v2499_v33 = vpop.f32.mrf.mxu1 }
 0x448   : > { %v2574_v35 = vpop.f32.mrf.mxu0 }
 0x449   : > { %v2575_v34 = vadd.f32 %v2574_v35, %v2497_v32  ;;  %v3592_v32 = vmov 1966171168  }
 0x44a   : > { %v2576_v9 = vpop.f32.mrf.mxu0 }
 0x44b   : > { %v2577_v23 = vadd.f32 %v2576_v9, %v2499_v33  ;;  %v2778_v33 = vunpack.c.l.s4 %v3592_v32  ;;  %v2753_v9 = vcombine.high %v2745_v3, %v2745_v3 }
 0x44d   : > { %v2755_v49 = vrot.slane %v2753_v9, 1 }
 0x46c   : > { %v2503_v55 = vpop.f32.mrf.mxu1 }
 0x46e   : > { %v2505_v60 = vpop.f32.mrf.mxu1 }
 0x475   : > { %v2651_v46 = vpop.f32.mrf.mxu1 }
 0x476   : > { %v6013_v43 = vadd.f32 %v2651_v46, %v2575_v34 }
 0x477   : > { %v2653_v10 = vpop.f32.mrf.mxu1 }
 0x478   : > { %v2654_v52 = vadd.f32 %v2653_v10, %v2577_v23  ;;  %2666 = vrot.lane.b32.xlu0 %v6013_v43, %s6494_s18  ;;  %v2754_v10 = vrot.slane %v2745_v3, 1 }
 0x47a   : > { %v2580_v53 = vpop.f32.mrf.mxu0  ;;  %2668 = vrot.lane.b32.xlu1 %v2654_v52, %s6494_s18 }
 0x47b   : > { %v2581_v48 = vadd.f32 %v2580_v53, %v2503_v55  ;;  %v2779_v53 = vunpack.c.0.s8 %v2778_v33  ;;  %v2849_v33 = vld [vmem:[%s6384_s5 + $0x18] sm:$0xff] }
 0x47c   : > { %v2582_v8 = vpop.f32.mrf.mxu0 }
 0x47d   : > { %v2657_v54 = vpop.f32.mrf.mxu1  ;;  %v2583_v1 = vadd.f32 %v2582_v8, %v2505_v60  ;;  %v2782_v7 = vsub.s32 %v2779_v53, %v4697_v59  ;;  %v2862_v53 = vld [vmem:[%s6384_s5 + $0x80] sm:$0xff] }
 0x47e   : > { %v6018_v26 = vadd.f32 %v2657_v54, %v2581_v48 }
 0x47f   : > { %v2659_v12 = vpop.f32.mrf.mxu1 }
 0x480   : > { %v2660_v18 = vadd.f32 %v2659_v12, %v2583_v1  ;;  %2670 = vrot.lane.b32.xlu0 %v6018_v26, %s6494_s18  ;;  %v2903_v12 = vld [vmem:[%s6384_s5 + $0x1c8] sm:$0xff] }
 0x481   : > { %3050 = vmatpush2.msra.mxu1 %v2903_v12 }
 0x482   : > { %2672 = vrot.lane.b32.xlu1 %v2660_v18, %s6494_s18  ;;  %v2738_v18 = vcombine.high %v3280_v50, %v3280_v50  ;;  %3051 = vmatprep.subr.mxu1 %v6493_v45  ;;  %v2866_v50 = vld [vmem:[%s6384_s5 + $0xa0] sm:$0xff]  ;;  %s3285_s18 = sshll.u32 %s3670_s13, 4 }
 0x483   : > { %3052 = vmatpush2.msra.mxu1 %v2902_v40  ;;  %s3187_s23 = scalar_lea.hbm %s6388_s9, %s3285_s18 }
 0x484   : > { %v2752_v44 = vrot.slane %v2738_v18, %v4710_v28  ;;  %3053 = vmatprep.subr.mxu1 %v6493_v45 }
 0x485   : > { %3054 = vmatpush2.msra.mxu1 %v2901_v62  ;;  %v6510_v62 = vld [vmem:[#allocation12_spill] sm:$0xff] }
 0x486   : > { %3055 = vmatprep.subr.mxu1 %v6493_v45 }
 0x487   : > { %3056 = vmatpush2.msra.mxu1 %v2900_v25  ;;  %v2909_v25 = vld [vmem:[%s6385_s6] sm:$0x1] }
 0x488   : > { %3057 = vmatprep.subr.mxu1 %v6493_v45 }
 0x489   : > { %3058 = vmatpush2.msra.mxu1 %v2899_v19 }
 0x48a   : > { %3059 = vmatprep.subr.mxu1 %v6493_v45 }
 0x4ea   : > { %v2667_v39 = vpop.permute.xlu0 %2666 }
 0x4ec   : > { %v2669_v42 = vpop.permute.xlu1 %2668 }
 0x4ed   : > { %v2675_v61 = vsel %vm2674_vm10, %v2667_v39, %v2669_v42  ;;  %v2850_v39 = vld [vmem:[%s6384_s5 + $0x20] sm:$0xff] }
 0x4ee   : > { %v2679_v13 = vmax.f32 %v6013_v43, %v2675_v61  ;;  %v2855_v43 = vld [vmem:[%s6384_s5 + $0x48] sm:$0xff]  ;;  %v2898_v61 = vld [vmem:[%s6384_s5 + $0x1a0] sm:$0xff] }
 0x4ef   : > { %3345 = vmatpush3.msra.mxu0 %v2855_v43  ;;  %3060 = vmatpush2.msra.mxu1 %v2898_v61 }
 0x4f0   : > { %v2683_v35 = vcombine.high %v2679_v13, %v2679_v13  ;;  %v2690_v55 = vrot.slane %v2679_v13, %v4710_v28  ;;  %3346 = vmatprep.subr.mxu0 %v2870_v36  ;;  %3061 = vmatprep.subr.mxu1 %v6493_v45 }
 0x4f1   : > { %3347 = vmatpush3.msra.mxu0 %v2854_v41 }
 0x4f2   : > { %v2697_v60 = vrot.slane %v2683_v35, %v4710_v28  ;;  %v2698_v34 = vcombine.high %v2690_v55, %v2690_v55  ;;  %v3275_v46 = vrot.slane %v2690_v55, 9  ;;  %v2671_v1 = vpop.permute.xlu0 %2670  ;;  %3348 = vmatprep.subr.mxu0 %v2869_v30  ;;  %v2897_v35 = vld [vmem:[%s6384_s5 + $0x198] sm:$0xff]  ;;  %v2925_v30 = vsub.s32 3, %v4697_v59 }
 0x4f3   : > { %3062 = vmatpush2.msra.mxu1 %v2897_v35 }
 0x4f4   : > { %v2673_v23 = vpop.permute.xlu1 %2672  ;;  %v2699_v52 = vcombine.high %v2697_v60, %v2697_v60  ;;  %v3276_v8 = vrot.slane %v2698_v34, 9  ;;  %v3277_v48 = vrot.slane %v2697_v60, 9  ;;  %v2727_v54 = vmax.f32 %v2690_v55, %v3275_v46  ;;  %v2864_v55 = vld [vmem:[%s6384_s5 + $0x90] sm:$0xff]  ;;  %v2863_v46 = vld [vmem:[%s6384_s5 + $0x88] sm:$0xff]  ;;  %3063 = vmatprep.subr.mxu1 %v6493_v45 }
 0x4f5   : > { %v2676_v51 = vsel %vm2674_vm10, %v2671_v1, %v2673_v23  ;;  %v2847_v23 = vld [vmem:[%s6384_s5 + $0x8] sm:$0xff]  ;;  %vm2843_vm10 = vmand %vm2841_vm2, %vm2842_vm3 }
 0x4f6   : > { %v3278_v4 = vrot.slane %v2699_v52, 9  ;;  %v2728_v16 = vmax.f32 %v2698_v34, %v3276_v8  ;;  %v2729_v2 = vmax.f32 %v2697_v60, %v3277_v48  ;;  %v2680_v21 = vmax.f32 %v6018_v26, %v2676_v51  ;;  %v2853_v26 = vld [vmem:[%s6384_s5 + $0x38] sm:$0xff]  ;;  %v2848_v60 = vld [vmem:[%s6384_s5 + $0x10] sm:$0xff]  ;;  %v2894_v8 = vld [vmem:[%s6384_s5 + $0x180] sm:$0xff] }
 0x4f7   : > { %v2761_v47 = vadd.f32 %v2745_v3, %v2727_v54  ;;  %3349 = vmatpush3.msra.mxu0 %v2853_v26  ;;  %v2865_v3 = vld [vmem:[%s6384_s5 + $0x98] sm:$0xff]  ;;  %v2896_v34 = vld [vmem:[%s6384_s5 + $0x190] sm:$0xff] }
 0x4f8   : > { %v2706_v29 = vrot.slane %v2680_v21, %v4710_v28  ;;  %v2762_v63 = vadd.f32 %v2754_v10, %v2728_v16  ;;  %v2763_v6 = vadd.f32 %v2753_v9, %v2729_v2  ;;  %v2730_v0 = vmax.f32 %v2699_v52, %v3278_v4  ;;  %3350 = vmatprep.subr.mxu0 %v2868_v37  ;;  %v2867_v28 = vld [vmem:[%s6384_s5 + $0xa8] sm:$0xff]  ;;  %v2846_v52 = vld [vmem:[%s6384_s5] sm:$0xff] }
 0x4f9   : > { %v2766_v22 = vmax.f32 %v2761_v47, 0.0  ;;  %3351 = vmatpush3.msra.mxu0 %v2852_v15  ;;  %v2895_v10 = vld [vmem:[%s6384_s5 + $0x188] sm:$0xff]  ;;  %3064 = vmatpush2.msra.mxu1 %v2896_v34  ;;  %v6509_v47 = vsub.s32 1, %v4697_v59 }
 0x4fa   : > { %v3279_v24 = vrot.slane %v2706_v29, 9  ;;  %v2767_v11 = vmax.f32 %v2762_v63, 0.0  ;;  %v2768_v58 = vmax.f32 %v2763_v6, 0.0  ;;  %v2764_v31 = vadd.f32 %v2755_v49, %v2730_v0  ;;  %3352 = vmatprep.subr.mxu0 %v2867_v28  ;;  %3065 = vmatprep.subr.mxu1 %v6493_v45  ;;  %v3081_v59 = vld [vmem:[%s6386_s7 + $0x28] sm:$0xff]  ;;  %v3079_v63 = vld [vmem:[%s6386_s7 + $0x18] sm:$0xff]  ;;  %v3078_v6 = vld [vmem:[%s6386_s7 + $0x10] sm:$0xff] }
 0x4fb   : > { %2775 = vst.msk [vmem:[#allocation4] sm:$0x1] %vm6178_vm6, %v2766_v22  ;;  %3353 = vmatpush3.msra.mxu0 %v2851_v5  ;;  %3066 = vmatpush2.msra.mxu1 %v2895_v10  ;;  %vm3088_vm6 = vcmask 1041408   ;;  %v3077_v0 = vld [vmem:[%s6386_s7 + $0x8] sm:$0xff] }
 0x4fc   : > { %v2731_v20 = vmax.f32 %v2706_v29, %v3279_v24  ;;  %v2783_v57 = vrot.slane %v2767_v11, %v2782_v7  ;;  %v2801_v38 = vrot.slane %v2768_v58, %v2782_v7  ;;  %v2769_v17 = vmax.f32 %v2764_v31, 0.0  ;;  %3354 = vmatprep.subr.mxu0 %v2866_v50  ;;  %3067 = vmatprep.subr.mxu1 %v6493_v45  ;;  %v3082_v29 = vld [vmem:[%s6386_s7 + $0x30] sm:$0x3] }
 0x4fd   : > { %3355 = vmatpush3.msra.mxu0 %v2850_v39  ;;  %3068 = vmatpush2.msra.mxu1 %v2894_v8 }
 0x4fe   : > { %v2765_v42 = vadd.f32 %v2752_v44, %v2731_v20  ;;  %2784 = vrot.lane.b32.xlu0 %v2783_v57, %s3593_s2  ;;  %2802 = vrot.lane.b32.xlu1 %v2801_v38, %s3594_s11  ;;  %v2819_v32 = vrot.slane %v2769_v17, %v2782_v7  ;;  %s3596_s2 = smov 16   ;;  %v3076_v44 = vld [vmem:[%s6386_s7] sm:$0xff] }
 0x4ff   : > { %3356 = vmatprep.subr.mxu0 %v2865_v3  ;;  %v3083_v20 = vld [vmem:[%s6387_s8] sm:$0x1] }
 0x500   : > { %v2770_v13 = vmax.f32 %v2765_v42, 0.0  ;;  %3357 = vmatpush3.msra.mxu0 %v2849_v33 }
 0x501   : > { %3358 = vmatprep.subr.mxu0 %v2864_v55 }
 0x502   : > { %2820 = vrot.lane.b32.xlu0 %v2819_v32, %s3595_s16  ;;  %v2837_v9 = vrot.slane %v2770_v13, %v2782_v7  ;;  %3359 = vmatpush3.msra.mxu0 %v2848_v60  ;;  %s324_s16 = scalar_lea.vmem [#allocation5], %s323_s20 }
 0x503   : > { %3360 = vmatprep.subr.mxu0 %v2863_v46  ;;  %s3189_s21 = sshll.u32 %s324_s16, 4  ;;  %s3190_s21 = int_to_ptr.vmem [resolvable:$true] %s3189_s21 }
 0x504   : > { %2838 = vrot.lane.b32.xlu1 %v2837_v9, %s3596_s2  ;;  %3361 = vmatpush3.msra.mxu0 %v2847_v23  ;;  %s3486_s25 = scalar_lea.vmem %s3190_s21, 16  ;;  %s3598_s2 = smov [#allocation5]  }
 0x505   : > { %3362 = vmatprep.subr.mxu0 %v2862_v53  ;;  %p3487_p11 = scmp.ne.s32.totalorder %s3190_s21, %s3486_s25  ;;  %s3490_s11 = sshll.u32 %s3598_s2, 4  ;;  %s3491_s11 = int_to_ptr.vmem [resolvable:$false] %s3490_s11 }
 0x506   : > { %3363 = vmatpush3.msra.mxu0 %v2846_v52  ;;  %s3492_s13 = scalar_lea.vmem %s3491_s11, 32  ;;  %p3493_p0 = scmp.lt.s32.totalorder %s3190_s21, %s3491_s11 }
 0x507   : > { %3375 = vmatprep.subr.mxu0 %v6493_v45  ;;  %p3488_p12 = pnand %p3487_p11, %p3687_p5  ;;  %p3494_p1 = scmp.lt.s32.totalorder %s3492_s13, %s3486_s25 }
 0x509   : > { %p3489_p13 = pneg %p3488_p12  ;;  %p3495_p2 = por %p3494_p1, %p3493_p0 }
 0x50b   : > { %p3496_p3 = pnand %p3495_p2, %p3489_p13 }
 0x570   : > { %v2803_v12 = vpop.permute.xlu1 %2802  ;;  %v2785_v18 = vpop.permute.xlu0 %2784 }
 0x571   : > { %v2804_v51 = vrot.slane %v2803_v12, 7  ;;  %v2786_v49 = vrot.slane %v2785_v18, 7 }
 0x573   : > { %v2806_v41 = vsel %vm2805_vm13, %v2804_v51, %v2803_v12  ;;  %v2788_v40 = vsel %vm2787_vm14, %v2786_v49, %v2785_v18 }
 0x574   : > { %2793 = vst.msk [vmem:[#allocation4] sm:$0x3] %vm2792_vm4, %v2788_v40  ;;  %v2821_v4 = vpop.permute.xlu0 %2820 }
 0x575   : > { %v2822_v16 = vrot.slane %v2821_v4, 7  ;;  %2811 = vst.msk [vmem:[#allocation4 + $0x1] sm:$0x3] %vm2810_vm0, %v2806_v41 }
 0x576   : > { %v2839_v21 = vpop.permute.xlu1 %2838 }
 0x577   : > { %v2824_v2 = vsel %vm2823_vm5, %v2822_v16, %v2821_v4 }
 0x578   : > { %2829 = vst.msk [vmem:[#allocation4 + $0x2] sm:$0x3] %vm2828_vm12, %v2824_v2 }
 0x579   : > { %2844 = vst.msk [vmem:[#allocation4 + $0x3] sm:$0x1] %vm2843_vm10, %v2839_v21 }
 0x580   : > { %v2845_v7 = vld [vmem:[#allocation4] sm:$0xf] }
 0x581   : > { %v2918_v56 = vrot.slane %v2845_v7, %v6509_v47  ;;  %v2926_v14 = vrot.slane %v2845_v7, %v2925_v30  ;;  %v2914_v26 = vrot.slane %v2845_v7, %v4700_v27  ;;  %v2922_v37 = vrot.slane %v2845_v7, %v6510_v62  ;;  %v3080_v27 = vld [vmem:[%s6386_s7 + $0x20] sm:$0xff] }
 0x583   : > { %2999 = vmatprep.mubr.f32.mxu0 %v2918_v56  ;;  %3282 = vmatprep.mubr.msk.f32.mxu1 %vm6511_vm7, %v2926_v14 }
 0x584   : > { %3000 = vmatmul.mubr.f32.vlgmr.msra.gmra.mxu0 %v2914_v26  ;;  %3070 = vmatmul.mubr.f32.vlgmr.msra.gmra.mxu1 %v2922_v37 }
 0x585   : > { %3376 = vmatpush3.msk.msra.mxu0 %vm3088_vm6, %v3082_v29  ;;  %3389 = vmatprep.mubr.msk.f32.mxu0 %vm3597_vm8, %v6493_v45 }
 0x586   : > { %3377 = vmatprep.subr.mxu0 %v6493_v45 }
 0x587   : > { %3378 = vmatpush3.msra.mxu0 %v3081_v59 }
 0x588   : > { %3379 = vmatprep.subr.mxu0 %v6493_v45 }
 0x589   : > { %3380 = vmatpush3.msra.mxu0 %v3080_v27 }
 0x58a   : > { %3381 = vmatprep.subr.mxu0 %v6493_v45 }
 0x58b   : > { %3382 = vmatpush3.msra.mxu0 %v3079_v63 }
 0x58c   : > { %3383 = vmatprep.subr.mxu0 %v6493_v45 }
 0x58d   : > { %3384 = vmatpush3.msra.mxu0 %v3078_v6 }
 0x58e   : > { %3385 = vmatprep.subr.mxu0 %v6493_v45 }
 0x58f   : > { %3386 = vmatpush3.msra.mxu0 %v3077_v0 }
 0x590   : > { %3387 = vmatprep.subr.mxu0 %v6493_v45 }
 0x591   : > { %3388 = vmatpush3.msra.mxu0 %v3076_v44 }
 0x644   : > { %v3364_v22 = vpop.f32.mrf.mxu0  ;;  %v3071_v15 = vpop.f32.mrf.mxu1 }
 0x646   : > { %v3365_v24 = vpop.f32.mrf.mxu0  ;;  %v3073_v11 = vpop.f32.mrf.mxu1 }
 0x647   : > { %v3366_v58 = vadd.f32 %v3365_v24, %v3364_v22 }
 0x649   : > { %v3002_v31 = vadd.f32 %v3366_v58, %v2909_v25 }
 0x64b   : > { %v3072_v28 = vadd.f32 %v3071_v15, %v3002_v31 }
 0x64d   : > { %v3075_v5 = vmax.f32 %v3072_v28, 0.0 }
 0x64f   : > { %3390 = vmatmul.mubr.msk.f32.vlgmr.msra.gmra.mxu0 %vm3084_vm9, %v3075_v5 }
 0x70f   : > { %v3158_v45 = vpop.f32.mrf.mxu0 }
 0x710   : > { %v3159_v57 = vadd.f32 %v3158_v45, %v3083_v20 }
 0x711   : > { %v3391_v38 = vpop.f32.mrf.mxu0 }
 0x712   : > { %v3163_v17 = vsel %vm3162_vm11, %v3159_v57, -inf }
 0x713   : > { %3164 = vmax.xlane.f32.xlu0 %v3163_v17 }
 0x79c   : > { %v3165_v19 = vpop.xlane.xlu0 %3164 }
 0x79d   : > { %v3166_v50 = vsub.f32 %v3159_v57, %v3165_v19 }
 0x79f   : > { %v3167_v39 = vmul.f32 1.442695, %v3166_v50 }
 0x7a1   : > { %3482 = vpow2.f32 %v3167_v39 }
 0x7ae   : > { %v3483_v42 = vpop.eup %3482 }
 0x7af   : > { %v3169_v61 = vsel %vm3162_vm11, %v3483_v42, 0.0 }
 0x7b0   : > { %3170 = vadd.xlane.f32.xlu1 %v3169_v61 }
 0x839   : > { %v3171_v3 = vpop.xlane.xlu1 %3170 }
 0x83a   : > { %3484 = vlog2.f32 %v3171_v3 }
 0x847   : > { %v3485_v13 = vpop.eup %3484 }
 0x848   : > { %v3173_v32 = vmul.f32 0.6931472, %v3485_v13 }
 0x84a   : > { %v3174_v33 = vsub.f32 %v3166_v50, %v3173_v32 }
 0x84c   : > { %3175 = vst.msk [vmem:[%s324_s16] sm:$0x1] %vm3162_vm11, %v3174_v33 }
 0x84d   : > { %3499 = shalt.err (!%p3496_p3)
}
 0x84e   : > { %s3500_s15 = scalar_lea.hbm %s3187_s23, 16  ;;  %s3504_s28 = scalar_lea.hbm %s6388_s9, 32 }
 0x84f   : > { %p3501_p4 = scmp.ne.s32.totalorder %s3187_s23, %s3500_s15  ;;  %p3505_p9 = scmp.lt.s32.totalorder %s3187_s23, %s6388_s9 }
 0x850   : > { %p3506_p10 = scmp.lt.s32.totalorder %s3504_s28, %s3500_s15 }
 0x851   : > { %p3502_p7 = pnand %p3501_p4, %p3687_p5 }
 0x852   : > { %p3507_p11 = por %p3506_p10, %p3505_p9 }
 0x853   : > { %p3503_p8 = pneg %p3502_p7 }
 0x855   : > { %p3508_p12 = pnand %p3507_p11, %p3503_p8 }
 0x857   : > { %3511 = shalt.err (!%p3508_p12)
}
 0x858   : > { %3393 = dma.vmem_to_hbm [thread:$0]  (%p3687_p5), %s3190_s21, 16, %s3187_s23, %s3177_s22  }
 0x859 PF: > { %p3399_p13 = scmp.ge.s32.totalorder %s3546_s12, 2  ;;  %s3201_s26 = sand.u32 1, %s3534_s30  }
 0x85a   : > { %s3202_s20 = scalar_lea.sflag [#allocation6], %s3201_s26 }
 0x85b   : > { %p3396_p0 = pnand %p3399_p13, %p3691_p6 }
 0x85d   : > { %p3397_p1 = pneg %p3396_p0 }
 0x85f   : > { %3529 = dma.done.wait (%p3397_p1), %s3202_s20, 16  }
 0x860   : > { %3531 = vsyncadd (%p3397_p1), %s3202_s20, 4294967280  ;;  %s6513_s12 = sld [smem:[#allocation9_spill]]  ;;  %s6516_s30 = smov %s3538_s10 }
 0x861   : > { %s6514_s18 = sld [smem:[#allocation8_spill]] }
 0x862   : > { %s6515_s11 = sld [smem:[#allocation10_spill]] }
 0x866   : > { %p19_p2 = scmp.ge.s32.totalorder %s6513_s12, 4  }
 0x867   : > { %s6517_s10 = smov %s6514_s18 }
 0x868   :  { %21 = sbr.rel (!%p19_p2) target bundleno = 7 (0x7), region = 91 }
 0x86d   :  { %3206 = vsyncpa [#allocation6], 1 }
 0x86e   :  { %3208 = vsyncpa [#allocation6 + $0x1], 1 }

</bundles_post_ra>
